<compile_context>
chip_gen: v5e
topology: v5e:2x2
jax: 0.10.0
libtpu: 0.0.40
codegen_flags: <defaults>
</compile_context>

<pallas_src>
import functools

import jax
import jax.numpy as jnp
from jax import lax
from jax.experimental import pallas as pl
from jax.experimental.pallas import tpu as pltpu


# ---------------------------------------------------------------------------
# Fused forward kernel (one batch tile of nb images).
# ---------------------------------------------------------------------------
def _fused_cnn_kernel(x_ref, w1_ref, b1_ref, w2_ref, b2_ref,
                      wf1_ref, bf1_ref, wf2_ref, bf2_ref,
                      o_ref,
                      xp2_ref, lhs1_ref, lhs2_ref, flat_ref, *, nb):
    # ---- conv1: 32x32x3 -> 32x32x16, ReLU, 2x2 max-pool -> 16x16x16 ----
    for ki in range(3):                                    # stage the 3 vertical taps at
        lhs1_ref[:, ki * 128:(ki + 1) * 128] = (           # 128-aligned lane offsets
            x_ref[:, ki:ki + 32, :].reshape(nb * 32, 128))
    a1 = jnp.dot(lhs1_ref[...], w1_ref[...], preferred_element_type=jnp.float32)
    a1 = jnp.maximum(a1 + b1_ref[...], 0.0)                # (nb*32, 512) lanes = (parity, w', c)
    cm1 = jnp.maximum(a1[:, :256], a1[:, 256:])            # pool over the column pair
    p1 = jnp.max(cm1.reshape(nb, 16, 2, 256), axis=2)      # pool over the row pair -> (nb,16,256)

    # conv2 input: row-padded copy of the pooled conv1 activation (lanes already = (w, c)).
    xp2_ref[:, 0:1, :] = jnp.zeros((nb, 1, 256), xp2_ref.dtype)
    xp2_ref[:, 17:18, :] = jnp.zeros((nb, 1, 256), xp2_ref.dtype)
    xp2_ref[:, 1:17, :] = p1.astype(xp2_ref.dtype)

    # ---- conv2: 16x16x16 -> 16x16x32, ReLU, 2x2 max-pool -> 8x8x32 ----
    for ki in range(3):
        lhs2_ref[:, ki * 256:(ki + 1) * 256] = (
            xp2_ref[:, ki:ki + 16, :].reshape(nb * 16, 256))
    a2 = jnp.dot(lhs2_ref[...], w2_ref[...], preferred_element_type=jnp.float32)
    a2 = jnp.maximum(a2 + b2_ref[...], 0.0)                # (nb*16, 512)
    cm2 = jnp.maximum(a2[:, :256], a2[:, 256:])
    p2 = jnp.max(cm2.reshape(nb, 8, 2, 256), axis=2).astype(jnp.bfloat16)   # (nb, 8, 256)

    # ---- flatten (h, w, c) into lanes, then fc1 + ReLU + fc2 ----
    for i in range(8):
        flat_ref[:, i * 256:(i + 1) * 256] = p2[:, i, :]
    hid = jnp.dot(flat_ref[...], wf1_ref[...], preferred_element_type=jnp.float32)
    hid = jnp.maximum(hid + bf1_ref[...], 0.0)
    logits = jnp.dot(hid.astype(jnp.bfloat16), wf2_ref[...],
                     preferred_element_type=jnp.float32)
    o_ref[:, 0, :] = logits + bf2_ref[...]


# ---------------------------------------------------------------------------
# Parameters: PyTorch layout at init, converted ONCE into kernel-ready form.
# ---------------------------------------------------------------------------
def init_params(key):
    """PyTorch-layout parameters with nn.Conv2d / nn.Linear default uniform init."""
    ks = jax.random.split(key, 8)

    def u(k, shape, fan_in):
        bound = float(fan_in) ** -0.5
        return jax.random.uniform(k, shape, jnp.float32, -bound, bound)

    return {
        "conv1_w": u(ks[0], (16, 3, 3, 3), 3 * 9),
        "conv1_b": u(ks[1], (16,), 3 * 9),
        "conv2_w": u(ks[2], (32, 16, 3, 3), 16 * 9),
        "conv2_b": u(ks[3], (32,), 16 * 9),
        "fc1_w": u(ks[4], (128, 32 * 8 * 8), 32 * 8 * 8),
        "fc1_b": u(ks[5], (128,), 32 * 8 * 8),
        "fc2_w": u(ks[6], (10, 128), 128),
        "fc2_b": u(ks[7], (10,), 128),
    }


def _prep_conv_fullwidth(w, bias, width, lanes_padded):
    """(OC, Cin, 3, 3) torch weights -> one block-Toeplitz (3*Lp, width*OC) matrix.

    LHS rows: one output image row; K = 3 vertical taps x Lp lanes of (w_in, c_in).
    N lanes ordered (col_parity, col//2, c_out) so 2x2 pooling only needs lane slices.
    Horizontal padding is implicit: out-of-range taps are zero weight rows.
    """
    oc, cin = w.shape[0], w.shape[1]
    wt = jnp.transpose(w, (2, 3, 1, 0))                      # (ki, kj, Cin, OC)
    j_in = jnp.arange(width)[:, None]
    j_out = jnp.arange(width)[None, :]
    kj = j_in - j_out + 1                                    # (W_in, W_out)
    valid = ((kj >= 0) & (kj <= 2)).astype(w.dtype)
    kj_c = jnp.clip(kj, 0, 2)
    t = wt[:, kj_c, :, :] * valid[None, :, :, None, None]    # (ki, W_in, W_out, Cin, OC)
    t = jnp.transpose(t, (0, 1, 3, 2, 4))                    # (ki, W_in, Cin, W_out, OC)
    t = t.reshape(3, width, cin, width // 2, 2, oc)          # W_out -> (w_half, parity)
    t = jnp.transpose(t, (0, 1, 2, 4, 3, 5))                 # (ki, W_in, Cin, parity, w_half, OC)
    t = t.reshape(3, width * cin, width * oc)
    t = jnp.pad(t, ((0, 0), (0, lanes_padded - width * cin), (0, 0)))
    w_cat = t.reshape(3 * lanes_padded, width * oc).astype(jnp.bfloat16)
    b_vec = jnp.tile(bias, width).reshape(1, width * oc).astype(jnp.float32)
    return w_cat, b_vec


def prepare_params(params):
    """One-time conversion of PyTorch-layout params into kernel-ready tensors."""
    c1w, c1b = _prep_conv_fullwidth(params["conv1_w"], params["conv1_b"],
                                    width=32, lanes_padded=128)
    c2w, c2b = _prep_conv_fullwidth(params["conv2_w"], params["conv2_b"],
                                    width=16, lanes_padded=256)
    # fc1 consumes NHWC-flattened features; permute its input dim from PyTorch's
    # (C,H,W) flatten order to (H,W,C) so results match x.view(-1, 32*8*8).
    w1 = params["fc1_w"].T.reshape(32, 8, 8, 128).transpose(1, 2, 0, 3).reshape(2048, 128)
    return {
        "conv1_w": c1w, "conv1_b": c1b,
        "conv2_w": c2w, "conv2_b": c2b,
        "fc1_w": w1.astype(jnp.bfloat16),
        "fc1_b": params["fc1_b"].reshape(1, -1).astype(jnp.float32),
        "fc2_w": params["fc2_w"].T.astype(jnp.bfloat16),
        "fc2_b": params["fc2_b"].reshape(1, -1).astype(jnp.float32),
    }


# ---------------------------------------------------------------------------
# Forward pass (matches CNNArchitecture2.forward) -- ONE pallas_call.
# ---------------------------------------------------------------------------
@jax.jit
def forward(prepared, x):
    """x: (B, 3, 32, 32) NCHW float32 -> logits (B, 10) float32."""
    b = x.shape[0]
    nb = max(1, min(16, b // 2))                       # batch tile; keeps >=2 grid steps for B>=2
    xb = x.astype(jnp.bfloat16)
    xh = jnp.transpose(xb, (0, 2, 3, 1)).reshape(b, 32, 96)    # NHWC rows folded as (w, c) lanes
    x1 = jnp.pad(xh, ((0, 0), (1, 1), (0, 32)))                # row pad + lane pad -> (B, 34, 128)

    kernel = functools.partial(_fused_cnn_kernel, nb=nb)
    out = pl.pallas_call(
        kernel,
        out_shape=jax.ShapeDtypeStruct((b, 1, 10), jnp.float32),
        grid=(pl.cdiv(b, nb),),
        in_specs=[
            pl.BlockSpec((nb, 34, 128), lambda i: (i, 0, 0)),   # folded / row-padded input
            pl.BlockSpec((384, 512), lambda i: (0, 0)),         # conv1 block-Toeplitz weight
            pl.BlockSpec((1, 512), lambda i: (0, 0)),           # conv1 bias
            pl.BlockSpec((768, 512), lambda i: (0, 0)),         # conv2 block-Toeplitz weight
            pl.BlockSpec((1, 512), lambda i: (0, 0)),           # conv2 bias
            pl.BlockSpec((2048, 128), lambda i: (0, 0)),        # fc1 weight (HWC-permuted)
            pl.BlockSpec((1, 128), lambda i: (0, 0)),           # fc1 bias
            pl.BlockSpec((128, 10), lambda i: (0, 0)),          # fc2 weight
            pl.BlockSpec((1, 10), lambda i: (0, 0)),            # fc2 bias
        ],
        out_specs=pl.BlockSpec((nb, 1, 10), lambda i: (i, 0, 0)),
        scratch_shapes=[
            pltpu.VMEM((nb, 18, 256), jnp.bfloat16),            # conv2 row-padded input
            pltpu.VMEM((nb * 32, 384), jnp.bfloat16),           # conv1 LHS (3 taps along K)
            pltpu.VMEM((nb * 16, 768), jnp.bfloat16),           # conv2 LHS (3 taps along K)
            pltpu.VMEM((nb, 2048), jnp.bfloat16),               # flattened features for fc1
        ],
        compiler_params=pltpu.CompilerParams(dimension_semantics=("parallel",)),
    )(x1, prepared["conv1_w"], prepared["conv1_b"],
      prepared["conv2_w"], prepared["conv2_b"],
      prepared["fc1_w"], prepared["fc1_b"],
      prepared["fc2_w"], prepared["fc2_b"])
    return out.reshape(b, 10)


def reference_forward(params, x):
    """Pure-JAX f32 reference of the PyTorch module (numerical sanity check)."""
    dn = ("NCHW", "OIHW", "NCHW")
    p = lax.Precision.HIGHEST
    y = lax.conv_general_dilated(x, params["conv1_w"], (1, 1), ((1, 1), (1, 1)),
                                 dimension_numbers=dn, precision=p)
    y = jnp.maximum(y + params["conv1_b"][None, :, None, None], 0.0)
    y = lax.reduce_window(y, -jnp.inf, lax.max, (1, 1, 2, 2), (1, 1, 2, 2), "VALID")
    y = lax.conv_general_dilated(y, params["conv2_w"], (1, 1), ((1, 1), (1, 1)),
                                 dimension_numbers=dn, precision=p)
    y = jnp.maximum(y + params["conv2_b"][None, :, None, None], 0.0)
    y = lax.reduce_window(y, -jnp.inf, lax.max, (1, 1, 2, 2), (1, 1, 2, 2), "VALID")
    y = y.reshape(y.shape[0], -1)
    y = jnp.maximum(jnp.dot(y, params["fc1_w"].T, precision=p) + params["fc1_b"], 0.0)
    return jnp.dot(y, params["fc2_w"].T, precision=p) + params["fc2_b"]


if __name__ == "__main__":
    key = jax.random.PRNGKey(0)
    pkey, xkey = jax.random.split(key)
    params = init_params(pkey)
    prepared = prepare_params(params)
    # fc1 expects 32*8*8 features after two 2x2 pools -> spatial input must be 32x32.
    x = jax.random.normal(xkey, (2, 3, 32, 32), jnp.float32)
    out = jax.block_until_ready(forward(prepared, x))
    assert out.shape == (2, 10) and out.dtype == jnp.float32
    ref = jax.block_until_ready(reference_forward(params, x))
    # bf16 matmul path vs. f32 reference: expected |err| ~1e-2 on O(0.3) logits.
    assert bool(jnp.allclose(out, ref, rtol=5e-2, atol=5e-2)), \
        "Pallas forward deviates from f32 reference beyond bf16 tolerance"
    print("KERNEL_OK")
</pallas_src>

<mosaic_0001>
module attributes {stable_mosaic.version = 11 : i64} {
  func.func @_fused_cnn_kernel(%arg0: i32, %arg1: memref<1x34x128xbf16, #tpu.memory_space<vmem>>, %arg2: memref<384x512xbf16, #tpu.memory_space<vmem>>, %arg3: memref<1x512xf32, #tpu.memory_space<vmem>>, %arg4: memref<768x512xbf16, #tpu.memory_space<vmem>>, %arg5: memref<1x512xf32, #tpu.memory_space<vmem>>, %arg6: memref<2048x128xbf16, #tpu.memory_space<vmem>>, %arg7: memref<1x128xf32, #tpu.memory_space<vmem>>, %arg8: memref<128x10xbf16, #tpu.memory_space<vmem>>, %arg9: memref<1x10xf32, #tpu.memory_space<vmem>>, %arg10: memref<1x1x10xf32, #tpu.memory_space<vmem>>, %arg11: memref<1x18x256xbf16, #tpu.memory_space<vmem>>, %arg12: memref<32x384xbf16, #tpu.memory_space<vmem>>, %arg13: memref<16x768xbf16, #tpu.memory_space<vmem>>, %arg14: memref<1x2048xbf16, #tpu.memory_space<vmem>>) attributes {dimension_semantics = [#tpu.dimension_semantics<parallel>], iteration_bounds = array<i64: 2>, scalar_prefetch = 0 : i64, scratch_operands = 4 : i64, tpu.core_type = #tpu.core_type<tc>, window_params = [{transform_indices = @transform_0, window_bounds = array<i64: 1, 34, 128>}, {pipeline_mode = #tpu.pipeline_mode<synchronous>, transform_indices = @transform_1, window_bounds = array<i64: 384, 512>}, {pipeline_mode = #tpu.pipeline_mode<synchronous>, transform_indices = @transform_2, window_bounds = array<i64: 1, 512>}, {pipeline_mode = #tpu.pipeline_mode<synchronous>, transform_indices = @transform_3, window_bounds = array<i64: 768, 512>}, {pipeline_mode = #tpu.pipeline_mode<synchronous>, transform_indices = @transform_4, window_bounds = array<i64: 1, 512>}, {pipeline_mode = #tpu.pipeline_mode<synchronous>, transform_indices = @transform_5, window_bounds = array<i64: 2048, 128>}, {pipeline_mode = #tpu.pipeline_mode<synchronous>, transform_indices = @transform_6, window_bounds = array<i64: 1, 128>}, {pipeline_mode = #tpu.pipeline_mode<synchronous>, transform_indices = @transform_7, window_bounds = array<i64: 128, 10>}, {pipeline_mode = #tpu.pipeline_mode<synchronous>, transform_indices = @transform_8, window_bounds = array<i64: 1, 10>}, {transform_indices = @transform_9, window_bounds = array<i64: 1, 1, 10>}]} {
    %c0 = arith.constant 0 : index
    %c0_0 = arith.constant 0 : index
    %c0_1 = arith.constant 0 : index
    %0 = vector.load %arg1[%c0, %c0_0, %c0_1] : memref<1x34x128xbf16, #tpu.memory_space<vmem>>, vector<1x32x128xbf16>
    %1 = vector.shape_cast %0 : vector<1x32x128xbf16> to vector<32x128xbf16>
    %c0_2 = arith.constant 0 : index
    %c0_3 = arith.constant 0 : index
    %2 = vector.load %arg12[%c0_2, %c0_3] : memref<32x384xbf16, #tpu.memory_space<vmem>>, vector<32x128xbf16>
    tpu.vector_store %arg12[%c0_2, %c0_3], %1 {strides = array<i32>} : memref<32x384xbf16, #tpu.memory_space<vmem>>, vector<32x128xbf16>,
    %c0_4 = arith.constant 0 : index
    %c1 = arith.constant 1 : index
    %c0_5 = arith.constant 0 : index
    %3 = vector.load %arg1[%c0_4, %c1, %c0_5] : memref<1x34x128xbf16, #tpu.memory_space<vmem>>, vector<1x32x128xbf16>
    %4 = vector.shape_cast %3 : vector<1x32x128xbf16> to vector<32x128xbf16>
    %c0_6 = arith.constant 0 : index
    %c128 = arith.constant 128 : index
    %5 = vector.load %arg12[%c0_6, %c128] : memref<32x384xbf16, #tpu.memory_space<vmem>>, vector<32x128xbf16>
    tpu.vector_store %arg12[%c0_6, %c128], %4 {strides = array<i32>} : memref<32x384xbf16, #tpu.memory_space<vmem>>, vector<32x128xbf16>,
    %c0_7 = arith.constant 0 : index
    %c2 = arith.constant 2 : index
    %c0_8 = arith.constant 0 : index
    %6 = vector.load %arg1[%c0_7, %c2, %c0_8] : memref<1x34x128xbf16, #tpu.memory_space<vmem>>, vector<1x32x128xbf16>
    %7 = vector.shape_cast %6 : vector<1x32x128xbf16> to vector<32x128xbf16>
    %c0_9 = arith.constant 0 : index
    %c256 = arith.constant 256 : index
    %8 = vector.load %arg12[%c0_9, %c256] : memref<32x384xbf16, #tpu.memory_space<vmem>>, vector<32x128xbf16>
    tpu.vector_store %arg12[%c0_9, %c256], %7 {strides = array<i32>} : memref<32x384xbf16, #tpu.memory_space<vmem>>, vector<32x128xbf16>,
    %c0_10 = arith.constant 0 : index
    %c0_11 = arith.constant 0 : index
    %9 = vector.load %arg12[%c0_10, %c0_11] : memref<32x384xbf16, #tpu.memory_space<vmem>>, vector<32x384xbf16>
    %c0_12 = arith.constant 0 : index
    %c0_13 = arith.constant 0 : index
    %10 = vector.load %arg2[%c0_12, %c0_13] : memref<384x512xbf16, #tpu.memory_space<vmem>>, vector<384x512xbf16>
    %cst = arith.constant dense<0.000000e+00> : vector<32x512xf32>
    %11 = tpu.matmul %9, %10, %cst {dimension_numbers = #tpu.dot_dimension_numbers<[1], [0], [0], [1], [0, 0, 1, 1], [], []>} : vector<32x384xbf16>, vector<384x512xbf16>, vector<32x512xf32> -> vector<32x512xf32>
    %c0_14 = arith.constant 0 : index
    %c0_15 = arith.constant 0 : index
    %12 = vector.load %arg3[%c0_14, %c0_15] : memref<1x512xf32, #tpu.memory_space<vmem>>, vector<1x512xf32>
    %13 = vector.broadcast %12 : vector<1x512xf32> to vector<32x512xf32>
    %14 = arith.addf %11, %13 : vector<32x512xf32>
    %cst_16 = arith.constant 0.000000e+00 : f32
    %15 = vector.broadcast %cst_16 : f32 to vector<32x512xf32>
    %16 = arith.maximumf %14, %15 : vector<32x512xf32>
    %17 = vector.extract_strided_slice %16 {offsets = [0, 0], sizes = [32, 256], strides = [1, 1]} : vector<32x512xf32> to vector<32x256xf32>
    %18 = vector.extract_strided_slice %16 {offsets = [0, 256], sizes = [32, 256], strides = [1, 1]} : vector<32x512xf32> to vector<32x256xf32>
    %19 = arith.maximumf %17, %18 : vector<32x256xf32>
    %20 = vector.shape_cast %19 : vector<32x256xf32> to vector<1x16x2x256xf32>
    %cst_17 = arith.constant dense<0xFF800000> : vector<1x16x256xf32>
    %21 = vector.multi_reduction <maximumf>, %20, %cst_17 [2] : vector<1x16x2x256xf32> to vector<1x16x256xf32>
    %cst_18 = arith.constant 0.000000e+00 : bf16
    %22 = vector.broadcast %cst_18 : bf16 to vector<1x1x256xbf16>
    %c0_19 = arith.constant 0 : index
    %c0_20 = arith.constant 0 : index
    %c0_21 = arith.constant 0 : index
    %23 = vector.load %arg11[%c0_19, %c0_20, %c0_21] : memref<1x18x256xbf16, #tpu.memory_space<vmem>>, vector<1x1x256xbf16>
    tpu.vector_store %arg11[%c0_19, %c0_20, %c0_21], %22 {strides = array<i32>} : memref<1x18x256xbf16, #tpu.memory_space<vmem>>, vector<1x1x256xbf16>,
    %cst_22 = arith.constant 0.000000e+00 : bf16
    %24 = vector.broadcast %cst_22 : bf16 to vector<1x1x256xbf16>
    %c0_23 = arith.constant 0 : index
    %c17 = arith.constant 17 : index
    %c0_24 = arith.constant 0 : index
    %25 = vector.load %arg11[%c0_23, %c17, %c0_24] : memref<1x18x256xbf16, #tpu.memory_space<vmem>>, vector<1x1x256xbf16>
    tpu.vector_store %arg11[%c0_23, %c17, %c0_24], %24 {strides = array<i32>} : memref<1x18x256xbf16, #tpu.memory_space<vmem>>, vector<1x1x256xbf16>,
    %26 = arith.truncf %21 : vector<1x16x256xf32> to vector<1x16x256xbf16>
    %c0_25 = arith.constant 0 : index
    %c1_26 = arith.constant 1 : index
    %c0_27 = arith.constant 0 : index
    %27 = vector.load %arg11[%c0_25, %c1_26, %c0_27] : memref<1x18x256xbf16, #tpu.memory_space<vmem>>, vector<1x16x256xbf16>
    tpu.vector_store %arg11[%c0_25, %c1_26, %c0_27], %26 {strides = array<i32>} : memref<1x18x256xbf16, #tpu.memory_space<vmem>>, vector<1x16x256xbf16>,
    %c0_28 = arith.constant 0 : index
    %c0_29 = arith.constant 0 : index
    %c0_30 = arith.constant 0 : index
    %28 = vector.load %arg11[%c0_28, %c0_29, %c0_30] : memref<1x18x256xbf16, #tpu.memory_space<vmem>>, vector<1x16x256xbf16>
    %29 = vector.shape_cast %28 : vector<1x16x256xbf16> to vector<16x256xbf16>
    %c0_31 = arith.constant 0 : index
    %c0_32 = arith.constant 0 : index
    %30 = vector.load %arg13[%c0_31, %c0_32] : memref<16x768xbf16, #tpu.memory_space<vmem>>, vector<16x256xbf16>
    tpu.vector_store %arg13[%c0_31, %c0_32], %29 {strides = array<i32>} : memref<16x768xbf16, #tpu.memory_space<vmem>>, vector<16x256xbf16>,
    %c0_33 = arith.constant 0 : index
    %c1_34 = arith.constant 1 : index
    %c0_35 = arith.constant 0 : index
    %31 = vector.load %arg11[%c0_33, %c1_34, %c0_35] : memref<1x18x256xbf16, #tpu.memory_space<vmem>>, vector<1x16x256xbf16>
    %32 = vector.shape_cast %31 : vector<1x16x256xbf16> to vector<16x256xbf16>
    %c0_36 = arith.constant 0 : index
    %c256_37 = arith.constant 256 : index
    %33 = vector.load %arg13[%c0_36, %c256_37] : memref<16x768xbf16, #tpu.memory_space<vmem>>, vector<16x256xbf16>
    tpu.vector_store %arg13[%c0_36, %c256_37], %32 {strides = array<i32>} : memref<16x768xbf16, #tpu.memory_space<vmem>>, vector<16x256xbf16>,
    %c0_38 = arith.constant 0 : index
    %c2_39 = arith.constant 2 : index
    %c0_40 = arith.constant 0 : index
    %34 = vector.load %arg11[%c0_38, %c2_39, %c0_40] : memref<1x18x256xbf16, #tpu.memory_space<vmem>>, vector<1x16x256xbf16>
    %35 = vector.shape_cast %34 : vector<1x16x256xbf16> to vector<16x256xbf16>
    %c0_41 = arith.constant 0 : index
    %c512 = arith.constant 512 : index
    %36 = vector.load %arg13[%c0_41, %c512] : memref<16x768xbf16, #tpu.memory_space<vmem>>, vector<16x256xbf16>
    tpu.vector_store %arg13[%c0_41, %c512], %35 {strides = array<i32>} : memref<16x768xbf16, #tpu.memory_space<vmem>>, vector<16x256xbf16>,
    %c0_42 = arith.constant 0 : index
    %c0_43 = arith.constant 0 : index
    %37 = vector.load %arg13[%c0_42, %c0_43] : memref<16x768xbf16, #tpu.memory_space<vmem>>, vector<16x768xbf16>
    %c0_44 = arith.constant 0 : index
    %c0_45 = arith.constant 0 : index
    %38 = vector.load %arg4[%c0_44, %c0_45] : memref<768x512xbf16, #tpu.memory_space<vmem>>, vector<768x512xbf16>
    %cst_46 = arith.constant dense<0.000000e+00> : vector<16x512xf32>
    %39 = tpu.matmul %37, %38, %cst_46 {dimension_numbers = #tpu.dot_dimension_numbers<[1], [0], [0], [1], [0, 0, 1, 1], [], []>} : vector<16x768xbf16>, vector<768x512xbf16>, vector<16x512xf32> -> vector<16x512xf32>
    %c0_47 = arith.constant 0 : index
    %c0_48 = arith.constant 0 : index
    %40 = vector.load %arg5[%c0_47, %c0_48] : memref<1x512xf32, #tpu.memory_space<vmem>>, vector<1x512xf32>
    %41 = vector.broadcast %40 : vector<1x512xf32> to vector<16x512xf32>
    %42 = arith.addf %39, %41 : vector<16x512xf32>
    %cst_49 = arith.constant 0.000000e+00 : f32
    %43 = vector.broadcast %cst_49 : f32 to vector<16x512xf32>
    %44 = arith.maximumf %42, %43 : vector<16x512xf32>
    %45 = vector.extract_strided_slice %44 {offsets = [0, 0], sizes = [16, 256], strides = [1, 1]} : vector<16x512xf32> to vector<16x256xf32>
    %46 = vector.extract_strided_slice %44 {offsets = [0, 256], sizes = [16, 256], strides = [1, 1]} : vector<16x512xf32> to vector<16x256xf32>
    %47 = arith.maximumf %45, %46 : vector<16x256xf32>
    %48 = vector.shape_cast %47 : vector<16x256xf32> to vector<1x8x2x256xf32>
    %cst_50 = arith.constant dense<0xFF800000> : vector<1x8x256xf32>
    %49 = vector.multi_reduction <maximumf>, %48, %cst_50 [2] : vector<1x8x2x256xf32> to vector<1x8x256xf32>
    %50 = arith.truncf %49 : vector<1x8x256xf32> to vector<1x8x256xbf16>
    %51 = vector.extract_strided_slice %50 {offsets = [0, 0, 0], sizes = [1, 1, 256], strides = [1, 1, 1]} : vector<1x8x256xbf16> to vector<1x1x256xbf16>
    %52 = vector.shape_cast %51 : vector<1x1x256xbf16> to vector<1x256xbf16>
    %c0_51 = arith.constant 0 : index
    %c0_52 = arith.constant 0 : index
    %53 = vector.load %arg14[%c0_51, %c0_52] : memref<1x2048xbf16, #tpu.memory_space<vmem>>, vector<1x256xbf16>
    tpu.vector_store %arg14[%c0_51, %c0_52], %52 {strides = array<i32>} : memref<1x2048xbf16, #tpu.memory_space<vmem>>, vector<1x256xbf16>,
    %54 = vector.extract_strided_slice %50 {offsets = [0, 1, 0], sizes = [1, 1, 256], strides = [1, 1, 1]} : vector<1x8x256xbf16> to vector<1x1x256xbf16>
    %55 = vector.shape_cast %54 : vector<1x1x256xbf16> to vector<1x256xbf16>
    %c0_53 = arith.constant 0 : index
    %c256_54 = arith.constant 256 : index
    %56 = vector.load %arg14[%c0_53, %c256_54] : memref<1x2048xbf16, #tpu.memory_space<vmem>>, vector<1x256xbf16>
    tpu.vector_store %arg14[%c0_53, %c256_54], %55 {strides = array<i32>} : memref<1x2048xbf16, #tpu.memory_space<vmem>>, vector<1x256xbf16>,
    %57 = vector.extract_strided_slice %50 {offsets = [0, 2, 0], sizes = [1, 1, 256], strides = [1, 1, 1]} : vector<1x8x256xbf16> to vector<1x1x256xbf16>
    %58 = vector.shape_cast %57 : vector<1x1x256xbf16> to vector<1x256xbf16>
    %c0_55 = arith.constant 0 : index
    %c512_56 = arith.constant 512 : index
    %59 = vector.load %arg14[%c0_55, %c512_56] : memref<1x2048xbf16, #tpu.memory_space<vmem>>, vector<1x256xbf16>
    tpu.vector_store %arg14[%c0_55, %c512_56], %58 {strides = array<i32>} : memref<1x2048xbf16, #tpu.memory_space<vmem>>, vector<1x256xbf16>,
    %60 = vector.extract_strided_slice %50 {offsets = [0, 3, 0], sizes = [1, 1, 256], strides = [1, 1, 1]} : vector<1x8x256xbf16> to vector<1x1x256xbf16>
    %61 = vector.shape_cast %60 : vector<1x1x256xbf16> to vector<1x256xbf16>
    %c0_57 = arith.constant 0 : index
    %c768 = arith.constant 768 : index
    %62 = vector.load %arg14[%c0_57, %c768] : memref<1x2048xbf16, #tpu.memory_space<vmem>>, vector<1x256xbf16>
    tpu.vector_store %arg14[%c0_57, %c768], %61 {strides = array<i32>} : memref<1x2048xbf16, #tpu.memory_space<vmem>>, vector<1x256xbf16>,
    %63 = vector.extract_strided_slice %50 {offsets = [0, 4, 0], sizes = [1, 1, 256], strides = [1, 1, 1]} : vector<1x8x256xbf16> to vector<1x1x256xbf16>
    %64 = vector.shape_cast %63 : vector<1x1x256xbf16> to vector<1x256xbf16>
    %c0_58 = arith.constant 0 : index
    %c1024 = arith.constant 1024 : index
    %65 = vector.load %arg14[%c0_58, %c1024] : memref<1x2048xbf16, #tpu.memory_space<vmem>>, vector<1x256xbf16>
    tpu.vector_store %arg14[%c0_58, %c1024], %64 {strides = array<i32>} : memref<1x2048xbf16, #tpu.memory_space<vmem>>, vector<1x256xbf16>,
    %66 = vector.extract_strided_slice %50 {offsets = [0, 5, 0], sizes = [1, 1, 256], strides = [1, 1, 1]} : vector<1x8x256xbf16> to vector<1x1x256xbf16>
    %67 = vector.shape_cast %66 : vector<1x1x256xbf16> to vector<1x256xbf16>
    %c0_59 = arith.constant 0 : index
    %c1280 = arith.constant 1280 : index
    %68 = vector.load %arg14[%c0_59, %c1280] : memref<1x2048xbf16, #tpu.memory_space<vmem>>, vector<1x256xbf16>
    tpu.vector_store %arg14[%c0_59, %c1280], %67 {strides = array<i32>} : memref<1x2048xbf16, #tpu.memory_space<vmem>>, vector<1x256xbf16>,
    %69 = vector.extract_strided_slice %50 {offsets = [0, 6, 0], sizes = [1, 1, 256], strides = [1, 1, 1]} : vector<1x8x256xbf16> to vector<1x1x256xbf16>
    %70 = vector.shape_cast %69 : vector<1x1x256xbf16> to vector<1x256xbf16>
    %c0_60 = arith.constant 0 : index
    %c1536 = arith.constant 1536 : index
    %71 = vector.load %arg14[%c0_60, %c1536] : memref<1x2048xbf16, #tpu.memory_space<vmem>>, vector<1x256xbf16>
    tpu.vector_store %arg14[%c0_60, %c1536], %70 {strides = array<i32>} : memref<1x2048xbf16, #tpu.memory_space<vmem>>, vector<1x256xbf16>,
    %72 = vector.extract_strided_slice %50 {offsets = [0, 7, 0], sizes = [1, 1, 256], strides = [1, 1, 1]} : vector<1x8x256xbf16> to vector<1x1x256xbf16>
    %73 = vector.shape_cast %72 : vector<1x1x256xbf16> to vector<1x256xbf16>
    %c0_61 = arith.constant 0 : index
    %c1792 = arith.constant 1792 : index
    %74 = vector.load %arg14[%c0_61, %c1792] : memref<1x2048xbf16, #tpu.memory_space<vmem>>, vector<1x256xbf16>
    tpu.vector_store %arg14[%c0_61, %c1792], %73 {strides = array<i32>} : memref<1x2048xbf16, #tpu.memory_space<vmem>>, vector<1x256xbf16>,
    %c0_62 = arith.constant 0 : index
    %c0_63 = arith.constant 0 : index
    %75 = vector.load %arg14[%c0_62, %c0_63] : memref<1x2048xbf16, #tpu.memory_space<vmem>>, vector<1x2048xbf16>
    %c0_64 = arith.constant 0 : index
    %c0_65 = arith.constant 0 : index
    %76 = vector.load %arg6[%c0_64, %c0_65] : memref<2048x128xbf16, #tpu.memory_space<vmem>>, vector<2048x128xbf16>
    %cst_66 = arith.constant dense<0.000000e+00> : vector<1x128xf32>
    %77 = tpu.matmul %75, %76, %cst_66 {dimension_numbers = #tpu.dot_dimension_numbers<[1], [0], [0], [1], [0, 0, 1, 1], [], []>} : vector<1x2048xbf16>, vector<2048x128xbf16>, vector<1x128xf32> -> vector<1x128xf32>
    %c0_67 = arith.constant 0 : index
    %c0_68 = arith.constant 0 : index
    %78 = vector.load %arg7[%c0_67, %c0_68] : memref<1x128xf32, #tpu.memory_space<vmem>>, vector<1x128xf32>
    %79 = arith.addf %77, %78 : vector<1x128xf32>
    %cst_69 = arith.constant 0.000000e+00 : f32
    %80 = vector.broadcast %cst_69 : f32 to vector<1x128xf32>
    %81 = arith.maximumf %79, %80 : vector<1x128xf32>
    %82 = arith.truncf %81 : vector<1x128xf32> to vector<1x128xbf16>
    %c0_70 = arith.constant 0 : index
    %c0_71 = arith.constant 0 : index
    %83 = vector.load %arg8[%c0_70, %c0_71] : memref<128x10xbf16, #tpu.memory_space<vmem>>, vector<128x10xbf16>
    %cst_72 = arith.constant dense<0.000000e+00> : vector<1x10xf32>
    %84 = tpu.matmul %82, %83, %cst_72 {dimension_numbers = #tpu.dot_dimension_numbers<[1], [0], [0], [1], [0, 0, 1, 1], [], []>} : vector<1x128xbf16>, vector<128x10xbf16>, vector<1x10xf32> -> vector<1x10xf32>
    %c0_73 = arith.constant 0 : index
    %c0_74 = arith.constant 0 : index
    %85 = vector.load %arg9[%c0_73, %c0_74] : memref<1x10xf32, #tpu.memory_space<vmem>>, vector<1x10xf32>
    %86 = arith.addf %84, %85 : vector<1x10xf32>
    %c0_75 = arith.constant 0 : index
    %c0_76 = arith.constant 0 : index
    %c0_77 = arith.constant 0 : index
    %87 = vector.load %arg10[%c0_75, %c0_76, %c0_77] : memref<1x1x10xf32, #tpu.memory_space<vmem>>, vector<1x1x10xf32>
    %88 = vector.shape_cast %87 : vector<1x1x10xf32> to vector<1x10xf32>
    %89 = vector.shape_cast %86 : vector<1x10xf32> to vector<1x1x10xf32>
    tpu.vector_store %arg10[%c0_75, %c0_76, %c0_77], %89 {strides = array<i32>} : memref<1x1x10xf32, #tpu.memory_space<vmem>>, vector<1x1x10xf32>,
    return
  }
  func.func @transform_0(%arg0: i32) -> (i32, i32, i32) {
    %c0_i32 = arith.constant 0 : i32
    %c0_i32_0 = arith.constant 0 : i32
    %c0_i32_1 = arith.constant 0 : i32
    return %arg0, %c0_i32, %c0_i32_0 : i32, i32, i32
  }
  func.func @transform_1(%arg0: i32) -> (i32, i32) {
    %c0_i32 = arith.constant 0 : i32
    %c0_i32_0 = arith.constant 0 : i32
    %c0_i32_1 = arith.constant 0 : i32
    return %c0_i32, %c0_i32_0 : i32, i32
  }
  func.func @transform_2(%arg0: i32) -> (i32, i32) {
    %c0_i32 = arith.constant 0 : i32
    %c0_i32_0 = arith.constant 0 : i32
    %c0_i32_1 = arith.constant 0 : i32
    return %c0_i32, %c0_i32_0 : i32, i32
  }
  func.func @transform_3(%arg0: i32) -> (i32, i32) {
    %c0_i32 = arith.constant 0 : i32
    %c0_i32_0 = arith.constant 0 : i32
    %c0_i32_1 = arith.constant 0 : i32
    return %c0_i32, %c0_i32_0 : i32, i32
  }
  func.func @transform_4(%arg0: i32) -> (i32, i32) {
    %c0_i32 = arith.constant 0 : i32
    %c0_i32_0 = arith.constant 0 : i32
    %c0_i32_1 = arith.constant 0 : i32
    return %c0_i32, %c0_i32_0 : i32, i32
  }
  func.func @transform_5(%arg0: i32) -> (i32, i32) {
    %c0_i32 = arith.constant 0 : i32
    %c0_i32_0 = arith.constant 0 : i32
    %c0_i32_1 = arith.constant 0 : i32
    return %c0_i32, %c0_i32_0 : i32, i32
  }
  func.func @transform_6(%arg0: i32) -> (i32, i32) {
    %c0_i32 = arith.constant 0 : i32
    %c0_i32_0 = arith.constant 0 : i32
    %c0_i32_1 = arith.constant 0 : i32
    return %c0_i32, %c0_i32_0 : i32, i32
  }
  func.func @transform_7(%arg0: i32) -> (i32, i32) {
    %c0_i32 = arith.constant 0 : i32
    %c0_i32_0 = arith.constant 0 : i32
    %c0_i32_1 = arith.constant 0 : i32
    return %c0_i32, %c0_i32_0 : i32, i32
  }
  func.func @transform_8(%arg0: i32) -> (i32, i32) {
    %c0_i32 = arith.constant 0 : i32
    %c0_i32_0 = arith.constant 0 : i32
    %c0_i32_1 = arith.constant 0 : i32
    return %c0_i32, %c0_i32_0 : i32, i32
  }
  func.func @transform_9(%arg0: i32) -> (i32, i32, i32) {
    %c0_i32 = arith.constant 0 : i32
    %c0_i32_0 = arith.constant 0 : i32
    %c0_i32_1 = arith.constant 0 : i32
    return %arg0, %c0_i32, %c0_i32_0 : i32, i32, i32
  }
}

</mosaic_0001>

<bundles_post_ra>
// kernel: forward.1
= control target key start
LH: loop header
LB: loop body
LE: loop exit
PB: predicated region body
PF: predicated region fallthrough
CT: control target
= control target key end

     0   :  { %s8586_s0 = inlined_call_operand.vmem [shape: bf16[2,34,128], index: 0, kind: input, shape index: {}]   ;;  %s8587_s1 = inlined_call_operand.hbm [shape: bf16[384,512], index: 1, kind: input, shape index: {}]   ;;  %s8588_s2 = inlined_call_operand.vmem [shape: f32[1,512], index: 2, kind: input, shape index: {}]   ;;  %s8589_s3 = inlined_call_operand.hbm [shape: bf16[768,512], index: 3, kind: input, shape index: {}]   ;;  %s8590_s4 = inlined_call_operand.vmem [shape: f32[1,512], index: 4, kind: input, shape index: {}]   ;;  %s8591_s5 = inlined_call_operand.hbm [shape: bf16[2048,128], index: 5, kind: input, shape index: {}]   ;;  %s8592_s6 = inlined_call_operand.vmem [shape: f32[1,128], index: 6, kind: input, shape index: {}]   ;;  %s8593_s7 = inlined_call_operand.vmem [shape: bf16[128,10], index: 7, kind: input, shape index: {}]   ;;  %s8594_s8 = inlined_call_operand.vmem [shape: f32[1,10], index: 8, kind: input, shape index: {}]   ;;  %s8595_s9 = inlined_call_operand.hbm [shape: f32[2,1,10], index: 9, kind: output, shape index: {}]  }
   0x1   :  { %8604 = sst [smem:[#allocation18_spill]] %s8587_s1 }
   0x2   :  { %8605 = sst [smem:[#allocation19_spill]] %s8589_s3 }
   0x3   :  { %14 = vsyncpa [#allocation7], 0 }
   0x4   :  { %15 = vsyncpa [#allocation10], 0 }
   0x5   :  { %16 = vsyncpa [#allocation8], 0 }
   0x6   :  { %18 = vsyncpa [#allocation8 + $0x1], 0  ;;  %s7640_s30 = smov 0   ;;  %s7642_s10 = smov 0  }
   0x7   :  { %s7644_s11 = smov 0   ;;  %s7646_s12 = smov 0  }
   0x8 LB: > { %8606 = sst [smem:[#allocation16_spill]] %s7577_s11  ;;  %s7661_s13 = sadd.s32 4294967295, %s7581_s12   ;;  %s7581_s12 = sphi %s7646_s12, %s8671_s12   ;;  %s7577_s11 = sphi %s7644_s11, %s8668_s11   ;;  %s7573_s10 = sphi %s7642_s10, %s8670_s10   ;;  %s7569_s30 = sphi %s7640_s30, %s8669_s30  }
   0x9   : > { %s5151_s14 = sadd.s32 4294967294, %s7581_s12   ;;  %s7665_s15 = sadd.s32 1, %s7581_s12  }
   0xa   : > { %s225_s16 = sadd.s32 1, %s7577_s11  ;;  %s222_s17 = ssub.s32 %s7581_s12, %s7665_s15 }
   0xb   : > { %p235_p0 = scmp.ne.s32.totalorder %s7577_s11, %s7573_s10  ;;  %p223_p1 = scmp.eq.s32.totalorder %s222_s17, 0 }
   0xc   : > { %p236_p2 = scmp.eq.s32.totalorder %s7661_s13, 1  ;;  %p241_p3 = scmp.ne.s32.totalorder %s7573_s10, %s7569_s30 }
   0xd   : > { %p242_p4 = scmp.eq.s32.totalorder %s5151_s14, 1  ;;  %p5152_p7 = scmp.ge.s32.totalorder %s7581_s12, 1 }
   0xe   : > { %s7676_s18 = scalar_select %p223_p1, %s7577_s11, %s225_s16  }
   0xf   : > { %p7678_p5 = por %p236_p2, %p235_p0  ;;  %p7682_p6 = por %p242_p4, %p241_p3 }
  0x10   : > { %8607 = sst [smem:[#allocation17_spill]] %s7676_s18  ;;  %p249_p8 = scmp.lt.s32.totalorder %s7581_s12, 3 }
  0x11   : > { %p7375_p9 = scmp.eq.s32.totalorder %s7661_s13, 0  ;;  %s8611_s3 = sld [smem:[#allocation19_spill]] }
  0x12   : > { %p7689_p10 = pnand %p5152_p7, %p249_p8  ;;  %s8612_s1 = sld [smem:[#allocation18_spill]] }
  0x13   : > { %s7583_s29 = smov [#allocation9]   ;;  %s7584_s16 = smov 256  }
  0x14   : > { %p7361_p11 = pneg %p7689_p10  ;;  %s279_s14 = sshll.u32 %s7583_s29, 4  ;;  %s280_s14 = int_to_ptr.vmem [resolvable:$true] %s279_s14 }
  0x15   : > { %s7585_s17 = smov 16   ;;  %s7586_s22 = smov [#allocation6]  }
  0x16   : > { %p7703_p12 = pnand %p7375_p9, %p7361_p11  ;;  %s262_s23 = sshll.u32 %s7586_s22, 4  ;;  %s263_s23 = int_to_ptr.vmem [resolvable:$true] %s262_s23 }
  0x17   : > { %s277_s24 = sshll.u32 %s8611_s3, 4  ;;  %s7587_s3 = smov [#allocation11]   ;;  %s278_s24 = int_to_ptr.hbm [resolvable:$true] %s277_s24 }
  0x18   : > { %s260_s27 = sshll.u32 %s8612_s1, 4  ;;  %s294_s1 = sshll.u32 %s8591_s5, 4  ;;  %s261_s27 = int_to_ptr.hbm [resolvable:$true] %s260_s27  ;;  %s295_s1 = int_to_ptr.hbm [resolvable:$true] %s294_s1 }
  0x19   : > { %7367 = dma.hbm_to_vmem [thread:$0]  (!%p7703_p12), %s278_s24, 24576, %s280_s14, [#allocation10], %s7584_s16, %s7584_s16, %s7585_s17  }
  0x1a   : > { %7364 = dma.hbm_to_vmem [thread:$0]  (!%p7703_p12), %s261_s27, 12288, %s263_s23, [#allocation7], %s7584_s16, %s7584_s16, %s7585_s17  }
  0x1b   : > { %s296_s18 = sshll.u32 %s7587_s3, 4  ;;  %s7588_s29 = smov 64   ;;  %s297_s18 = int_to_ptr.vmem [resolvable:$true] %s296_s18 }
  0x1c   : > { %s7589_s11 = smov 4   ;;  %329 = sbr.rel (%p7689_p10) target bundleno = 1128 (0x468), region = 56 }
  0x1d   : > { %7370 = dma.hbm_to_vmem [thread:$0]  (!%p7703_p12), %s295_s1, 16384, %s297_s18, [#allocation10], %s7588_s29, %s7588_s29, %s7589_s11  }
  0x21   : > { %7556 = dma.done.wait (%p7375_p9), [#allocation7], 12288  }
  0x22   : > { %7558 = vsyncadd (%p7375_p9), [#allocation7], 4294955008 }
  0x23   : > { %7560 = dma.done.wait (%p7375_p9), [#allocation10], 40960  }
  0x24   : > { %7562 = vsyncadd (%p7375_p9), [#allocation10], 4294926336  ;;  %p375_p13 = scmp.lt.s32.totalorder %s7661_s13, 1  ;;  %v5301_v0 = vld [vmem:[#allocation6 + $0xe0] sm:$0xf]  ;;  %vm459_vm0 = vcmask 1042432   ;;  %s5061_s26 = scalar_lea.hbm %s8595_s9, %s7661_s13 }
  0x25   : > { %v6946_v1 = vld [vmem:[#allocation6 + $0xec] sm:$0xf0]  ;;  %v5429_v2 = vld [vmem:[#allocation6 + $0x1e0] sm:$0xf]  ;;  %v6944_v9 = vld [vmem:[#allocation6 + $0xe4] sm:$0xf] }
  0x26   : > { %v5302_v3 = vor.u32 %v6946_v1, %v5301_v0  ;;  %v6978_v4 = vld [vmem:[#allocation6 + $0x1ec] sm:$0xf0]  ;;  %v5557_v5 = vld [vmem:[#allocation6 + $0x2e0] sm:$0xf]  ;;  %v5303_v10 = vld [vmem:[#allocation6 + $0xf0] sm:$0xf0] }
  0x27   : > { %v7010_v6 = vld [vmem:[#allocation6 + $0x2ec] sm:$0xf0]  ;;  %v5430_v7 = vor.u32 %v6978_v4, %v5429_v2  ;;  %v5285_v11 = vld [vmem:[#allocation6 + $0xc0] sm:$0xf]  ;;  %v5306_v12 = vor.u32 %v6944_v9, %v5303_v10  ;;  %v6940_v20 = vld [vmem:[#allocation6 + $0xc4] sm:$0xf] }
  0x28   : > { %v5558_v8 = vor.u32 %v7010_v6, %v5557_v5  ;;  %1109 = vmatpush.bf16.msra.mxu0 %v5302_v3  ;;  %v6942_v13 = vld [vmem:[#allocation6 + $0xcc] sm:$0xf0]  ;;  %v5413_v14 = vld [vmem:[#allocation6 + $0x1c0] sm:$0xf]  ;;  %v5287_v22 = vld [vmem:[#allocation6 + $0xd0] sm:$0xf0] }
  0x29   : > { %v6974_v15 = vld [vmem:[#allocation6 + $0x1cc] sm:$0xf0]  ;;  %1128 = vmatpush.bf16.msra.mxu1 %v5430_v7  ;;  %v5286_v16 = vor.u32 %v6942_v13, %v5285_v11  ;;  %v5541_v18 = vld [vmem:[#allocation6 + $0x2c0] sm:$0xf]  ;;  %1166 = vmatpush.bf16.msra.mxu3 %v5306_v12  ;;  %v5290_v25 = vor.u32 %v6940_v20, %v5287_v22  ;;  %v6936_v31 = vld [vmem:[#allocation6 + $0xa4] sm:$0xf] }
  0x2a   : > { %1147 = vmatpush.bf16.msra.mxu2 %v5558_v8  ;;  %v5414_v17 = vor.u32 %v6974_v15, %v5413_v14  ;;  %v7006_v19 = vld [vmem:[#allocation6 + $0x2cc] sm:$0xf0]  ;;  %v5269_v23 = vld [vmem:[#allocation6 + $0xa0] sm:$0xf]  ;;  %v5271_v32 = vld [vmem:[#allocation6 + $0xb0] sm:$0xf0] }
  0x2b   : > { %v5542_v21 = vor.u32 %v7006_v19, %v5541_v18  ;;  %v6938_v24 = vld [vmem:[#allocation6 + $0xac] sm:$0xf0]  ;;  %v5397_v26 = vld [vmem:[#allocation6 + $0x1a0] sm:$0xf]  ;;  %v5274_v38 = vor.u32 %v6936_v31, %v5271_v32  ;;  %v6932_v42 = vld [vmem:[#allocation6 + $0x84] sm:$0xf] }
  0x2c   : > { %v6970_v27 = vld [vmem:[#allocation6 + $0x1ac] sm:$0xf0]  ;;  %v5525_v28 = vld [vmem:[#allocation6 + $0x2a0] sm:$0xf]  ;;  %1110 = vmatpush.bf16.msra.mxu0 %v5286_v16  ;;  %v5270_v29 = vor.u32 %v6938_v24, %v5269_v23  ;;  %v5255_v43 = vld [vmem:[#allocation6 + $0x90] sm:$0xf0] }
  0x2d   : > { %v7002_v30 = vld [vmem:[#allocation6 + $0x2ac] sm:$0xf0]  ;;  %1129 = vmatpush.bf16.msra.mxu1 %v5414_v17  ;;  %v5398_v33 = vor.u32 %v6970_v27, %v5397_v26  ;;  %v5253_v35 = vld [vmem:[#allocation6 + $0x80] sm:$0xf]  ;;  %1167 = vmatpush.bf16.msra.mxu3 %v5290_v25  ;;  %s7730_s1 = scalar_select %p375_p13, %s7661_s13, 1  ;;  %v5258_v50 = vor.u32 %v6932_v42, %v5255_v43  ;;  %vm460_vm1 = vcmask 1046532  }
  0x2e   : > { %1148 = vmatpush.bf16.msra.mxu2 %v5542_v21  ;;  %v5526_v34 = vor.u32 %v7002_v30, %v5525_v28  ;;  %v6934_v36 = vld [vmem:[#allocation6 + $0x8c] sm:$0xf0]  ;;  %v5381_v37 = vld [vmem:[#allocation6 + $0x180] sm:$0xf]  ;;  %v6928_v54 = vld [vmem:[#allocation6 + $0x64] sm:$0xf] }
  0x2f   : > { %v6966_v39 = vld [vmem:[#allocation6 + $0x18c] sm:$0xf0]  ;;  %v5509_v40 = vld [vmem:[#allocation6 + $0x280] sm:$0xf]  ;;  %v5254_v44 = vor.u32 %v6934_v36, %v5253_v35  ;;  %v5239_v55 = vld [vmem:[#allocation6 + $0x70] sm:$0xf0] }
  0x30   : > { %v6998_v41 = vld [vmem:[#allocation6 + $0x28c] sm:$0xf0]  ;;  %1111 = vmatpush.bf16.msra.mxu0 %v5270_v29  ;;  %v5382_v45 = vor.u32 %v6966_v39, %v5381_v37  ;;  %v5237_v47 = vld [vmem:[#allocation6 + $0x60] sm:$0xf]  ;;  %s7346_s3 = smul.u32 20, %s7730_s1  ;;  %v5242_v0 = vor.u32 %v6928_v54, %v5239_v55  ;;  %vm7775_vm4 = vmor %vm459_vm0, %vm460_vm1  ;;  %vm8601_vm6 = vcmask 1041408  }
  0x31   : > { %1130 = vmatpush.bf16.msra.mxu1 %v5398_v33  ;;  %v5510_v46 = vor.u32 %v6998_v41, %v5509_v40  ;;  %v6930_v48 = vld [vmem:[#allocation6 + $0x6c] sm:$0xf0]  ;;  %v5365_v49 = vld [vmem:[#allocation6 + $0x160] sm:$0xf]  ;;  %1168 = vmatpush.bf16.msra.mxu3 %v5274_v38  ;;  %vm394_vm2 = vsmask.f32 3328 }
  0x32   : > { %1149 = vmatpush.bf16.msra.mxu2 %v5526_v34  ;;  %v6962_v51 = vld [vmem:[#allocation6 + $0x16c] sm:$0xf0]  ;;  %v5493_v52 = vld [vmem:[#allocation6 + $0x260] sm:$0xf]  ;;  %v5238_v56 = vor.u32 %v6930_v48, %v5237_v47  ;;  %vm395_vm3 = vsmask.f32 7440  ;;  %s7740_s21 = scalar_lea.vmem %s8586_s0, %s7346_s3 }
  0x33   : > { %v6994_v53 = vld [vmem:[#allocation6 + $0x26c] sm:$0xf0]  ;;  %v5221_v57 = vld [vmem:[#allocation6 + $0x40] sm:$0xf]  ;;  %v5366_v59 = vor.u32 %v6962_v51, %v5365_v49  ;;  %v6924_v2 = vld [vmem:[#allocation6 + $0x44] sm:$0xf] }
  0x34   : > { %1112 = vmatpush.bf16.msra.mxu0 %v5254_v44  ;;  %v6926_v58 = vld [vmem:[#allocation6 + $0x4c] sm:$0xf0]  ;;  %v5494_v60 = vor.u32 %v6994_v53, %v5493_v52  ;;  %v5349_v61 = vld [vmem:[#allocation6 + $0x140] sm:$0xf]  ;;  %v5223_v3 = vld [vmem:[#allocation6 + $0x50] sm:$0xf0] }
  0x35   : > { %1131 = vmatpush.bf16.msra.mxu1 %v5382_v45  ;;  %v6958_v62 = vld [vmem:[#allocation6 + $0x14c] sm:$0xf0]  ;;  %v5477_v63 = vld [vmem:[#allocation6 + $0x240] sm:$0xf]  ;;  %1169 = vmatpush.bf16.msra.mxu3 %v5258_v50  ;;  %v5222_v7 = vor.u32 %v6926_v58, %v5221_v57  ;;  %v6920_v13 = vld [vmem:[#allocation6 + $0x24] sm:$0xf]  ;;  %v5226_v16 = vor.u32 %v6924_v2, %v5223_v3 }
  0x36   : > { %1150 = vmatpush.bf16.msra.mxu2 %v5510_v46  ;;  %v6990_v1 = vld [vmem:[#allocation6 + $0x24c] sm:$0xf0]  ;;  %v5205_v4 = vld [vmem:[#allocation6 + $0x20] sm:$0xf]  ;;  %v5350_v11 = vor.u32 %v6958_v62, %v5349_v61  ;;  %v5207_v14 = vld [vmem:[#allocation6 + $0x30] sm:$0xf0] }
  0x37   : > { %v6922_v5 = vld [vmem:[#allocation6 + $0x2c] sm:$0xf0]  ;;  %v7733_v6 = vld [vmem:[#allocation6 + $0x120] sm:$0xf]  ;;  %v5478_v12 = vor.u32 %v6990_v1, %v5477_v63  ;;  %v382_v19 = vld [vmem:[%s7740_s21 + $0x4] sm:$0xf]  ;;  %v5210_v39 = vor.u32 %v6920_v13, %v5207_v14 }
  0x38   : > { %1113 = vmatpush.bf16.msra.mxu0 %v5238_v56  ;;  %v6954_v8 = vld [vmem:[#allocation6 + $0x12c] sm:$0xf0]  ;;  %v5461_v9 = vld [vmem:[#allocation6 + $0x220] sm:$0xf]  ;;  %v5206_v20 = vor.u32 %v6922_v5, %v5205_v4  ;;  %v390_v24 = vld [vmem:[%s7740_s21 + $0x4] sm:$0xf] }
  0x39   : > { %v6986_v10 = vld [vmem:[#allocation6 + $0x22c] sm:$0xf0]  ;;  %1132 = vmatpush.bf16.msra.mxu1 %v5366_v59  ;;  %v7742_v15 = vld [vmem:[#allocation6] sm:$0xf]  ;;  %1170 = vmatpush.bf16.msra.mxu3 %v5242_v0  ;;  %v5334_v25 = vor.u32 %v6954_v8, %v7733_v6  ;;  %v7759_v29 = vld [vmem:[#allocation6 + $0x4] sm:$0xf] }
  0x3a   : > { %1151 = vmatpush.bf16.msra.mxu2 %v5494_v60  ;;  %v7744_v17 = vld [vmem:[#allocation6 + $0xc] sm:$0xf0]  ;;  %v7748_v21 = vld [vmem:[#allocation6 + $0x100] sm:$0xf]  ;;  %v5462_v26 = vor.u32 %v6986_v10, %v5461_v9  ;;  %v7761_v30 = vld [vmem:[#allocation6 + $0x10] sm:$0xf0] }
  0x3b   : > { %v381_v18 = vld [vmem:[%s7740_s21] sm:$0xf]  ;;  %v7755_v27 = vld [vmem:[#allocation6 + $0x200] sm:$0xf]  ;;  %386 = vst [vmem:[#allocation3 + $0xc] sm:$0xf] %v382_v19  ;;  %v5190_v40 = vor.u32 %v7744_v17, %v7742_v15  ;;  %vm7783_vm5 = vmor %vm394_vm2, %vm395_vm3  ;;  %v5194_v59 = vor.u32 %v7759_v29, %v7761_v30 }
  0x3c   : > { %v7750_v22 = vld [vmem:[#allocation6 + $0x10c] sm:$0xf0]  ;;  %385 = vst [vmem:[#allocation3] sm:$0xf] %v381_v18  ;;  %1114 = vmatpush.bf16.msra.mxu0 %v5222_v7  ;;  %v391_v31 = vld [vmem:[%s7740_s21 + $0x8] sm:$0xf] }
  0x3d   : > { %v389_v23 = vld [vmem:[%s7740_s21] sm:$0xf]  ;;  %1133 = vmatpush.bf16.msra.mxu1 %v5350_v11  ;;  %v407_v34 = vshll.u32 %v390_v24, 16  ;;  %v411_v35 = vshrl.u32 %v390_v24, 16  ;;  %v417_v36 = vshll.u32 %v391_v31, 16  ;;  %v421_v37 = vshrl.u32 %v391_v31, 16  ;;  %1171 = vmatpush.bf16.msra.mxu3 %v5226_v16 }
  0x3e   : > { %v7757_v28 = vld [vmem:[#allocation6 + $0x20c] sm:$0xf0]  ;;  %v398_v32 = vshrl.u32 %v389_v23, 16  ;;  %v401_v33 = vshll.u32 %v389_v23, 16  ;;  %1152 = vmatpush.bf16.msra.mxu2 %v5478_v12  ;;  %v450_v43 = vld [vmem:[%s7740_s21 + $0x4] sm:$0xf]  ;;  %v5318_v51 = vor.u32 %v7750_v22, %v7748_v21 }
  0x3f   : > { %v449_v38 = vld [vmem:[%s7740_s21] sm:$0xe]  ;;  %v7769_v44 = vld [vmem:[%s7740_s21 + $0x8] sm:$0xf]  ;;  %v409_v45 = vrot.slane %v407_v34, 5  ;;  %v413_v46 = vrot.slane %v411_v35, 4  ;;  %v5446_v58 = vor.u32 %v7757_v28, %v7755_v27 }
  0x40   : > { %v400_v41 = vrot.slane %v398_v32, 4  ;;  %v403_v42 = vrot.slane %v401_v33, 5  ;;  %v7771_v47 = vrot.slane %v417_v36, 5  ;;  %v5162_v49 = vrot.slane %v449_v38, 9  ;;  %v6976_v50 = vld [vmem:[#allocation6 + $0x1e4] sm:$0xf]  ;;  %1115 = vmatpush.bf16.msra.mxu0 %v5206_v20 }
  0x41   : > { %v464_v54 = vrot.slane %v450_v43, 5  ;;  %v467_v55 = vrot.slane %v7769_v44, 5  ;;  %v5431_v56 = vld [vmem:[#allocation6 + $0x1f0] sm:$0xf0]  ;;  %v7008_v57 = vld [vmem:[#allocation6 + $0x2e4] sm:$0xf]  ;;  %1134 = vmatpush.bf16.msra.mxu1 %v5334_v25  ;;  %v414_v60 = vor.u32 %v413_v46, %v409_v45  ;;  %1172 = vmatpush.bf16.msra.mxu3 %v5210_v39 }
  0x42   : > { %v404_v53 = vor.u32 %v403_v42, %v400_v41  ;;  %1153 = vmatpush.bf16.msra.mxu2 %v5462_v26  ;;  %v5559_v61 = vld [vmem:[#allocation6 + $0x2f0] sm:$0xf0]  ;;  %v5309_v62 = vld [vmem:[#allocation6 + $0xe8] sm:$0xf]  ;;  %v6947_v63 = vld [vmem:[#allocation6 + $0xf4] sm:$0xf0]  ;;  %v5434_v4 = vor.u32 %v6976_v50, %v5431_v56 }
  0x43   : > { %v5165_v0 = vld [vmem:[#allocation3] sm:$0xf]  ;;  %v465_v2 = vsel %vm7775_vm4, %v5162_v49, %v464_v54  ;;  %v466_v3 = vrot.slane %v464_v54, 4  ;;  %v5437_v5 = vld [vmem:[#allocation6 + $0x1e8] sm:$0xf]  ;;  %v415_v7 = vrot.slane %v414_v60, 4  ;;  %v5562_v8 = vor.u32 %v7008_v57, %v5559_v61 }
  0x44   : > { %v405_v1 = vrot.slane %v404_v53, 4  ;;  %v6911_v6 = vld [vmem:[#allocation3 + $0x8] sm:$0xf0]  ;;  %479 = vst [vmem:[#allocation3 + $0x8] sm:$0xf] %v465_v2  ;;  %v7794_v9 = vrot.slane %v421_v37, 4  ;;  %1116 = vmatpush.bf16.msra.mxu0 %v5190_v40  ;;  %v5310_v13 = vor.u32 %v6947_v63, %v5309_v62 }
  0x45   : > { %v7796_v10 = vor.u32 %v6911_v6, %v5165_v0  ;;  %v468_v12 = vsel %vm7775_vm4, %v466_v3, %v467_v55  ;;  %v6979_v14 = vld [vmem:[#allocation6 + $0x1f4] sm:$0xf0]  ;;  %v6972_v15 = vld [vmem:[#allocation6 + $0x1c4] sm:$0xf]  ;;  %v5415_v16 = vld [vmem:[#allocation6 + $0x1d0] sm:$0xf0]  ;;  %1135 = vmatpush.bf16.msra.mxu1 %v5318_v51  ;;  %v420_v17 = vsel %vm7783_vm5, %v415_v7, %v7771_v47  ;;  %1173 = vmatpush.bf16.msra.mxu3 %v5194_v59 }
  0x46   : > { %v410_v11 = vsel %vm7783_vm5, %v405_v1, %v409_v45  ;;  %1154 = vmatpush.bf16.msra.mxu2 %v5446_v58  ;;  %v5438_v18 = vor.u32 %v6979_v14, %v5437_v5  ;;  %v7004_v19 = vld [vmem:[#allocation6 + $0x2c4] sm:$0xf]  ;;  %v5543_v20 = vld [vmem:[#allocation6 + $0x2d0] sm:$0xf0]  ;;  %446 = vst [vmem:[#allocation3 + $0x10] sm:$0xf] %v420_v17  ;;  %v5418_v21 = vor.u32 %v6972_v15, %v5415_v16 }
  0x47   : > { %445 = vst [vmem:[#allocation3 + $0x4] sm:$0xf] %v410_v11  ;;  %v5293_v22 = vld [vmem:[#allocation6 + $0xc8] sm:$0xf]  ;;  %v6943_v23 = vld [vmem:[#allocation6 + $0xd4] sm:$0xf0]  ;;  %1117 = vmatmul.bf16.vlgmr.msra.gmra.mxu0 %v7796_v10  ;;  %v5546_v24 = vor.u32 %v7004_v19, %v5543_v20  ;;  %v424_v50 = vor.u32 %v7794_v9, %v7771_v47 }
  0x48   : > { %1185 = vmatpush.bf16.msrb.mxu0 %v5434_v4  ;;  %480 = vst [vmem:[#allocation3 + $0x14] sm:$0xf] %v468_v12  ;;  %v5421_v25 = vld [vmem:[#allocation6 + $0x1c8] sm:$0xf]  ;;  %v6975_v26 = vld [vmem:[#allocation6 + $0x1d4] sm:$0xf0]  ;;  %v5294_v27 = vor.u32 %v6943_v23, %v5293_v22  ;;  %1174 = vmatmul.bf16.vlgmr.msra.gmra.mxu3 %v7796_v10 }
  0x49   : > { %1204 = vmatpush.bf16.msrb.mxu1 %v5562_v8  ;;  %1242 = vmatpush.bf16.msrb.mxu3 %v5438_v18  ;;  %v5422_v28 = vor.u32 %v6975_v26, %v5421_v25  ;;  %v6968_v29 = vld [vmem:[#allocation6 + $0x1a4] sm:$0xf]  ;;  %v5399_v30 = vld [vmem:[#allocation6 + $0x1b0] sm:$0xf0]  ;;  %v5277_v33 = vld [vmem:[#allocation6 + $0xa8] sm:$0xf] }
  0x4a   : > { %1223 = vmatpush.bf16.msrb.mxu2 %v5310_v13  ;;  %v7000_v31 = vld [vmem:[#allocation6 + $0x2a4] sm:$0xf]  ;;  %v5527_v32 = vld [vmem:[#allocation6 + $0x2b0] sm:$0xf0]  ;;  %v6939_v34 = vld [vmem:[#allocation6 + $0xb4] sm:$0xf0]  ;;  %v5402_v36 = vor.u32 %v6968_v29, %v5399_v30 }
  0x4b   : > { %v5173_v35 = vld [vmem:[#allocation3 + $0x8] sm:$0xf]  ;;  %v5405_v37 = vld [vmem:[#allocation6 + $0x1a8] sm:$0xf]  ;;  %v5530_v39 = vor.u32 %v7000_v31, %v5527_v32  ;;  %v6964_v40 = vld [vmem:[#allocation6 + $0x184] sm:$0xf]  ;;  %v5278_v45 = vor.u32 %v6939_v34, %v5277_v33 }
  0x4c   : > { %1186 = vmatpush.bf16.msrb.mxu0 %v5418_v21  ;;  %v6971_v38 = vld [vmem:[#allocation6 + $0x1b4] sm:$0xf0]  ;;  %v5383_v41 = vld [vmem:[#allocation6 + $0x190] sm:$0xf0]  ;;  %v6996_v42 = vld [vmem:[#allocation6 + $0x284] sm:$0xf] }
  0x4d   : > { %1205 = vmatpush.bf16.msrb.mxu1 %v5546_v24  ;;  %1243 = vmatpush.bf16.msrb.mxu3 %v5422_v28  ;;  %v5511_v46 = vld [vmem:[#allocation6 + $0x290] sm:$0xf0]  ;;  %v5261_v49 = vld [vmem:[#allocation6 + $0x88] sm:$0xf]  ;;  %v5167_v51 = vld [vmem:[#allocation3 + $0xc] sm:$0xf0]  ;;  %v5406_v53 = vor.u32 %v6971_v38, %v5405_v37  ;;  %v5386_v59 = vor.u32 %v6964_v40, %v5383_v41 }
  0x4e   : > { %v6910_v43 = vld [vmem:[#allocation3 + $0x4] sm:$0xf]  ;;  %1224 = vmatpush.bf16.msrb.mxu2 %v5294_v27  ;;  %v6935_v54 = vld [vmem:[#allocation6 + $0x94] sm:$0xf0]  ;;  %v5389_v56 = vld [vmem:[#allocation6 + $0x188] sm:$0xf]  ;;  %v5514_v63 = vor.u32 %v6996_v42, %v5511_v46 }
  0x4f   : > { %v7811_v57 = vor.u32 %v6910_v43, %v5167_v51  ;;  %v6912_v58 = vld [vmem:[#allocation3 + $0x10] sm:$0xf0]  ;;  %v6967_v60 = vld [vmem:[#allocation6 + $0x194] sm:$0xf0]  ;;  %v384_v0 = vld [vmem:[%s7740_s21 + $0xc] sm:$0xf]  ;;  %v5262_v1 = vor.u32 %v6935_v54, %v5261_v49 }
  0x50   : > { %1187 = vmatpush.bf16.msrb.mxu0 %v5402_v36  ;;  %v383_v61 = vld [vmem:[%s7740_s21 + $0x8] sm:$0xf]  ;;  %v7814_v62 = vor.u32 %v6912_v58, %v5173_v35  ;;  %v392_v47 = vld [vmem:[%s7740_s21 + $0xc] sm:$0xf]  ;;  %388 = vst [vmem:[#allocation3 + $0x24] sm:$0xf] %v384_v0  ;;  %v5390_v5 = vor.u32 %v6967_v60, %v5389_v56 }
  0x51   : > { %1206 = vmatpush.bf16.msrb.mxu1 %v5530_v39  ;;  %387 = vst [vmem:[#allocation3 + $0x18] sm:$0xf] %v383_v61  ;;  %v393_v2 = vld [vmem:[%s7740_s21 + $0x10] sm:$0x1]  ;;  %v425_v3 = vrot.slane %v424_v50, 4  ;;  %v427_v4 = vshll.u32 %v392_v47, 16  ;;  %1244 = vmatpush.bf16.msrb.mxu3 %v5406_v53 }
  0x52   : > { %1136 = vmatmul.bf16.vlgmr.msra.gmra.mxu1 %v7811_v57  ;;  %1225 = vmatpush.bf16.msrb.mxu2 %v5278_v45  ;;  %v431_v6 = vshrl.u32 %v392_v47, 16  ;;  %v437_v7 = vshll.u32 %v393_v2, 16  ;;  %v452_v8 = vld [vmem:[%s7740_s21 + $0xc] sm:$0xf]  ;;  %v453_v9 = vld [vmem:[%s7740_s21 + $0x10] sm:$0x1] }
  0x53   : > { %1155 = vmatmul.bf16.vlgmr.msra.gmra.mxu2 %v7814_v62  ;;  %v429_v11 = vrot.slane %v427_v4, 5  ;;  %v469_v12 = vrot.slane %v467_v55, 4  ;;  %v470_v13 = vrot.slane %v452_v8, 5  ;;  %v473_v14 = vrot.slane %v453_v9, 5  ;;  %v6960_v15 = vld [vmem:[#allocation6 + $0x164] sm:$0xf] }
  0x54   : > { %1188 = vmatpush.bf16.msrb.mxu0 %v5386_v59  ;;  %v433_v16 = vrot.slane %v431_v6, 4  ;;  %v439_v17 = vrot.slane %v437_v7, 5  ;;  %v5367_v18 = vld [vmem:[#allocation6 + $0x170] sm:$0xf0]  ;;  %v6992_v19 = vld [vmem:[#allocation6 + $0x264] sm:$0xf] }
  0x55   : > { %1207 = vmatpush.bf16.msrb.mxu1 %v5514_v63  ;;  %v430_v20 = vsel %vm7783_vm5, %v425_v3, %v429_v11  ;;  %v471_v21 = vsel %vm7775_vm4, %v469_v12, %v470_v13  ;;  %v472_v22 = vrot.slane %v470_v13, 4  ;;  %v5370_v23 = vor.u32 %v6960_v15, %v5367_v18  ;;  %v5495_v24 = vld [vmem:[#allocation6 + $0x270] sm:$0xf0]  ;;  %v5245_v44 = vld [vmem:[#allocation6 + $0x68] sm:$0xf]  ;;  %1245 = vmatpush.bf16.msrb.mxu3 %v5390_v5  ;;  %s373_s22 = sand.u32 1, %s7573_s10  }
  0x56   : > { %1226 = vmatpush.bf16.msrb.mxu2 %v5262_v1  ;;  %v434_v55 = vor.u32 %v433_v16, %v429_v11  ;;  %447 = vst [vmem:[#allocation3 + $0x1c] sm:$0xf] %v430_v20  ;;  %v5498_v25 = vor.u32 %v6992_v19, %v5495_v24  ;;  %v6931_v26 = vld [vmem:[#allocation6 + $0x74] sm:$0xf0]  ;;  %v5373_v27 = vld [vmem:[#allocation6 + $0x168] sm:$0xf] }
  0x57   : > { %v474_v29 = vsel %vm7775_vm4, %v472_v22, %v473_v14  ;;  %481 = vst [vmem:[#allocation3 + $0x20] sm:$0xf] %v471_v21  ;;  %v5246_v30 = vor.u32 %v6931_v26, %v5245_v44  ;;  %v6963_v31 = vld [vmem:[#allocation6 + $0x174] sm:$0xf0]  ;;  %v6914_v32 = vld [vmem:[#allocation3 + $0x20] sm:$0xf0] }
  0x58   : > { %v5177_v28 = vld [vmem:[#allocation3 + $0x18] sm:$0xf]  ;;  %1189 = vmatpush.bf16.msrb.mxu0 %v5370_v23  ;;  %v435_v33 = vrot.slane %v434_v55, 4  ;;  %482 = vst [vmem:[#allocation3 + $0x2c] sm:$0xf] %v474_v29  ;;  %v5374_v34 = vor.u32 %v6963_v31, %v5373_v27  ;;  %vm8599_vm7 = vcmask 1043458  }
  0x59   : > { %1208 = vmatpush.bf16.msrb.mxu1 %v5498_v25  ;;  %v7831_v35 = vor.u32 %v6914_v32, %v5177_v28  ;;  %v6956_v36 = vld [vmem:[#allocation6 + $0x144] sm:$0xf]  ;;  %v5351_v37 = vld [vmem:[#allocation6 + $0x150] sm:$0xf0]  ;;  %v5229_v42 = vld [vmem:[#allocation6 + $0x48] sm:$0xf] }
  0x5a   : > { %1227 = vmatpush.bf16.msrb.mxu2 %v5246_v30  ;;  %v6988_v38 = vld [vmem:[#allocation6 + $0x244] sm:$0xf]  ;;  %v440_v39 = vsel %vm7783_vm5, %v435_v33, %v439_v17  ;;  %1246 = vmatpush.bf16.msrb.mxu3 %v5374_v34  ;;  %v5354_v40 = vor.u32 %v6956_v36, %v5351_v37  ;;  %v5479_v41 = vld [vmem:[#allocation6 + $0x250] sm:$0xf0]  ;;  %v6927_v43 = vld [vmem:[#allocation6 + $0x54] sm:$0xf0] }
  0x5b   : > { %1122 = vmatmul.bf16.gmra.mxu0 %v7831_v35  ;;  %448 = vst [vmem:[#allocation3 + $0x28] sm:$0xf] %v440_v39  ;;  %1179 = vmatmul.bf16.gmra.mxu3 %v7831_v35  ;;  %v5482_v45 = vor.u32 %v6988_v38, %v5479_v41  ;;  %v5230_v46 = vor.u32 %v6927_v43, %v5229_v42  ;;  %v5357_v49 = vld [vmem:[#allocation6 + $0x148] sm:$0xf]  ;;  %v6959_v50 = vld [vmem:[#allocation6 + $0x154] sm:$0xf0] }
  0x5c   : > { %1190 = vmatpush.bf16.msrb.mxu0 %v5354_v40  ;;  %v5358_v51 = vor.u32 %v6959_v50, %v5357_v49  ;;  %v6952_v53 = vld [vmem:[#allocation6 + $0x124] sm:$0xf]  ;;  %v5335_v54 = vld [vmem:[#allocation6 + $0x130] sm:$0xf0]  ;;  %v5213_v60 = vld [vmem:[#allocation6 + $0x28] sm:$0xf] }
  0x5d   : > { %v6984_v56 = vld [vmem:[#allocation6 + $0x224] sm:$0xf]  ;;  %1209 = vmatpush.bf16.msrb.mxu1 %v5482_v45  ;;  %v5338_v58 = vor.u32 %v6952_v53, %v5335_v54  ;;  %v5463_v59 = vld [vmem:[#allocation6 + $0x230] sm:$0xf0]  ;;  %v6913_v61 = vld [vmem:[#allocation3 + $0x1c] sm:$0xf] }
  0x5e   : > { %1228 = vmatpush.bf16.msrb.mxu2 %v5230_v46  ;;  %v5185_v63 = vld [vmem:[#allocation3 + $0x20] sm:$0xf]  ;;  %1247 = vmatpush.bf16.msrb.mxu3 %v5358_v51  ;;  %v5466_v0 = vor.u32 %v6984_v56, %v5463_v59  ;;  %v6923_v47 = vld [vmem:[#allocation6 + $0x34] sm:$0xf0]  ;;  %v5341_v1 = vld [vmem:[#allocation6 + $0x128] sm:$0xf] }
  0x5f   : > { %v6915_v2 = vld [vmem:[#allocation3 + $0x28] sm:$0xf0]  ;;  %v5214_v3 = vor.u32 %v6923_v47, %v5213_v60  ;;  %v6955_v4 = vld [vmem:[#allocation6 + $0x134] sm:$0xf0]  ;;  %v6948_v5 = vld [vmem:[#allocation6 + $0x104] sm:$0xf] }
  0x60   : > { %v7837_v6 = vor.u32 %v6915_v2, %v5185_v63  ;;  %1191 = vmatpush.bf16.msrb.mxu0 %v5338_v58  ;;  %v5342_v7 = vor.u32 %v6955_v4, %v5341_v1  ;;  %v5319_v8 = vld [vmem:[#allocation6 + $0x110] sm:$0xf0]  ;;  %v6980_v9 = vld [vmem:[#allocation6 + $0x204] sm:$0xf]  ;;  %v5197_v13 = vld [vmem:[#allocation6 + $0x8] sm:$0xf] }
  0x61   : > { %v5447_v11 = vld [vmem:[#allocation6 + $0x210] sm:$0xf0]  ;;  %1210 = vmatpush.bf16.msrb.mxu1 %v5466_v0  ;;  %v5322_v12 = vor.u32 %v6948_v5, %v5319_v8  ;;  %v6919_v14 = vld [vmem:[#allocation6 + $0x14] sm:$0xf0]  ;;  %v5325_v15 = vld [vmem:[#allocation6 + $0x108] sm:$0xf] }
  0x62   : > { %1229 = vmatpush.bf16.msrb.mxu2 %v5214_v3  ;;  %v5179_v16 = vld [vmem:[#allocation3 + $0x24] sm:$0xf0]  ;;  %1248 = vmatpush.bf16.msrb.mxu3 %v5342_v7  ;;  %v5450_v17 = vor.u32 %v6980_v9, %v5447_v11  ;;  %v5198_v18 = vor.u32 %v6919_v14, %v5197_v13  ;;  %v5565_v20 = vld [vmem:[#allocation6 + $0x2e8] sm:$0xf]  ;;  %v6945_v24 = vld [vmem:[#allocation6 + $0xec] sm:$0xf] }
  0x63   : > { %1160 = vmatmul.bf16.gmra.mxu2 %v7837_v6  ;;  %v6951_v19 = vld [vmem:[#allocation6 + $0x114] sm:$0xf0]  ;;  %v7840_v21 = vor.u32 %v6913_v61, %v5179_v16  ;;  %v5311_v44 = vld [vmem:[#allocation6 + $0xf8] sm:$0xf0]  ;;  %v6977_v26 = vld [vmem:[#allocation6 + $0x1ec] sm:$0xf] }
  0x64   : > { %v5326_v22 = vor.u32 %v6951_v19, %v5325_v15  ;;  %v7011_v23 = vld [vmem:[#allocation6 + $0x2f4] sm:$0xf0]  ;;  %1192 = vmatpush.bf16.msrb.mxu0 %v5322_v12  ;;  %v5314_v25 = vor.u32 %v6945_v24, %v5311_v44  ;;  %v5439_v27 = vld [vmem:[#allocation6 + $0x1f8] sm:$0xf0]  ;;  %v7009_v28 = vld [vmem:[#allocation6 + $0x2ec] sm:$0xf] }
  0x65   : > { %v5566_v55 = vor.u32 %v7011_v23, %v5565_v20  ;;  %1141 = vmatmul.bf16.gmra.mxu1 %v7840_v21  ;;  %v5442_v29 = vor.u32 %v6977_v26, %v5439_v27  ;;  %v5567_v30 = vld [vmem:[#allocation6 + $0x2f8] sm:$0xf0]  ;;  %v5549_v31 = vld [vmem:[#allocation6 + $0x2c8] sm:$0xf]  ;;  %v7007_v32 = vld [vmem:[#allocation6 + $0x2d4] sm:$0xf0] }
  0x66   : > { %1230 = vmatpush.bf16.msrb.mxu2 %v5198_v18  ;;  %1211 = vmatpush.bf16.msrb.mxu1 %v5450_v17  ;;  %v5570_v33 = vor.u32 %v7009_v28, %v5567_v30  ;;  %v6941_v34 = vld [vmem:[#allocation6 + $0xcc] sm:$0xf]  ;;  %v5295_v36 = vld [vmem:[#allocation6 + $0xd8] sm:$0xf0]  ;;  %v5550_v41 = vor.u32 %v7007_v32, %v5549_v31  ;;  %v5533_v43 = vld [vmem:[#allocation6 + $0x2a8] sm:$0xf] }
  0x67   : > { %1249 = vmatpush.bf16.msrb.mxu3 %v5326_v22  ;;  %v6973_v37 = vld [vmem:[#allocation6 + $0x1cc] sm:$0xf]  ;;  %v5423_v38 = vld [vmem:[#allocation6 + $0x1d8] sm:$0xf0]  ;;  %v5298_v42 = vor.u32 %v6941_v34, %v5295_v36  ;;  %v7003_v45 = vld [vmem:[#allocation6 + $0x2b4] sm:$0xf0] }
  0x68   : > { %1261 = vmatpush.bf16.msra.mxu0 %v5566_v55  ;;  %v7005_v39 = vld [vmem:[#allocation6 + $0x2cc] sm:$0xf]  ;;  %v5551_v40 = vld [vmem:[#allocation6 + $0x2d8] sm:$0xf0]  ;;  %v5426_v46 = vor.u32 %v6973_v37, %v5423_v38  ;;  %v5534_v59 = vor.u32 %v7003_v45, %v5533_v43  ;;  %v5517_v61 = vld [vmem:[#allocation6 + $0x288] sm:$0xf] }
  0x69   : > { %v5554_v49 = vor.u32 %v7005_v39, %v5551_v40  ;;  %v6937_v50 = vld [vmem:[#allocation6 + $0xac] sm:$0xf]  ;;  %v5279_v51 = vld [vmem:[#allocation6 + $0xb8] sm:$0xf0]  ;;  %v6999_v47 = vld [vmem:[#allocation6 + $0x294] sm:$0xf0] }
  0x6a   : > { %1280 = vmatpush.bf16.msra.mxu1 %v5314_v25  ;;  %1299 = vmatpush.bf16.msra.mxu2 %v5442_v29  ;;  %v6969_v53 = vld [vmem:[#allocation6 + $0x1ac] sm:$0xf]  ;;  %v5407_v54 = vld [vmem:[#allocation6 + $0x1b8] sm:$0xf0]  ;;  %v5282_v60 = vor.u32 %v6937_v50, %v5279_v51  ;;  %v5518_v8 = vor.u32 %v6999_v47, %v5517_v61  ;;  %v5501_v11 = vld [vmem:[#allocation6 + $0x268] sm:$0xf] }
  0x6b   : > { %1318 = vmatpush.bf16.msra.mxu3 %v5570_v33  ;;  %v7001_v56 = vld [vmem:[#allocation6 + $0x2ac] sm:$0xf]  ;;  %v5535_v58 = vld [vmem:[#allocation6 + $0x2b8] sm:$0xf0]  ;;  %1193 = vmatmul.bf16.vlgmr.msrb.gmra.mxu0 %v7811_v57  ;;  %v5410_v63 = vor.u32 %v6969_v53, %v5407_v54  ;;  %v6995_v13 = vld [vmem:[#allocation6 + $0x274] sm:$0xf0] }
  0x6c   : > { %1250 = vmatmul.bf16.vlgmr.msrb.gmra.mxu3 %v7811_v57  ;;  %1262 = vmatpush.bf16.msra.mxu0 %v5550_v41  ;;  %v5538_v0 = vor.u32 %v7001_v56, %v5535_v58  ;;  %v6933_v1 = vld [vmem:[#allocation6 + $0x8c] sm:$0xf]  ;;  %v5263_v2 = vld [vmem:[#allocation6 + $0x98] sm:$0xf0]  ;;  %v5502_v22 = vor.u32 %v6995_v13, %v5501_v11  ;;  %v5485_v24 = vld [vmem:[#allocation6 + $0x248] sm:$0xf] }
  0x6d   : > { %v6965_v3 = vld [vmem:[#allocation6 + $0x18c] sm:$0xf]  ;;  %v5391_v4 = vld [vmem:[#allocation6 + $0x198] sm:$0xf0]  ;;  %v5266_v9 = vor.u32 %v6933_v1, %v5263_v2  ;;  %v6991_v55 = vld [vmem:[#allocation6 + $0x254] sm:$0xf0] }
  0x6e   : > { %1281 = vmatpush.bf16.msra.mxu1 %v5298_v42  ;;  %1300 = vmatpush.bf16.msra.mxu2 %v5426_v46  ;;  %v6997_v5 = vld [vmem:[#allocation6 + $0x28c] sm:$0xf]  ;;  %v5519_v7 = vld [vmem:[#allocation6 + $0x298] sm:$0xf0]  ;;  %v5394_v12 = vor.u32 %v6965_v3, %v5391_v4  ;;  %v5486_v32 = vor.u32 %v6991_v55, %v5485_v24  ;;  %v5469_v34 = vld [vmem:[#allocation6 + $0x228] sm:$0xf] }
  0x6f   : > { %1319 = vmatpush.bf16.msra.mxu3 %v5554_v49  ;;  %v6929_v14 = vld [vmem:[#allocation6 + $0x6c] sm:$0xf]  ;;  %v5247_v15 = vld [vmem:[#allocation6 + $0x78] sm:$0xf0]  ;;  %v5522_v16 = vor.u32 %v6997_v5, %v5519_v7  ;;  %v6987_v37 = vld [vmem:[#allocation6 + $0x234] sm:$0xf0] }
  0x70   : > { %1263 = vmatpush.bf16.msra.mxu0 %v5534_v59  ;;  %v6961_v17 = vld [vmem:[#allocation6 + $0x16c] sm:$0xf]  ;;  %v5375_v18 = vld [vmem:[#allocation6 + $0x178] sm:$0xf0]  ;;  %v5250_v23 = vor.u32 %v6929_v14, %v5247_v15  ;;  %v5470_v46 = vor.u32 %v6987_v37, %v5469_v34  ;;  %v5453_v50 = vld [vmem:[#allocation6 + $0x208] sm:$0xf] }
  0x71   : > { %v6993_v19 = vld [vmem:[#allocation6 + $0x26c] sm:$0xf]  ;;  %v5503_v20 = vld [vmem:[#allocation6 + $0x278] sm:$0xf0]  ;;  %v5378_v44 = vor.u32 %v6961_v17, %v5375_v18  ;;  %v6983_v53 = vld [vmem:[#allocation6 + $0x214] sm:$0xf0] }
  0x72   : > { %1282 = vmatpush.bf16.msra.mxu1 %v5282_v60  ;;  %1301 = vmatpush.bf16.msra.mxu2 %v5410_v63  ;;  %v6925_v25 = vld [vmem:[#allocation6 + $0x4c] sm:$0xf]  ;;  %v5231_v26 = vld [vmem:[#allocation6 + $0x58] sm:$0xf0]  ;;  %v5506_v27 = vor.u32 %v6993_v19, %v5503_v20  ;;  %v587_v4 = vld [vmem:[%s8588_s2] sm:$0xf] }
  0x73   : > { %1320 = vmatpush.bf16.msra.mxu3 %v5538_v0  ;;  %1231 = vmatmul.bf16.vlgmr.msrb.gmra.mxu2 %v7796_v10  ;;  %v6957_v28 = vld [vmem:[#allocation6 + $0x14c] sm:$0xf]  ;;  %v5359_v29 = vld [vmem:[#allocation6 + $0x158] sm:$0xf0]  ;;  %v5234_v33 = vor.u32 %v6925_v25, %v5231_v26  ;;  %v5454_v0 = vor.u32 %v6983_v53, %v5453_v50  ;;  %v7862_v5 = vperm.slane %v587_v4, 0  ;;  %vm8598_vm8 = vcmask 1045508  }
  0x74   : > { %1264 = vmatpush.bf16.msra.mxu0 %v5518_v8  ;;  %v6989_v30 = vld [vmem:[#allocation6 + $0x24c] sm:$0xf]  ;;  %v5487_v31 = vld [vmem:[#allocation6 + $0x258] sm:$0xf0]  ;;  %v5362_v36 = vor.u32 %v6957_v28, %v5359_v29  ;;  %vm8597_vm9 = vcmask 1045504   ;;  %vm8602_vm10 = vcmask 1040384  }
  0x75   : > { %1212 = vmatmul.bf16.vlgmr.msrb.gmra.mxu1 %v7814_v62  ;;  %v6921_v38 = vld [vmem:[#allocation6 + $0x2c] sm:$0xf]  ;;  %v5215_v39 = vld [vmem:[#allocation6 + $0x38] sm:$0xf0]  ;;  %v5490_v40 = vor.u32 %v6989_v30, %v5487_v31  ;;  %vm1711_vm11 = vsmask.f32 256 }
  0x76   : > { %1283 = vmatpush.bf16.msra.mxu1 %v5266_v9  ;;  %1302 = vmatpush.bf16.msra.mxu2 %v5394_v12  ;;  %v6953_v41 = vld [vmem:[#allocation6 + $0x12c] sm:$0xf]  ;;  %v5343_v42 = vld [vmem:[#allocation6 + $0x138] sm:$0xf0]  ;;  %v5218_v49 = vor.u32 %v6921_v38, %v5215_v39  ;;  %v590_v38 = vperm.slane %v587_v4, 1  ;;  %v7894_v39 = vperm.slane %v587_v4, 2  ;;  %vm8273_vm12 = vmand %vm8602_vm10, %vm1711_vm11 }
  0x77   : > { %1321 = vmatpush.bf16.msra.mxu3 %v5522_v16  ;;  %v6985_v43 = vld [vmem:[#allocation6 + $0x22c] sm:$0xf]  ;;  %v5471_v45 = vld [vmem:[#allocation6 + $0x238] sm:$0xf0]  ;;  %v5346_v51 = vor.u32 %v6953_v41, %v5343_v42  ;;  %v7896_v42 = vperm.slane %v587_v4, 3  ;;  %vm1713_vm13 = vcmask 1044484  }
  0x78   : > { %1265 = vmatpush.bf16.msra.mxu0 %v5502_v22  ;;  %v6917_v54 = vld [vmem:[#allocation6 + $0xc] sm:$0xf]  ;;  %v5199_v56 = vld [vmem:[#allocation6 + $0x18] sm:$0xf0]  ;;  %v5474_v58 = vor.u32 %v6985_v43, %v5471_v45  ;;  %vm1714_vm14 = vsmask.f32 4352 }
  0x79   : > { %v6949_v59 = vld [vmem:[#allocation6 + $0x10c] sm:$0xf]  ;;  %v5327_v60 = vld [vmem:[#allocation6 + $0x118] sm:$0xf0]  ;;  %v5202_v47 = vor.u32 %v6917_v54, %v5199_v56  ;;  %vm8278_vm15 = vmand %vm1713_vm13, %vm1714_vm14  ;;  %vm1720_vm1 = vsmask.f32 7938 }
  0x7a   : > { %1284 = vmatpush.bf16.msra.mxu1 %v5250_v23  ;;  %1303 = vmatpush.bf16.msra.mxu2 %v5378_v44  ;;  %v6981_v61 = vld [vmem:[#allocation6 + $0x20c] sm:$0xf]  ;;  %v5455_v63 = vld [vmem:[#allocation6 + $0x218] sm:$0xf0]  ;;  %v5330_v1 = vor.u32 %v6949_v59, %v5327_v60  ;;  %vm8600_vm0 = vmor %vm8278_vm15, %vm8273_vm12  ;;  %vm1722_vm2 = vsmask.f32 7954 }
  0x7b   : > { %1322 = vmatpush.bf16.msra.mxu3 %v5506_v27  ;;  %1198 = vmatmul.bf16.gmra.mxu0 %v7840_v21  ;;  %v5458_v2 = vor.u32 %v6981_v61, %v5455_v63  ;;  %vm1792_vm3 = vcmask 1042434   ;;  %vm1794_vm11 = vcmask 1043459   ;;  %vm1798_vm14 = vcmask 1045509   ;;  %v6352_v48 = vld [vmem:[#allocation9 + $0x5f0] sm:$0xf0]  ;;  %s374_s3 = scalar_lea.vmem [#allocation12], %s373_s22 }
  0x7c   : > { %1255 = vmatmul.bf16.gmra.mxu3 %v7840_v21  ;;  %1266 = vmatpush.bf16.msra.mxu0 %v5486_v32  ;;  %v5856_v52 = vld [vmem:[#allocation9 + $0x210] sm:$0xf0]  ;;  %s5063_s11 = sshll.u32 %s374_s3, 4  ;;  %s5065_s18 = sshll.u32 %s5061_s26, 4  ;;  %s5064_s11 = int_to_ptr.vmem [resolvable:$true] %s5063_s11  ;;  %s5066_s18 = int_to_ptr.hbm [resolvable:$true] %s5065_s18 }
  0x7d   : > { %s5053_s21 = scalar_lea.sflag [#allocation8], %s373_s22  ;;  %s7525_s24 = sshra.s32 %s5066_s18, 4  ;;  %s7526_s24 = int_to_ptr.hbm [resolvable:$true] %s7525_s24 }
  0x7e   : > { %1285 = vmatpush.bf16.msra.mxu1 %v5234_v33  ;;  %1304 = vmatpush.bf16.msra.mxu2 %v5362_v36  ;;  %s7527_s27 = scalar_lea.hbm %s7526_s24, 1  ;;  %s7531_s14 = scalar_lea.hbm %s8595_s9, 2 }
  0x7f   : > { %1323 = vmatpush.bf16.msra.mxu3 %v5490_v40  ;;  %p7528_p0 = scmp.ne.s32.totalorder %s7526_s24, %s7527_s27  ;;  %p7532_p3 = scmp.lt.s32.totalorder %s7526_s24, %s8595_s9 }
  0x80   : > { %1267 = vmatpush.bf16.msra.mxu0 %v5470_v46  ;;  %p7533_p4 = scmp.lt.s32.totalorder %s7531_s14, %s7527_s27 }
  0x81   : > { %p7529_p1 = pnand %p7528_p0, %p7678_p5 }
  0x82   : > { %1286 = vmatpush.bf16.msra.mxu1 %v5218_v49  ;;  %1305 = vmatpush.bf16.msra.mxu2 %v5346_v51  ;;  %p7534_p7 = por %p7533_p4, %p7532_p3 }
  0x83   : > { %1236 = vmatmul.bf16.gmra.mxu2 %v7831_v35  ;;  %1324 = vmatpush.bf16.msra.mxu3 %v5474_v58  ;;  %p7530_p2 = pneg %p7529_p1 }
  0x84   : > { %1268 = vmatpush.bf16.msra.mxu0 %v5454_v0 }
  0x85   : > { %1217 = vmatmul.bf16.gmra.mxu1 %v7837_v6  ;;  %p7535_p8 = pnand %p7534_p7, %p7530_p2 }
  0x86   : > { %1287 = vmatpush.bf16.msra.mxu1 %v5202_v47  ;;  %1306 = vmatpush.bf16.msra.mxu2 %v5330_v1 }
  0x87   : > { %1325 = vmatpush.bf16.msra.mxu3 %v5458_v2 }
  0x8b   : > { %1269 = vmatmul.bf16.vlgmr.msra.gmra.mxu0 %v7814_v62 }
  0x8c   : > { %1326 = vmatmul.bf16.vlgmr.msra.gmra.mxu3 %v7814_v62 }
  0x93   : > { %1307 = vmatmul.bf16.vlgmr.msra.gmra.mxu2 %v7811_v57 }
  0x95   : > { %1288 = vmatmul.bf16.vlgmr.msra.gmra.mxu1 %v7796_v10 }
  0x9b   : > { %1274 = vmatmul.bf16.gmra.mxu0 %v7837_v6 }
  0x9c   : > { %1331 = vmatmul.bf16.gmra.mxu3 %v7837_v6 }
  0xa3   : > { %1312 = vmatmul.bf16.gmra.mxu2 %v7840_v21 }
  0xa5   : > { %1293 = vmatmul.bf16.gmra.mxu1 %v7831_v35 }
  0xc4   : > { %v1118_v3 = vpop.f32.mrf.mxu0 }
  0xc5   : > { %v1119_v57 = vadd.f32 %v1118_v3, %v7862_v5 }
  0xcb   : > { %v1175_v62 = vpop.f32.mrf.mxu3 }
  0xcc   : > { %v1120_v10 = vpop.f32.mrf.mxu0  ;;  %v1176_v43 = vadd.f32 %v1175_v62, %v590_v38 }
  0xcd   : > { %v1121_v62 = vadd.f32 %v1120_v10, %v7862_v5 }
  0xcf   : > { %v1137_v7 = vpop.f32.mrf.mxu1 }
  0xd0   : > { %v1138_v8 = vadd.f32 %v1137_v7, %v1119_v57 }
  0xd3   : > { %v1177_v11 = vpop.f32.mrf.mxu3 }
  0xd4   : > { %v1178_v61 = vadd.f32 %v1177_v11, %v590_v38 }
  0xd6   : > { %v1156_v9 = vpop.f32.mrf.mxu2 }
  0xd7   : > { %v7865_v6 = vadd.f32 %v1156_v9, %v1138_v8  ;;  %v7867_v21 = vpop.f32.mrf.mxu1 }
  0xd8   : > { %v1123_v35 = vpop.f32.mrf.mxu0 }
  0xd9   : > { %v1124_v14 = vadd.f32 %v1123_v35, %v7862_v5  ;;  %v1337_v4 = vmax.f32 %v7865_v6, 0.0 }
  0xde   : > { %v7869_v12 = vpop.f32.mrf.mxu2  ;;  %v7871_v13 = vpop.f32.mrf.mxu3 }
  0xe0   : > { %v1125_v15 = vpop.f32.mrf.mxu0 }
  0xe2   : > { %v1142_v16 = vpop.f32.mrf.mxu1 }
  0xe3   : > { %v1143_v17 = vadd.f32 %v1142_v16, %v1124_v14 }
  0xe6   : > { %v1161_v18 = vpop.f32.mrf.mxu2  ;;  %v7876_v20 = vpop.f32.mrf.mxu3 }
  0xe7   : > { %v7874_v19 = vadd.f32 %v1161_v18, %v1143_v17  ;;  %v1140_v18 = vadd.f32 %v7867_v21, %v1121_v62 }
  0xe8   : > { %v1194_v22 = vpop.f32.mrf.mxu0 }
  0xe9   : > { %v1195_v46 = vadd.f32 %v1194_v22, %v1176_v43  ;;  %v1126_v22 = vadd.f32 %v1125_v15, %v7862_v5 }
  0xea   : > { %v7878_v23 = vpop.f32.mrf.mxu1 }
  0xee   : > { %v7880_v24 = vpop.f32.mrf.mxu2 }
  0xef   : > { %v1251_v44 = vpop.f32.mrf.mxu3 }
  0xf0   : > { %v1196_v55 = vpop.f32.mrf.mxu0 }
  0xf1   : > { %v1197_v47 = vadd.f32 %v1196_v55, %v1178_v61 }
  0xf2   : > { %v1213_v25 = vpop.f32.mrf.mxu1 }
  0xf3   : > { %v1214_v56 = vadd.f32 %v1213_v25, %v1195_v46 }
  0xf5   : > { %v1338_v0 = vmax.f32 %v1214_v56, 0.0 }
  0xf6   : > { %v1232_v26 = vpop.f32.mrf.mxu2 }
  0xf7   : > { %v1253_v27 = vpop.f32.mrf.mxu3  ;;  %v1233_v45 = vadd.f32 %v1232_v26, %v7894_v39 }
  0xf8   : > { %v7882_v28 = vpop.f32.mrf.mxu0 }
  0xf9   : > { %v1252_v51 = vadd.f32 %v1251_v44, %v1233_v45  ;;  %v1183_v45 = vadd.f32 %v7876_v20, %v590_v38  ;;  %v1345_v20 = vmax.f32 %v7874_v19, 0.0 }
  0xfa   : > { %v1215_v29 = vpop.f32.mrf.mxu1 }
  0xfb   : > { %v1216_v35 = vadd.f32 %v1215_v29, %v1197_v47  ;;  %v1159_v29 = vadd.f32 %v7869_v12, %v1140_v18  ;;  %v1145_v12 = vadd.f32 %v7878_v23, %v1126_v22 }
  0xfe   : > { %v1234_v30 = vpop.f32.mrf.mxu2 }
  0xff   : > { %v7884_v31 = vpop.f32.mrf.mxu3  ;;  %v1235_v8 = vadd.f32 %v1234_v30, %v7894_v39  ;;  %v1181_v30 = vadd.f32 %v7871_v13, %v590_v38 }
 0x100   : > { %v7888_v33 = vpop.f32.mrf.mxu0 }
 0x101   : > { %v1254_v55 = vadd.f32 %v1253_v27, %v1235_v8  ;;  %v1200_v27 = vadd.f32 %v7882_v28, %v1181_v30 }
 0x102   : > { %v7886_v32 = vpop.f32.mrf.mxu1 }
 0x103   : > { %v1219_v23 = vadd.f32 %v7886_v32, %v1200_v27 }
 0x106   : > { %v1237_v34 = vpop.f32.mrf.mxu2 }
 0x107   : > { %v7892_v37 = vpop.f32.mrf.mxu3  ;;  %v1238_v46 = vadd.f32 %v1237_v34, %v7894_v39  ;;  %v7921_v34 = vadd.f32 %v7880_v24, %v1145_v12 }
 0x108   : > { %v1270_v40 = vpop.f32.mrf.mxu0 }
 0x109   : > { %v1271_v58 = vadd.f32 %v1270_v40, %v1252_v51  ;;  %v1342_v40 = vmax.f32 %v1216_v35, 0.0  ;;  %v1202_v51 = vadd.f32 %v7888_v33, %v1183_v45 }
 0x10a   : > { %v7890_v36 = vpop.f32.mrf.mxu1 }
 0x10b   : > { %v1339_v1 = vmax.f32 %v1271_v58, 0.0  ;;  %v1341_v58 = vmax.f32 %v1159_v29, 0.0  ;;  %v7928_v19 = vadd.f32 %v7890_v36, %v1202_v51 }
 0x10d   : > { %v1353_v11 = vmax.f32 %v1337_v4, %v1339_v1 }
 0x10e   : > { %v1239_v41 = vpop.f32.mrf.mxu2 }
 0x10f   : > { %v1327_v54 = vpop.f32.mrf.mxu3 }
 0x110   : > { %v1272_v60 = vpop.f32.mrf.mxu0 }
 0x111   : > { %v1273_v21 = vadd.f32 %v1272_v60, %v1254_v55  ;;  %v1257_v60 = vadd.f32 %v7884_v31, %v1238_v46 }
 0x112   : > { %v1289_v49 = vpop.f32.mrf.mxu1 }
 0x113   : > { %v1290_v50 = vadd.f32 %v1289_v49, %v7896_v42  ;;  %v1343_v28 = vmax.f32 %v1273_v21, 0.0 }
 0x115   : > { %v1355_v36 = vmax.f32 %v1341_v58, %v1343_v28 }
 0x116   : > { %v1308_v53 = vpop.f32.mrf.mxu2 }
 0x117   : > { %v1309_v59 = vadd.f32 %v1308_v53, %v1290_v50  ;;  %v1329_v17 = vpop.f32.mrf.mxu3  ;;  %v1240_v53 = vadd.f32 %v1239_v41, %v7894_v39 }
 0x118   : > { %v1275_v44 = vpop.f32.mrf.mxu0 }
 0x119   : > { %v1328_v63 = vadd.f32 %v1327_v54, %v1309_v59  ;;  %v1259_v47 = vadd.f32 %v7892_v37, %v1240_v53 }
 0x11a   : > { %v1291_v3 = vpop.f32.mrf.mxu1 }
 0x11b   : > { %v1340_v2 = vmax.f32 %v1328_v63, 0.0  ;;  %v1292_v7 = vadd.f32 %v1291_v3, %v7896_v42 }
 0x11d   : > { %v1354_v57 = vmax.f32 %v1338_v0, %v1340_v2  ;;  %v1276_v2 = vadd.f32 %v1275_v44, %v1257_v60 }
 0x11e   : > { %v1310_v9 = vpop.f32.mrf.mxu2 }
 0x11f   : > { %v1369_v14 = vrot.slane %v1354_v57, 6  ;;  %v1311_v16 = vadd.f32 %v1310_v9, %v1292_v7  ;;  %v1332_v59 = vpop.f32.mrf.mxu3  ;;  %v1349_v7 = vmax.f32 %v7921_v34, 0.0 }
 0x120   : > { %v1277_v32 = vpop.f32.mrf.mxu0 }
 0x121   : > { %v1374_v6 = vsel %vm8601_vm6, %v1353_v11, %v1369_v14  ;;  %v1376_v10 = vsel %vm8599_vm7, %v1353_v11, %v1369_v14  ;;  %v1330_v26 = vadd.f32 %v1329_v17, %v1311_v16  ;;  %v1379_v49 = vsel %vm8598_vm8, %v1353_v11, %v1369_v14 }
 0x122   : > { %v1377_v25 = vrot.slane %v1376_v10, 2  ;;  %1405 = vst [vmem:[#allocation1] ss:$4 sm:$0xff] %v1374_v6  ;;  %v1294_v43 = vpop.f32.mrf.mxu1  ;;  %v1382_v54 = vsel %vm8597_vm9, %v1369_v14, %v1353_v11  ;;  %v1380_v38 = vrot.slane %v1379_v49, 4  ;;  %v1346_v11 = vmax.f32 %v1219_v23, 0.0 }
 0x123   : > { %v1344_v5 = vmax.f32 %v1330_v26, 0.0  ;;  %v1295_v15 = vadd.f32 %v1294_v43, %v7896_v42  ;;  %v1383_v63 = vrot.slane %v1382_v54, 6  ;;  %v7934_v16 = vadd.f32 %v1277_v32, %v1259_v47 }
 0x124   : > { %1409 = vst [vmem:[#allocation1 + $0x20] ss:$4 sm:$0xff] %v1377_v25  ;;  %v1350_v17 = vmax.f32 %v7928_v19, 0.0  ;;  %v1347_v6 = vmax.f32 %v1276_v2, 0.0 }
 0x125   : > { %v1356_v50 = vmax.f32 %v1342_v40, %v1344_v5 }
 0x126   : > { %v1313_v13 = vpop.f32.mrf.mxu2  ;;  %v1357_v12 = vmax.f32 %v1345_v20, %v1347_v6 }
 0x127   : > { %v1314_v56 = vadd.f32 %v1313_v13, %v1295_v15  ;;  %v1370_v0 = vrot.slane %v1356_v50, 6  ;;  %v1351_v15 = vmax.f32 %v7934_v16, 0.0 }
 0x129   : > { %v1406_v61 = vld.sshfl [vmem:[#allocation1] sm:$0xff pattern:$0x73625140]  ;;  %v1407_v33 = vld.sshfl [vmem:[#allocation1 + $0x8] sm:$0xff pattern:$0x73625140]  ;;  %v1333_v3 = vadd.f32 %v1332_v59, %v1314_v56  ;;  %v1385_v22 = vsel %vm8599_vm7, %v1355_v36, %v1370_v0  ;;  %v1384_v30 = vsel %vm8601_vm6, %v1355_v36, %v1370_v0  ;;  %v1387_v46 = vsel %vm8598_vm8, %v1355_v36, %v1370_v0 }
 0x12a   : > { %1412 = vst [vmem:[#allocation1] ss:$4 sm:$0xff] %v1380_v38  ;;  %v1486_v39 = vsel %vm8601_vm6, %v1406_v61, -inf  ;;  %v1493_v41 = vsel %vm8601_vm6, %v1407_v33, -inf  ;;  %v1296_v35 = vpop.f32.mrf.mxu1  ;;  %v1386_v5 = vrot.slane %v1385_v22, 2  ;;  %v1389_v49 = vsel %vm8597_vm9, %v1370_v0, %v1355_v36  ;;  %v1334_v38 = vpop.f32.mrf.mxu3 }
 0x12b   : > { %v1410_v24 = vld.sshfl [vmem:[#allocation1 + $0x20] sm:$0xff pattern:$0x73625140]  ;;  %v1411_v1 = vld.sshfl [vmem:[#allocation1 + $0x28] sm:$0xff pattern:$0x73625140]  ;;  %v1297_v25 = vadd.f32 %v1296_v35, %v7896_v42 }
 0x12c   : > { %1415 = vst [vmem:[#allocation1 + $0x20] ss:$4 sm:$0xff] %v1383_v63  ;;  %v1487_v31 = vrot.slane %v1486_v39, 4  ;;  %v1494_v4 = vrot.slane %v1493_v41, 4  ;;  %v1500_v62 = vsel %vm8601_vm6, %v1410_v24, -inf  ;;  %v1507_v57 = vsel %vm8601_vm6, %v1411_v1, -inf }
 0x12d   : > { %v1501_v8 = vrot.slane %v1500_v62, 4  ;;  %v1508_v9 = vrot.slane %v1507_v57, 4  ;;  %v1348_v55 = vmax.f32 %v1333_v3, 0.0  ;;  %v1388_v20 = vrot.slane %v1387_v46, 4  ;;  %v5710_v24 = vld [vmem:[#allocation9 + $0xe0] sm:$0xf] }
 0x12e   : > { %v1488_v37 = vmax.f32 %v1486_v39, %v1487_v31  ;;  %v1495_v14 = vmax.f32 %v1493_v41, %v1494_v4  ;;  %v1315_v40 = vpop.f32.mrf.mxu2  ;;  %v1390_v23 = vrot.slane %v1389_v49, 6  ;;  %v7048_v1 = vld [vmem:[#allocation9 + $0xec] sm:$0xf0]  ;;  %v5822_v46 = vld [vmem:[#allocation9 + $0x1c0] sm:$0xf] }
 0x12f   : > { %v1502_v18 = vmax.f32 %v1500_v62, %v1501_v8  ;;  %v1509_v44 = vmax.f32 %v1507_v57, %v1508_v9  ;;  %v1358_v13 = vmax.f32 %v1346_v11, %v1348_v55  ;;  %v1316_v51 = vadd.f32 %v1315_v40, %v1297_v25  ;;  %v5838_v40 = vld [vmem:[#allocation9 + $0x1e0] sm:$0xf]  ;;  %v7076_v49 = vld [vmem:[#allocation9 + $0x1cc] sm:$0xf0] }
 0x130   : > { %v1489_v10 = vrot.slane %v1488_v37, 2  ;;  %v1496_v43 = vrot.slane %v1495_v14, 2  ;;  %v5711_v55 = vor.u32 %v7048_v1, %v5710_v24 }
 0x131   : > { %v1413_v26 = vld.sshfl [vmem:[#allocation1] sm:$0xff pattern:$0x73625140]  ;;  %v1414_v29 = vld.sshfl [vmem:[#allocation1 + $0x8] sm:$0xff pattern:$0x73625140]  ;;  %v1335_v47 = vadd.f32 %v1334_v38, %v1316_v51 }
 0x132   : > { %v1503_v21 = vrot.slane %v1502_v18, 2  ;;  %1418 = vst [vmem:[#allocation1] ss:$4 sm:$0xff] %v1384_v30  ;;  %v7943_v50 = vmax.f32 %v1488_v37, %v1489_v10  ;;  %v1510_v42 = vrot.slane %v1509_v44, 2  ;;  %v1514_v53 = vsel %vm8601_vm6, %v1413_v26, -inf  ;;  %3093 = vmatpush.bf16.msrb.mxu0 %v5711_v55 }
 0x133   : > { %v1416_v45 = vld.sshfl [vmem:[#allocation1 + $0x20] sm:$0xff pattern:$0x73625140]  ;;  %v1417_v27 = vld.sshfl [vmem:[#allocation1 + $0x28] sm:$0xff pattern:$0x73625140]  ;;  %v7949_v28 = vmax.f32 %v1495_v14, %v1496_v43 }
 0x134   : > { %1421 = vst [vmem:[#allocation1 + $0x20] ss:$4 sm:$0xff] %v1386_v5  ;;  %v1521_v54 = vsel %vm8601_vm6, %v1414_v29, -inf  ;;  %v1528_v56 = vsel %vm8601_vm6, %v1416_v45, -inf  ;;  %v1535_v58 = vsel %vm8601_vm6, %v1417_v27, -inf  ;;  %v7951_v59 = vmax.f32 %v1502_v18, %v1503_v21 }
 0x135   : > { %v1515_v60 = vrot.slane %v1514_v53, 4  ;;  %v1522_v61 = vrot.slane %v1521_v54, 4  ;;  %v1529_v33 = vrot.slane %v1528_v56, 4  ;;  %v1536_v63 = vrot.slane %v1535_v58, 4  ;;  %v7080_v43 = vld [vmem:[#allocation9 + $0x1ec] sm:$0xf0] }
 0x136   : > { %v1491_v39 = vrot.slane %v7943_v50, 1  ;;  %v7954_v41 = vmax.f32 %v1509_v44, %v1510_v42  ;;  %v1371_v0 = vrot.slane %v1358_v13, 6  ;;  %v1498_v57 = vrot.slane %v7949_v28, 1  ;;  %v5694_v45 = vld [vmem:[#allocation9 + $0xc0] sm:$0xf] }
 0x137   : > { %v1516_v2 = vmax.f32 %v1514_v53, %v1515_v60  ;;  %v1523_v32 = vmax.f32 %v1521_v54, %v1522_v61  ;;  %v1530_v3 = vmax.f32 %v1528_v56, %v1529_v33  ;;  %v1537_v31 = vmax.f32 %v1535_v58, %v1536_v63  ;;  %v7044_v27 = vld [vmem:[#allocation9 + $0xcc] sm:$0xf0]  ;;  %v5966_v53 = vld [vmem:[#allocation9 + $0x2e0] sm:$0xf] }
 0x138   : > { %v1505_v8 = vrot.slane %v7951_v59, 1  ;;  %v1391_v36 = vsel %vm8601_vm6, %v1357_v12, %v1371_v0  ;;  %v1392_v6 = vsel %vm8599_vm7, %v1357_v12, %v1371_v0  ;;  %v7967_v10 = vsel %vm8598_vm8, %v1357_v12, %v1371_v0  ;;  %v7112_v60 = vld [vmem:[#allocation9 + $0x2ec] sm:$0xf0]  ;;  %v6094_v61 = vld [vmem:[#allocation9 + $0x3e0] sm:$0xf] }
 0x139   : > { %v1419_v4 = vld.sshfl [vmem:[#allocation1] sm:$0xff pattern:$0x73625140]  ;;  %v1420_v62 = vld.sshfl [vmem:[#allocation1 + $0x8] sm:$0xff pattern:$0x73625140]  ;;  %v7970_v44 = vsel %vm8597_vm9, %v1371_v0, %v1357_v12 }
 0x13a   : > { %1424 = vst [vmem:[#allocation1] ss:$4 sm:$0xff] %v1388_v20  ;;  %v1542_v9 = vsel %vm8601_vm6, %v1419_v4, -inf  ;;  %v1517_v35 = vrot.slane %v1516_v2, 2  ;;  %v1524_v11 = vrot.slane %v1523_v32, 2  ;;  %v1531_v37 = vrot.slane %v1530_v3, 2 }
 0x13b   : > { %v1549_v14 = vsel %vm8601_vm6, %v1420_v62, -inf  ;;  %v7961_v18 = vld.sshfl [vmem:[#allocation1 + $0x20] sm:$0xff pattern:$0x73625140]  ;;  %v1512_v25 = vrot.slane %v7954_v41, 1  ;;  %v1538_v30 = vrot.slane %v1537_v31, 2  ;;  %v5695_v4 = vor.u32 %v7044_v27, %v5694_v45 }
 0x13c   : > { %v7963_v22 = vld.sshfl [vmem:[#allocation1 + $0x28] sm:$0xff pattern:$0x73625140]  ;;  %v7973_v26 = vmax.f32 %v1516_v2, %v1517_v35  ;;  %v7975_v29 = vmax.f32 %v1523_v32, %v1524_v11  ;;  %v1543_v21 = vrot.slane %v1542_v9, 4  ;;  %v1550_v5 = vrot.slane %v1549_v14, 4 }
 0x13d   : > { %1427 = vst [vmem:[#allocation1 + $0x20] ss:$4 sm:$0xff] %v1390_v23  ;;  %v7978_v42 = vmax.f32 %v1530_v3, %v1531_v37  ;;  %v1393_v13 = vrot.slane %v1392_v6, 2  ;;  %v1395_v51 = vrot.slane %v7967_v10, 4  ;;  %v1352_v38 = vmax.f32 %v1335_v47, 0.0  ;;  %3094 = vmatpush.bf16.msrb.mxu0 %v5695_v4 }
 0x13e   : > { %v1519_v12 = vrot.slane %v7973_v26, 1  ;;  %v1526_v54 = vrot.slane %v7975_v29, 1  ;;  %v1544_v56 = vmax.f32 %v1542_v9, %v1543_v21  ;;  %v1551_v58 = vmax.f32 %v1549_v14, %v1550_v5  ;;  %v5678_v20 = vld [vmem:[#allocation9 + $0xa0] sm:$0xf]  ;;  %v7040_v23 = vld [vmem:[#allocation9 + $0xac] sm:$0xf0] }
 0x13f   : > { %v7982_v33 = vmax.f32 %v1537_v31, %v1538_v30  ;;  %v5839_v2 = vor.u32 %v7080_v43, %v5838_v40  ;;  %v7144_v32 = vld [vmem:[#allocation9 + $0x3ec] sm:$0xf0]  ;;  %v1533_v3 = vrot.slane %v7978_v42, 1  ;;  %v1360_v47 = vmax.f32 %v1350_v17, %v1352_v38  ;;  %v5806_v9 = vld [vmem:[#allocation9 + $0x1a0] sm:$0xf] }
 0x140   : > { %v1545_v24 = vrot.slane %v1544_v56, 2  ;;  %v1552_v1 = vrot.slane %v1551_v58, 2  ;;  %v5823_v62 = vor.u32 %v7076_v49, %v5822_v46  ;;  %v7072_v35 = vld [vmem:[#allocation9 + $0x1ac] sm:$0xf0]  ;;  %v6095_v6 = vor.u32 %v7144_v32, %v6094_v61  ;;  %v5662_v55 = vld [vmem:[#allocation9 + $0x80] sm:$0xf] }
 0x141   : > { %v7984_v63 = vld.sshfl [vmem:[#allocation1] sm:$0xff pattern:$0x73625140]  ;;  %v7986_v0 = vld.sshfl [vmem:[#allocation1 + $0x8] sm:$0xff pattern:$0x73625140]  ;;  %3107 = vmatpush.bf16.msrb.mxu1 %v5839_v2  ;;  %v5679_v17 = vor.u32 %v7040_v23, %v5678_v20  ;;  %v5807_v21 = vor.u32 %v7072_v35, %v5806_v9 }
 0x142   : > { %1430 = vst [vmem:[#allocation1] ss:$4 sm:$0xff] %v1391_v36  ;;  %v7995_v37 = vmax.f32 %v1544_v56, %v1545_v24  ;;  %v7997_v14 = vmax.f32 %v1551_v58, %v1552_v1  ;;  %v5967_v36 = vor.u32 %v7112_v60, %v5966_v53  ;;  %v1540_v10 = vrot.slane %v7982_v33, 1  ;;  %3135 = vmatpush.bf16.msrb.mxu3 %v6095_v6  ;;  %v7036_v30 = vld [vmem:[#allocation9 + $0x8c] sm:$0xf0] }
 0x143   : > { %v1397_v19 = vrot.slane %v7970_v44, 6  ;;  %v5950_v40 = vld [vmem:[#allocation9 + $0x2c0] sm:$0xf]  ;;  %v7108_v43 = vld [vmem:[#allocation9 + $0x2cc] sm:$0xf0]  ;;  %v8003_v53 = vrot.slane %v1360_v47, 6  ;;  %3095 = vmatpush.bf16.msrb.mxu0 %v5679_v17  ;;  %v5663_v38 = vor.u32 %v7036_v30, %v5662_v55 }
 0x144   : > { %v7991_v31 = vld.sshfl [vmem:[#allocation1 + $0x20] sm:$0xff pattern:$0x73625140]  ;;  %v7993_v11 = vld.sshfl [vmem:[#allocation1 + $0x28] sm:$0xff pattern:$0x73625140]  ;;  %3121 = vmatpush.bf16.msrb.mxu2 %v5967_v36  ;;  %v5951_v20 = vor.u32 %v7108_v43, %v5950_v40 }
 0x145   : > { %1433 = vst [vmem:[#allocation1 + $0x20] ss:$4 sm:$0xff] %v1393_v13  ;;  %v5790_v5 = vld [vmem:[#allocation9 + $0x180] sm:$0xf]  ;;  %v7140_v27 = vld [vmem:[#allocation9 + $0x3cc] sm:$0xf0]  ;;  %3108 = vmatpush.bf16.msrb.mxu1 %v5823_v62 }
 0x146   : > { %v6078_v45 = vld [vmem:[#allocation9 + $0x3c0] sm:$0xf]  ;;  %v1547_v46 = vrot.slane %v7995_v37, 1  ;;  %v7068_v44 = vld [vmem:[#allocation9 + $0x18c] sm:$0xf0]  ;;  %v8007_v13 = vsel %vm8601_vm6, %v7961_v18, -inf }
 0x147   : > { %v6079_v23 = vor.u32 %v7140_v27, %v6078_v45  ;;  %v5646_v60 = vld [vmem:[#allocation9 + $0x60] sm:$0xf]  ;;  %v7032_v61 = vld [vmem:[#allocation9 + $0x6c] sm:$0xf0]  ;;  %v5791_v18 = vor.u32 %v7068_v44, %v5790_v5  ;;  %3096 = vmatpush.bf16.msrb.mxu0 %v5663_v38 }
 0x148   : > { %3122 = vmatpush.bf16.msrb.mxu2 %v5951_v20  ;;  %v5774_v24 = vld [vmem:[#allocation9 + $0x160] sm:$0xf]  ;;  %v7064_v1 = vld [vmem:[#allocation9 + $0x16c] sm:$0xf0]  ;;  %v5647_v4 = vor.u32 %v7032_v61, %v5646_v60 }
 0x149   : > { %v1431_v56 = vld.sshfl [vmem:[#allocation1] sm:$0xff pattern:$0x73625140]  ;;  %v1432_v58 = vld.sshfl [vmem:[#allocation1 + $0x8] sm:$0xff pattern:$0x73625140]  ;;  %3136 = vmatpush.bf16.msrb.mxu3 %v6079_v23  ;;  %3109 = vmatpush.bf16.msrb.mxu1 %v5807_v21  ;;  %v5775_v34 = vor.u32 %v7064_v1, %v5774_v24 }
 0x14a   : > { %1436 = vst [vmem:[#allocation1] ss:$4 sm:$0xff] %v1395_v51  ;;  %v5934_v2 = vld [vmem:[#allocation9 + $0x2a0] sm:$0xf]  ;;  %v7104_v62 = vld [vmem:[#allocation9 + $0x2ac] sm:$0xf0]  ;;  %v8017_v51 = vmax.f32 %v1349_v7, %v1351_v15 }
 0x14b   : > { %v6062_v9 = vld [vmem:[#allocation9 + $0x3a0] sm:$0xf]  ;;  %v5935_v35 = vor.u32 %v7104_v62, %v5934_v2  ;;  %v7136_v36 = vld [vmem:[#allocation9 + $0x3ac] sm:$0xf0]  ;;  %v8020_v55 = vsel %vm8601_vm6, %v1431_v56, -inf  ;;  %v8023_v30 = vsel %vm8601_vm6, %v1432_v58, -inf  ;;  %3097 = vmatpush.bf16.msrb.mxu0 %v5647_v4 }
 0x14c   : > { %v8009_v32 = vld.sshfl [vmem:[#allocation1 + $0x20] sm:$0xff pattern:$0x73625140]  ;;  %v8011_v47 = vld.sshfl [vmem:[#allocation1 + $0x28] sm:$0xff pattern:$0x73625140]  ;;  %v1401_v16 = vsel %vm8598_vm8, %v8017_v51, %v8003_v53  ;;  %v1398_v27 = vsel %vm8601_vm6, %v8017_v51, %v8003_v53 }
 0x14d   : > { %1439 = vst [vmem:[#allocation1 + $0x20] ss:$4 sm:$0xff] %v1397_v19  ;;  %v5630_v6 = vld [vmem:[#allocation9 + $0x40] sm:$0xf]  ;;  %v7028_v17 = vld [vmem:[#allocation9 + $0x4c] sm:$0xf0]  ;;  %v6063_v19 = vor.u32 %v7136_v36, %v6062_v9  ;;  %3110 = vmatpush.bf16.msrb.mxu1 %v5791_v18  ;;  %3123 = vmatpush.bf16.msrb.mxu2 %v5935_v35 }
 0x14e   : > { %v5758_v40 = vld [vmem:[#allocation9 + $0x140] sm:$0xf]  ;;  %v7060_v43 = vld [vmem:[#allocation9 + $0x14c] sm:$0xf0]  ;;  %v5631_v44 = vor.u32 %v7028_v17, %v5630_v6  ;;  %v1599_v20 = vrot.slane %v8020_v55, 4  ;;  %v1606_v23 = vrot.slane %v8023_v30, 4 }
 0x14f   : > { %v5918_v7 = vld [vmem:[#allocation9 + $0x280] sm:$0xf]  ;;  %v7100_v15 = vld [vmem:[#allocation9 + $0x28c] sm:$0xf0]  ;;  %3137 = vmatpush.bf16.msrb.mxu3 %v6063_v19  ;;  %v1402_v60 = vrot.slane %v1401_v16, 4  ;;  %v5759_v1 = vor.u32 %v7060_v43, %v5758_v40  ;;  %vm1802_vm8 = vcmask 1047559  }
 0x150   : > { %v6046_v21 = vld [vmem:[#allocation9 + $0x380] sm:$0xf]  ;;  %v5919_v56 = vor.u32 %v7100_v15, %v5918_v7  ;;  %v7132_v58 = vld [vmem:[#allocation9 + $0x38c] sm:$0xf0]  ;;  %3098 = vmatpush.bf16.msrb.mxu0 %v5631_v44  ;;  %v8052_v49 = vmax.f32 %v8020_v55, %v1599_v20 }
 0x151   : > { %v8028_v5 = vld.sshfl [vmem:[#allocation1] sm:$0xff pattern:$0x73625140]  ;;  %v8030_v45 = vld.sshfl [vmem:[#allocation1 + $0x8] sm:$0xff pattern:$0x73625140]  ;;  %v6047_v61 = vor.u32 %v7132_v58, %v6046_v21  ;;  %3111 = vmatpush.bf16.msrb.mxu1 %v5775_v34 }
 0x152   : > { %1442 = vst [vmem:[#allocation1] ss:$4 sm:$0xff] %v1398_v27  ;;  %v5614_v38 = vld [vmem:[#allocation9 + $0x20] sm:$0xf]  ;;  %v7024_v24 = vld [vmem:[#allocation9 + $0x2c] sm:$0xf0]  ;;  %3124 = vmatpush.bf16.msrb.mxu2 %v5919_v56 }
 0x153   : > { %v5902_v2 = vld [vmem:[#allocation9 + $0x260] sm:$0xf]  ;;  %v7096_v18 = vld [vmem:[#allocation9 + $0x26c] sm:$0xf0]  ;;  %3138 = vmatpush.bf16.msrb.mxu3 %v6047_v61  ;;  %v5615_v4 = vor.u32 %v7024_v24, %v5614_v38  ;;  %v8040_v61 = vsel %vm8599_vm7, %v8017_v51, %v8003_v53  ;;  %vm8603_vm7 = vcmask 1041409  }
 0x154   : > { %v6030_v62 = vld [vmem:[#allocation9 + $0x360] sm:$0xf]  ;;  %v7056_v35 = vld [vmem:[#allocation9 + $0x12c] sm:$0xf0]  ;;  %v5903_v36 = vor.u32 %v7096_v18, %v5902_v2 }
 0x155   : > { %v5742_v9 = vld [vmem:[#allocation9 + $0x120] sm:$0xf]  ;;  %v7128_v6 = vld [vmem:[#allocation9 + $0x36c] sm:$0xf0]  ;;  %3112 = vmatpush.bf16.msrb.mxu1 %v5759_v1  ;;  %3099 = vmatpush.bf16.msrb.mxu0 %v5615_v4 }
 0x156   : > { %v6031_v17 = vor.u32 %v7128_v6, %v6030_v62  ;;  %v5598_v19 = vld [vmem:[#allocation9] sm:$0xf]  ;;  %v7020_v7 = vld [vmem:[#allocation9 + $0xc] sm:$0xf0]  ;;  %v5743_v43 = vor.u32 %v7056_v35, %v5742_v9  ;;  %3125 = vmatpush.bf16.msrb.mxu2 %v5903_v36  ;;  %v8049_v36 = vsel %vm8597_vm9, %v8003_v53, %v8017_v51  ;;  %vm1800_vm9 = vcmask 1046534  }
 0x157   : > { %v5886_v15 = vld [vmem:[#allocation9 + $0x240] sm:$0xf]  ;;  %v7052_v21 = vld [vmem:[#allocation9 + $0x10c] sm:$0xf0]  ;;  %v5599_v18 = vor.u32 %v7020_v7, %v5598_v19 }
 0x158   : > { %v5726_v16 = vld [vmem:[#allocation9 + $0x100] sm:$0xf]  ;;  %v7092_v27 = vld [vmem:[#allocation9 + $0x24c] sm:$0xf0]  ;;  %3139 = vmatpush.bf16.msrb.mxu3 %v6031_v17 }
 0x159   : > { %v6014_v34 = vld [vmem:[#allocation9 + $0x340] sm:$0xf]  ;;  %v7124_v40 = vld [vmem:[#allocation9 + $0x34c] sm:$0xf0]  ;;  %v5887_v56 = vor.u32 %v7092_v27, %v5886_v15  ;;  %3113 = vmatpush.bf16.msrb.mxu1 %v5743_v43  ;;  %v5727_v17 = vor.u32 %v7052_v21, %v5726_v16  ;;  %3100 = vmatpush.bf16.msrb.mxu0 %v5599_v18  ;;  %v1404_v16 = vrot.slane %v8049_v36, 6 }
 0x15a   : > { %v6222_v44 = vld [vmem:[#allocation9 + $0x4e0] sm:$0xf]  ;;  %v7176_v58 = vld [vmem:[#allocation9 + $0x4ec] sm:$0xf0]  ;;  %v6015_v62 = vor.u32 %v7124_v40, %v6014_v34  ;;  %v8056_v34 = vmax.f32 %v8023_v30, %v1606_v23  ;;  %v1492_v30 = vmax.f32 %v7943_v50, %v1491_v39  ;;  %v1499_v23 = vmax.f32 %v7949_v28, %v1498_v57  ;;  %v7046_v18 = vld [vmem:[#allocation9 + $0xe4] sm:$0xf] }
 0x15b   : > { %v6350_v38 = vld [vmem:[#allocation9 + $0x5e0] sm:$0xf]  ;;  %v8042_v24 = vld.sshfl [vmem:[#allocation1] sm:$0xff pattern:$0x73625140]  ;;  %v6223_v1 = vor.u32 %v7176_v58, %v6222_v44  ;;  %3126 = vmatpush.bf16.msrb.mxu2 %v5887_v56 }
 0x15c   : > { %v8044_v2 = vld.sshfl [vmem:[#allocation1 + $0x8] sm:$0xff pattern:$0x73625140]  ;;  %v7208_v9 = vld [vmem:[#allocation9 + $0x5ec] sm:$0xf0]  ;;  %3140 = vmatpush.bf16.msrb.mxu3 %v6015_v62 }
 0x15d   : > { %1448 = vst [vmem:[#allocation1] ss:$4 sm:$0xff] %v1402_v60  ;;  %v5870_v35 = vld [vmem:[#allocation9 + $0x220] sm:$0xf]  ;;  %v7088_v6 = vld [vmem:[#allocation9 + $0x22c] sm:$0xf0]  ;;  %v6351_v53 = vor.u32 %v7208_v9, %v6350_v38  ;;  %3149 = vmatpush.bf16.msra.mxu0 %v6223_v1  ;;  %3114 = vmatpush.bf16.msrb.mxu1 %v5727_v17  ;;  %v1506_v17 = vmax.f32 %v7951_v59, %v1505_v8 }
 0x15e   : > { %v5998_v15 = vld [vmem:[#allocation9 + $0x320] sm:$0xf]  ;;  %v7120_v27 = vld [vmem:[#allocation9 + $0x32c] sm:$0xf0]  ;;  %v5871_v60 = vor.u32 %v7088_v6, %v5870_v35  ;;  %v1557_v35 = vrot.slane %v8007_v13, 4  ;;  %v1601_v9 = vrot.slane %v8052_v49, 2 }
 0x15f   : > { %v6206_v19 = vld [vmem:[#allocation9 + $0x4c0] sm:$0xf]  ;;  %v7172_v7 = vld [vmem:[#allocation9 + $0x4cc] sm:$0xf0]  ;;  %v5999_v51 = vor.u32 %v7120_v27, %v5998_v15  ;;  %v5712_v62 = vld [vmem:[#allocation9 + $0xf0] sm:$0xf0] }
 0x160   : > { %v6334_v40 = vld [vmem:[#allocation9 + $0x5c0] sm:$0xf]  ;;  %v7084_v58 = vld [vmem:[#allocation9 + $0x20c] sm:$0xf0]  ;;  %v6207_v55 = vor.u32 %v7172_v7, %v6206_v19  ;;  %3127 = vmatpush.bf16.msrb.mxu2 %v5871_v60  ;;  %v7078_v1 = vld [vmem:[#allocation9 + $0x1e4] sm:$0xf]  ;;  %v5715_v28 = vor.u32 %v7046_v18, %v5712_v62  ;;  %v1513_v60 = vmax.f32 %v7954_v41, %v1512_v25  ;;  %v1534_v41 = vmax.f32 %v7978_v42, %v1533_v3 }
 0x161   : > { %v5854_v44 = vld [vmem:[#allocation9 + $0x200] sm:$0xf]  ;;  %v7204_v20 = vld [vmem:[#allocation9 + $0x5cc] sm:$0xf0]  ;;  %v1608_v6 = vrot.slane %v8056_v34, 2  ;;  %3163 = vmatpush.bf16.msra.mxu1 %v6351_v53  ;;  %3141 = vmatpush.bf16.msrb.mxu3 %v5999_v51  ;;  %v8087_v25 = vpack.c.bf16 %v1499_v23, %v1492_v30 }
 0x162   : > { %v5982_v4 = vld [vmem:[#allocation9 + $0x300] sm:$0xf]  ;;  %v7116_v43 = vld [vmem:[#allocation9 + $0x30c] sm:$0xf0]  ;;  %v5855_v38 = vor.u32 %v7084_v58, %v5854_v44  ;;  %v6335_v15 = vor.u32 %v7204_v20, %v6334_v40  ;;  %v5840_v19 = vld [vmem:[#allocation9 + $0x1f0] sm:$0xf0]  ;;  %3150 = vmatpush.bf16.msra.mxu0 %v6207_v55  ;;  %v1527_v58 = vmax.f32 %v7975_v29, %v1526_v54  ;;  %v1541_v54 = vmax.f32 %v7982_v33, %v1540_v10 }
 0x163   : > { %v6190_v21 = vld [vmem:[#allocation9 + $0x4a0] sm:$0xf]  ;;  %v7168_v56 = vld [vmem:[#allocation9 + $0x4ac] sm:$0xf0]  ;;  %v5983_v27 = vor.u32 %v7116_v43, %v5982_v4  ;;  %v5843_v44 = vor.u32 %v7078_v1, %v5840_v19  ;;  %v7042_v51 = vld [vmem:[#allocation9 + $0xc4] sm:$0xf]  ;;  %v1520_v4 = vmax.f32 %v7973_v26, %v1519_v12  ;;  %v8102_v18 = vpack.c.bf16 %v1513_v60, %v1506_v17 }
 0x164   : > { %v6191_v50 = vor.u32 %v7168_v56, %v6190_v21  ;;  %v6318_v39 = vld [vmem:[#allocation9 + $0x5a0] sm:$0xf]  ;;  %v7200_v7 = vld [vmem:[#allocation9 + $0x5ac] sm:$0xf0]  ;;  %v5696_v40 = vld [vmem:[#allocation9 + $0xd0] sm:$0xf0]  ;;  %3128 = vmatpush.bf16.msrb.mxu2 %v5855_v38 }
 0x165   : > { %v6174_v57 = vld [vmem:[#allocation9 + $0x480] sm:$0xf]  ;;  %v7164_v53 = vld [vmem:[#allocation9 + $0x48c] sm:$0xf0]  ;;  %v7074_v8 = vld [vmem:[#allocation9 + $0x1c4] sm:$0xf]  ;;  %3164 = vmatpush.bf16.msra.mxu1 %v6335_v15  ;;  %3142 = vmatpush.bf16.msrb.mxu3 %v5983_v27  ;;  %v6319_v26 = vor.u32 %v7200_v7, %v6318_v39  ;;  %v5699_v56 = vor.u32 %v7042_v51, %v5696_v40  ;;  %v8115_v27 = vmax.f32 %v7995_v37, %v1547_v46 }
 0x166   : > { %v8080_v55 = vld [vmem:[#allocation9 + $0x580] sm:$0xf]  ;;  %v8082_v59 = vld [vmem:[#allocation9 + $0x58c] sm:$0xf0]  ;;  %v5824_v20 = vld [vmem:[#allocation9 + $0x1d0] sm:$0xf0]  ;;  %3151 = vmatpush.bf16.msra.mxu0 %v6191_v50  ;;  %v6175_v21 = vor.u32 %v7164_v53, %v6174_v57  ;;  %v1558_v57 = vmax.f32 %v8007_v13, %v1557_v35  ;;  %v8131_v17 = vpack.c.bf16 %v1527_v58, %v1520_v4  ;;  %v8149_v13 = vmax.f32 %v8056_v34, %v1608_v6 }
 0x167   : > { %v8089_v12 = vld [vmem:[#allocation9 + $0x460] sm:$0xf]  ;;  %v8091_v43 = vld [vmem:[#allocation9 + $0x46c] sm:$0xf0]  ;;  %v8093_v29 = vld [vmem:[#allocation9 + $0xa4] sm:$0xf]  ;;  %v5827_v62 = vor.u32 %v7074_v8, %v5824_v20  ;;  %v6303_v37 = vor.u32 %v8082_v59, %v8080_v55  ;;  %v1760_v35 = vunpack.c.l.b16 %v8087_v25  ;;  %v1761_v34 = vunpack.c.h.b16 %v8087_v25 }
 0x168   : > { %3177 = vmatpush.bf16.msra.mxu2 %v5715_v28  ;;  %v8098_v42 = vld [vmem:[#allocation9 + $0x560] sm:$0xf]  ;;  %v8100_v3 = vld [vmem:[#allocation9 + $0x56c] sm:$0xf0]  ;;  %v5680_v30 = vld [vmem:[#allocation9 + $0xb0] sm:$0xf0]  ;;  %v6159_v53 = vor.u32 %v8091_v43, %v8089_v12  ;;  %v1762_v20 = vunpack.c.l.b16 %v8102_v18 }
 0x169   : > { %v7070_v23 = vld [vmem:[#allocation9 + $0x1a4] sm:$0xf]  ;;  %v5808_v38 = vld [vmem:[#allocation9 + $0x1b0] sm:$0xf0]  ;;  %3191 = vmatpush.bf16.msra.mxu3 %v5843_v44  ;;  %v8104_v1 = vld [vmem:[#allocation9 + $0x440] sm:$0xf]  ;;  %3165 = vmatpush.bf16.msra.mxu1 %v6319_v26  ;;  %v8144_v44 = vmax.f32 %v8052_v49, %v1601_v9  ;;  %v5683_v51 = vor.u32 %v8093_v29, %v5680_v30  ;;  %v8161_v9 = vpack.c.bf16 %v1541_v54, %v1534_v41  ;;  %v1763_v26 = vunpack.c.h.b16 %v8102_v18 }
 0x16a   : > { %v8106_v15 = vld [vmem:[#allocation9 + $0x44c] sm:$0xf0]  ;;  %v8108_v33 = vld [vmem:[#allocation9 + $0x540] sm:$0xf]  ;;  %v8618_v19 = vrot.slane %v7997_v14, 1  ;;  %3152 = vmatpush.bf16.msra.mxu0 %v6175_v21  ;;  %v6287_v6 = vor.u32 %v8100_v3, %v8098_v42  ;;  %v5811_v58 = vor.u32 %v7070_v23, %v5808_v38  ;;  %v1559_v38 = vrot.slane %v1558_v57, 2 }
 0x16b   : > { %v8110_v10 = vld [vmem:[#allocation9 + $0x54c] sm:$0xf0]  ;;  %v8122_v39 = vld [vmem:[#allocation9 + $0x84] sm:$0xf]  ;;  %v8124_v7 = vld [vmem:[#allocation9 + $0x90] sm:$0xf0]  ;;  %v6143_v41 = vor.u32 %v8106_v15, %v8104_v1 }
 0x16c   : > { %v8120_v50 = vmax.f32 %v7997_v14, %v8618_v19  ;;  %v8126_v28 = vld [vmem:[#allocation9 + $0x184] sm:$0xf]  ;;  %v8135_v46 = vld [vmem:[#allocation9 + $0x190] sm:$0xf0]  ;;  %v8137_v14 = vld [vmem:[#allocation9 + $0x420] sm:$0xf]  ;;  %3178 = vmatpush.bf16.msra.mxu2 %v5699_v56  ;;  %v6271_v12 = vor.u32 %v8110_v10, %v8108_v33  ;;  %v5667_v43 = vor.u32 %v8122_v39, %v8124_v7  ;;  %v1764_v56 = vunpack.c.l.b16 %v8131_v17 }
 0x16d   : > { %v8139_v60 = vld [vmem:[#allocation9 + $0x42c] sm:$0xf0]  ;;  %v8155_v40 = vld [vmem:[#allocation9 + $0x520] sm:$0xf]  ;;  %v8159_v49 = vld [vmem:[#allocation9 + $0x64] sm:$0xf]  ;;  %3192 = vmatpush.bf16.msra.mxu3 %v5827_v62  ;;  %3166 = vmatpush.bf16.msra.mxu1 %v6303_v37  ;;  %v5795_v42 = vor.u32 %v8126_v28, %v8135_v46  ;;  %v1765_v62 = vunpack.c.h.b16 %v8131_v17  ;;  %v1766_v19 = vunpack.c.l.b16 %v8161_v9  ;;  %v1560_v37 = vmax.f32 %v1558_v57, %v1559_v38 }
 0x16e   : > { %v8157_v4 = vld [vmem:[#allocation9 + $0x52c] sm:$0xf0]  ;;  %v5648_v55 = vld [vmem:[#allocation9 + $0x70] sm:$0xf0]  ;;  %v8166_v59 = vld [vmem:[#allocation9 + $0x164] sm:$0xf]  ;;  %v6127_v3 = vor.u32 %v8139_v60, %v8137_v14  ;;  %3153 = vmatpush.bf16.msra.mxu0 %v6159_v53 }
 0x16f   : > { %v8168_v8 = vld [vmem:[#allocation9 + $0x170] sm:$0xf0]  ;;  %v8178_v29 = vld [vmem:[#allocation9 + $0x400] sm:$0xf]  ;;  %v8180_v54 = vld [vmem:[#allocation9 + $0x40c] sm:$0xf0]  ;;  %v6255_v1 = vor.u32 %v8157_v4, %v8155_v40  ;;  %v5651_v15 = vor.u32 %v8159_v49, %v5648_v55 }
 0x170   : > { %v8182_v21 = vld [vmem:[#allocation9 + $0x500] sm:$0xf]  ;;  %v8189_v30 = vld [vmem:[#allocation9 + $0x50c] sm:$0xf0]  ;;  %3179 = vmatpush.bf16.msra.mxu2 %v5683_v51  ;;  %v5779_v33 = vor.u32 %v8166_v59, %v8168_v8  ;;  %v6111_v39 = vor.u32 %v8180_v54, %v8178_v29  ;;  %v8619_v28 = vrot.slane %v8040_v61, 2  ;;  %v1563_v46 = vsel %vm8601_vm6, %v7963_v22, -inf }
 0x171   : > { %v8191_v23 = vld.sshfl [vmem:[#allocation1 + $0x20] sm:$0xff pattern:$0x73625140]  ;;  %v8199_v10 = vld.sshfl [vmem:[#allocation1 + $0x28] sm:$0xff pattern:$0x73625140]  ;;  %3193 = vmatpush.bf16.msra.mxu3 %v5811_v58  ;;  %v6239_v7 = vor.u32 %v8189_v30, %v8182_v21  ;;  %3167 = vmatpush.bf16.msra.mxu1 %v6287_v6 }
 0x172   : > { %1445 = vst [vmem:[#allocation1 + $0x20] ss:$4 sm:$0xff] %v8619_v28  ;;  %v1564_v14 = vrot.slane %v1563_v46, 4  ;;  %v1570_v60 = vsel %vm8601_vm6, %v7984_v63, -inf  ;;  %v1577_v53 = vsel %vm8601_vm6, %v7986_v0, -inf  ;;  %v1584_v51 = vsel %vm8601_vm6, %v7991_v31, -inf  ;;  %3154 = vmatpush.bf16.msra.mxu0 %v6143_v41 }
 0x173   : > { %v1561_v40 = vrot.slane %v1560_v37, 1  ;;  %v1571_v4 = vrot.slane %v1570_v60, 4  ;;  %v1578_v49 = vrot.slane %v1577_v53, 4  ;;  %v1585_v61 = vrot.slane %v1584_v51, 4 }
 0x174   : > { %3180 = vmatpush.bf16.msra.mxu2 %v5667_v43  ;;  %v1565_v57 = vmax.f32 %v1563_v46, %v1564_v14  ;;  %v1591_v22 = vsel %vm8601_vm6, %v7993_v11, -inf  ;;  %v1603_v58 = vrot.slane %v8144_v44, 1  ;;  %v1610_v63 = vrot.slane %v8149_v13, 1 }
 0x175   : > { %3194 = vmatpush.bf16.msra.mxu3 %v5795_v42  ;;  %v1572_v0 = vmax.f32 %v1570_v60, %v1571_v4  ;;  %v1579_v55 = vmax.f32 %v1577_v53, %v1578_v49  ;;  %v1586_v59 = vmax.f32 %v1584_v51, %v1585_v61  ;;  %v8222_v31 = vpack.c.bf16 %v8120_v50, %v8115_v27 }
 0x176   : > { %v1566_v6 = vrot.slane %v1565_v57, 2  ;;  %v1592_v8 = vrot.slane %v1591_v22, 4  ;;  %v1604_v41 = vmax.f32 %v8144_v44, %v1603_v58  ;;  %v1611_v43 = vmax.f32 %v8149_v13, %v1610_v63  ;;  %3168 = vmatpush.bf16.msra.mxu1 %v6271_v12  ;;  %3155 = vmatpush.bf16.msra.mxu0 %v6127_v3 }
 0x177   : > { %v1573_v11 = vrot.slane %v1572_v0, 2  ;;  %v1580_v29 = vrot.slane %v1579_v55, 2  ;;  %v1587_v54 = vrot.slane %v1586_v59, 2  ;;  %v1612_v42 = vsel %vm8601_vm6, %v8009_v32, -inf }
 0x178   : > { %3181 = vmatpush.bf16.msra.mxu2 %v5651_v15  ;;  %v8232_v27 = vmax.f32 %v1560_v37, %v1561_v40  ;;  %v1567_v50 = vmax.f32 %v1565_v57, %v1566_v6  ;;  %v1593_v46 = vmax.f32 %v1591_v22, %v1592_v8  ;;  %v1767_v44 = vunpack.c.h.b16 %v8161_v9 }
 0x179   : > { %v8228_v38 = vld.sshfl [vmem:[#allocation1 + $0x20] sm:$0xff pattern:$0x73625140]  ;;  %v8230_v28 = vld.sshfl [vmem:[#allocation1 + $0x28] sm:$0xff pattern:$0x73625140]  ;;  %3195 = vmatpush.bf16.msra.mxu3 %v5779_v33  ;;  %v1574_v13 = vmax.f32 %v1572_v0, %v1573_v11  ;;  %v1581_v12 = vmax.f32 %v1579_v55, %v1580_v29  ;;  %v1588_v14 = vmax.f32 %v1586_v59, %v1587_v54  ;;  %v8241_v33 = vpack.c.bf16 %v1611_v43, %v1604_v41 }
 0x17a   : > { %v1613_v60 = vrot.slane %v1612_v42, 4  ;;  %1451 = vst [vmem:[#allocation1 + $0x20] ss:$4 sm:$0xff] %v1404_v16  ;;  %v1568_v32 = vrot.slane %v1567_v50, 1  ;;  %v1594_v3 = vrot.slane %v1593_v46, 2  ;;  %v1619_v15 = vsel %vm8601_vm6, %v8011_v47, -inf  ;;  %3169 = vmatpush.bf16.msra.mxu1 %v6255_v1  ;;  %3156 = vmatpush.bf16.msra.mxu0 %v6111_v39 }
 0x17b   : > { %v1626_v37 = vsel %vm8601_vm6, %v8028_v5, -inf  ;;  %v1575_v53 = vrot.slane %v1574_v13, 1  ;;  %v1582_v51 = vrot.slane %v1581_v12, 1  ;;  %v1589_v4 = vrot.slane %v1588_v14, 1 }
 0x17c   : > { %v1614_v40 = vmax.f32 %v1612_v42, %v1613_v60  ;;  %v1595_v49 = vmax.f32 %v1593_v46, %v1594_v3  ;;  %v1620_v61 = vrot.slane %v1619_v15, 4  ;;  %v1627_v36 = vrot.slane %v1626_v37, 4 }
 0x17d   : > { %v8243_v16 = vmax.f32 %v1567_v50, %v1568_v32  ;;  %v8245_v57 = vmax.f32 %v1574_v13, %v1575_v53  ;;  %v8247_v22 = vmax.f32 %v1581_v12, %v1582_v51  ;;  %v1633_v63 = vsel %vm8601_vm6, %v8030_v45, -inf  ;;  %v1449_v32 = vld.sshfl [vmem:[#allocation1] sm:$0xff pattern:$0x73625140] }
 0x17e   : > { %v1615_v47 = vrot.slane %v1614_v40, 2  ;;  %v1596_v58 = vrot.slane %v1595_v49, 1  ;;  %v1621_v5 = vmax.f32 %v1619_v15, %v1620_v61  ;;  %v1628_v1 = vmax.f32 %v1626_v37, %v1627_v36  ;;  %3170 = vmatpush.bf16.msra.mxu1 %v6239_v7 }
 0x17f   : > { %v1634_v0 = vrot.slane %v1633_v63, 4  ;;  %v1640_v55 = vsel %vm8601_vm6, %v8191_v23, -inf  ;;  %v1647_v59 = vsel %vm8601_vm6, %v8199_v10, -inf  ;;  %v8258_v6 = vmax.f32 %v1588_v14, %v1589_v4 }
 0x180   : > { %v1616_v39 = vmax.f32 %v1614_v40, %v1615_v47  ;;  %v1622_v8 = vrot.slane %v1621_v5, 2  ;;  %v1629_v41 = vrot.slane %v1628_v1, 2  ;;  %v1641_v43 = vrot.slane %v1640_v55, 4 }
 0x181   : > { %v1635_v29 = vmax.f32 %v1633_v63, %v1634_v0  ;;  %v1648_v45 = vrot.slane %v1647_v59, 4  ;;  %v1654_v21 = vsel %vm8601_vm6, %v8042_v24, -inf  ;;  %v8262_v50 = vmax.f32 %v1595_v49, %v1596_v58 }
 0x182   : > { %v1617_v11 = vrot.slane %v1616_v39, 1  ;;  %v1623_v30 = vmax.f32 %v1621_v5, %v1622_v8  ;;  %v1630_v7 = vmax.f32 %v1628_v1, %v1629_v41  ;;  %v1642_v54 = vmax.f32 %v1640_v55, %v1641_v43 }
 0x183   : > { %v1655_v42 = vrot.slane %v1654_v21, 4  ;;  %v1636_v23 = vrot.slane %v1635_v29, 2  ;;  %v1649_v46 = vmax.f32 %v1647_v59, %v1648_v45  ;;  %v1661_v10 = vsel %vm8601_vm6, %v8044_v2, -inf  ;;  %v1450_v2 = vld.sshfl [vmem:[#allocation1 + $0x8] sm:$0xff pattern:$0x73625140] }
 0x184   : > { %v1624_v13 = vrot.slane %v1623_v30, 1  ;;  %v1631_v12 = vrot.slane %v1630_v7, 1  ;;  %v1643_v14 = vrot.slane %v1642_v54, 2  ;;  %v1662_v37 = vrot.slane %v1661_v10, 4 }
 0x185   : > { %v1656_v60 = vmax.f32 %v1654_v21, %v1655_v42  ;;  %v1637_v3 = vmax.f32 %v1635_v29, %v1636_v23  ;;  %v1650_v15 = vrot.slane %v1649_v46, 2  ;;  %v1668_v24 = vsel %vm8601_vm6, %v8228_v38, -inf }
 0x186   : > { %v1618_v53 = vmax.f32 %v1616_v39, %v1617_v11  ;;  %v1625_v51 = vmax.f32 %v1623_v30, %v1624_v13  ;;  %v1644_v40 = vmax.f32 %v1642_v54, %v1643_v14  ;;  %v1663_v36 = vmax.f32 %v1661_v10, %v1662_v37 }
 0x187   : > { %v1657_v4 = vrot.slane %v1656_v60, 2  ;;  %v1638_v49 = vrot.slane %v1637_v3, 1  ;;  %v1651_v61 = vmax.f32 %v1649_v46, %v1650_v15  ;;  %v1669_v47 = vrot.slane %v1668_v24, 4 }
 0x188   : > { %v1645_v58 = vrot.slane %v1644_v40, 1  ;;  %v1675_v1 = vsel %vm8601_vm6, %v8230_v28, -inf  ;;  %v1682_v63 = vsel %vm8601_vm6, %v1449_v32, -inf  ;;  %v1632_v0 = vmax.f32 %v1630_v7, %v1631_v12 }
 0x189   : > { %v1658_v5 = vmax.f32 %v1656_v60, %v1657_v4  ;;  %v1652_v55 = vrot.slane %v1651_v61, 1  ;;  %v1664_v59 = vrot.slane %v1663_v36, 2  ;;  %v1670_v38 = vmax.f32 %v1668_v24, %v1669_v47 }
 0x18a   : > { %v1639_v39 = vmax.f32 %v1637_v3, %v1638_v49  ;;  %v1676_v41 = vrot.slane %v1675_v1, 4  ;;  %v1683_v43 = vrot.slane %v1682_v63, 4  ;;  %v1646_v11 = vmax.f32 %v1644_v40, %v1645_v58  ;;  %v1717_v3 = vld [vmem:[#allocation2 + $0x8] sm:$0x11] }
 0x18b   : > { %v1659_v8 = vrot.slane %v1658_v5, 1  ;;  %v1665_v29 = vmax.f32 %v1663_v36, %v1664_v59  ;;  %v1671_v45 = vrot.slane %v1670_v38, 2  ;;  %v1689_v21 = vsel %vm8601_vm6, %v1450_v2, -inf  ;;  %vm8342_vm6 = vmand %vm1713_vm13, %vm1722_vm2 }
 0x18c   : > { %v1653_v30 = vmax.f32 %v1651_v61, %v1652_v55  ;;  %v1677_v54 = vmax.f32 %v1675_v1, %v1676_v41  ;;  %v1684_v42 = vmax.f32 %v1682_v63, %v1683_v43  ;;  %v1690_v23 = vrot.slane %v1689_v21, 4 }
 0x18d   : > { %v1666_v28 = vrot.slane %v1665_v29, 1  ;;  %v1672_v46 = vmax.f32 %v1670_v38, %v1671_v45  ;;  %v1660_v7 = vmax.f32 %v1658_v5, %v1659_v8  ;;  %v1768_v4 = vunpack.c.l.b16 %v8222_v31 }
 0x18e   : > { %v1678_v10 = vrot.slane %v1677_v54, 2  ;;  %v1685_v13 = vrot.slane %v1684_v42, 2  ;;  %v1691_v12 = vmax.f32 %v1689_v21, %v1690_v23  ;;  %v8289_v61 = vpack.c.bf16 %v8243_v16, %v8232_v27 }
 0x18f   : > { %v1667_v60 = vmax.f32 %v1665_v29, %v1666_v28  ;;  %v1673_v32 = vrot.slane %v1672_v46, 1  ;;  %v8293_v36 = vpack.c.bf16 %v8247_v22, %v8245_v57  ;;  %v1735_v47 = vpack.c.bf16 %v8262_v50, %v8258_v6 }
 0x190   : > { %v1679_v15 = vmax.f32 %v1677_v54, %v1678_v10  ;;  %v1686_v37 = vmax.f32 %v1684_v42, %v1685_v13  ;;  %v1692_v24 = vrot.slane %v1691_v12, 2  ;;  %v1718_v1 = vsel %vm8600_vm0, 0, %v1717_v3  ;;  %vm8328_vm0 = vmand %vm8602_vm10, %vm1720_vm1 }
 0x191   : > { %v1674_v49 = vmax.f32 %v1672_v46, %v1673_v32  ;;  %1719 = vst [vmem:[#allocation2 + $0x8] sm:$0x11] %v1718_v1  ;;  %v1737_v63 = vpack.c.bf16 %v1625_v51, %v1618_v53  ;;  %v1738_v27 = vpack.c.bf16 %v1639_v39, %v1632_v0  ;;  %v1739_v16 = vpack.c.bf16 %v1653_v30, %v1646_v11 }
 0x192   : > { %v1680_v2 = vrot.slane %v1679_v15, 1  ;;  %v1687_v58 = vrot.slane %v1686_v37, 1  ;;  %v1693_v5 = vmax.f32 %v1691_v12, %v1692_v24  ;;  %v8302_v55 = vpack.c.bf16 %v1667_v60, %v1660_v7  ;;  %v7026_v24 = vld [vmem:[#allocation9 + $0x44] sm:$0xf] }
 0x193   : > { %v1769_v6 = vunpack.c.h.b16 %v8222_v31  ;;  %v1770_v50 = vunpack.c.l.b16 %v8289_v61  ;;  %v1771_v38 = vunpack.c.h.b16 %v8289_v61  ;;  %v1772_v8 = vunpack.c.l.b16 %v8293_v36 }
 0x194   : > { %v1681_v57 = vmax.f32 %v1679_v15, %v1680_v2  ;;  %v1688_v22 = vmax.f32 %v1686_v37, %v1687_v58  ;;  %v1694_v59 = vrot.slane %v1693_v5, 1  ;;  %v1773_v41 = vunpack.c.h.b16 %v8293_v36  ;;  %v7058_v36 = vld [vmem:[#allocation9 + $0x144] sm:$0xf] }
 0x195   : > { %v1774_v0 = vunpack.c.l.b16 %v1735_v47  ;;  %v1775_v39 = vunpack.c.h.b16 %v1735_v47  ;;  %v1776_v43 = vunpack.c.l.b16 %v8241_v33  ;;  %v1777_v11 = vunpack.c.h.b16 %v8241_v33  ;;  %v5760_v47 = vld [vmem:[#allocation9 + $0x150] sm:$0xf0]  ;;  %v7022_v2 = vld [vmem:[#allocation9 + $0x24] sm:$0xf] }
 0x196   : > { %v1695_v53 = vmax.f32 %v1693_v5, %v1694_v59  ;;  %v1741_v51 = vpack.c.bf16 %v1681_v57, %v1674_v49  ;;  %v1778_v29 = vunpack.c.l.b16 %v1737_v63  ;;  %v1779_v45 = vunpack.c.h.b16 %v1737_v63  ;;  %v5632_v49 = vld [vmem:[#allocation9 + $0x50] sm:$0xf0] }
 0x197   : > { %v1780_v21 = vunpack.c.l.b16 %v1738_v27  ;;  %v1781_v30 = vunpack.c.h.b16 %v1738_v27  ;;  %v1782_v54 = vunpack.c.l.b16 %v1739_v16  ;;  %v1783_v42 = vunpack.c.h.b16 %v1739_v16  ;;  %v5616_v63 = vld [vmem:[#allocation9 + $0x30] sm:$0xf0]  ;;  %v7054_v27 = vld [vmem:[#allocation9 + $0x124] sm:$0xf] }
 0x198   : > { %v1742_v31 = vpack.c.bf16 %v1695_v53, %v1688_v22  ;;  %v1784_v23 = vunpack.c.l.b16 %v8302_v55  ;;  %v1785_v28 = vunpack.c.h.b16 %v8302_v55  ;;  %v1786_v46 = vunpack.c.l.b16 %v1741_v51  ;;  %v1836_v22 = vld [vmem:[#allocation2 + $0x8] sm:$0xff]  ;;  %v5744_v59 = vld [vmem:[#allocation9 + $0x130] sm:$0xf0] }
 0x199   : > { %v1787_v7 = vunpack.c.h.b16 %v1741_v51  ;;  %v1793_v33 = vsel %vm1792_vm3, %v1762_v20, %v1760_v35  ;;  %v1804_v60 = vsel %vm1792_vm3, %v1763_v26, %v1761_v34  ;;  %v1811_v25 = vsel %vm8603_vm7, %v1776_v43, %v1774_v0  ;;  %v1453_v51 = vld.sshfl [vmem:[#allocation1 + $0x28] sm:$0xff pattern:$0x73625140]  ;;  %v7018_v43 = vld [vmem:[#allocation9 + $0x4] sm:$0xf] }
 0x19a   : > { %v1788_v10 = vunpack.c.l.b16 %v1742_v31  ;;  %v1789_v13 = vunpack.c.h.b16 %v1742_v31  ;;  %v1795_v12 = vsel %vm1794_vm11, %v1764_v56, %v1793_v33  ;;  %v1805_v20 = vsel %vm1794_vm11, %v1765_v62, %v1804_v60  ;;  %v5600_v31 = vld [vmem:[#allocation9 + $0x10] sm:$0xf0]  ;;  %v7110_v34 = vld [vmem:[#allocation9 + $0x2e4] sm:$0xf] }
 0x19b   : > { %v1797_v35 = vsel %vm1713_vm13, %v1766_v19, %v1795_v12  ;;  %v1818_v18 = vsel %vm8603_vm7, %v1777_v11, %v1775_v39  ;;  %v1806_v56 = vsel %vm1713_vm13, %v1767_v44, %v1805_v20  ;;  %v1812_v17 = vsel %vm1792_vm3, %v1778_v29, %v1811_v25  ;;  %v1725_v11 = vld [vmem:[#allocation2] sm:$0x11]  ;;  %v7303_v29 = vld [vmem:[#allocation11 + $0x2e8] sm:$0xff] }
 0x19c   : > { %v1799_v26 = vsel %vm1798_vm14, %v1768_v4, %v1797_v35  ;;  %v1819_v62 = vsel %vm1792_vm3, %v1779_v45, %v1818_v18  ;;  %v1807_v3 = vsel %vm1798_vm14, %v1769_v6, %v1806_v56  ;;  %v1813_v15 = vsel %vm1794_vm11, %v1780_v21, %v1812_v17  ;;  %v7050_v21 = vld [vmem:[#allocation9 + $0x104] sm:$0xf]  ;;  %v5968_v17 = vld [vmem:[#allocation9 + $0x2f0] sm:$0xf0] }
 0x19d   : > { %v1801_v19 = vsel %vm1800_vm9, %v1770_v50, %v1799_v26  ;;  %v1820_v37 = vsel %vm1794_vm11, %v1781_v30, %v1819_v62  ;;  %v1808_v9 = vsel %vm1800_vm9, %v1771_v38, %v1807_v3  ;;  %v1814_v44 = vsel %vm1713_vm13, %v1782_v54, %v1813_v15  ;;  %v5728_v54 = vld [vmem:[#allocation9 + $0x110] sm:$0xf0]  ;;  %v7142_v62 = vld [vmem:[#allocation9 + $0x3e4] sm:$0xf] }
 0x19e   : > { %v1803_v4 = vsel %vm1802_vm8, %v1772_v8, %v1801_v19  ;;  %v1821_v61 = vsel %vm1713_vm13, %v1783_v42, %v1820_v37  ;;  %v1809_v58 = vsel %vm1802_vm8, %v1773_v41, %v1808_v9  ;;  %v1815_v5 = vsel %vm1798_vm14, %v1784_v23, %v1814_v44  ;;  %v1452_v8 = vld.sshfl [vmem:[#allocation1 + $0x20] sm:$0xff pattern:$0x73625140] }
 0x19f   : > { %v1822_v1 = vsel %vm1798_vm14, %v1785_v28, %v1821_v61  ;;  %vm1831_vm11 = vcmask 1043456   ;;  %v1816_v16 = vsel %vm1800_vm9, %v1786_v46, %v1815_v5  ;;  %v1825_v57 = vpack.c.b16 %v1809_v58, %v1803_v4  ;;  %v6096_v19 = vld [vmem:[#allocation9 + $0x3f0] sm:$0xf0]  ;;  %v7106_v4 = vld [vmem:[#allocation9 + $0x2c4] sm:$0xf] }
 0x1a0   : > { %v1823_v55 = vsel %vm1800_vm9, %v1787_v7, %v1822_v1  ;;  %vm1832_vm13 = vmand %vm1831_vm11, %vm1720_vm1  ;;  %vm1833_vm10 = vcmask 1047556   ;;  %v1817_v6 = vsel %vm1802_vm8, %v1788_v10, %v1816_v16  ;;  %vm3630_vm14 = vsmask.f32 1280  ;;  %v5952_v9 = vld [vmem:[#allocation9 + $0x2d0] sm:$0xf0] }
 0x1a1   : > { %v1824_v50 = vsel %vm1802_vm8, %v1789_v13, %v1823_v55  ;;  %vm1834_vm3 = vmand %vm1833_vm10, %vm1722_vm2  ;;  %v5635_v38 = vor.u32 %v7026_v24, %v5632_v49  ;;  %v5763_v53 = vor.u32 %v7058_v36, %v5760_v47  ;;  %vm8628_vm9 = vcmask 1041409   ;;  %v6080_v16 = vld [vmem:[#allocation9 + $0x3d0] sm:$0xf0] }
 0x1a2   : > { %v8373_v41 = vpack.c.b16 %v1824_v50, %v1817_v6  ;;  %vm1835_vm7 = vmor %vm1834_vm3, %vm1832_vm13  ;;  %v5619_v39 = vor.u32 %v7022_v2, %v5616_v63  ;;  %v5747_v45 = vor.u32 %v7054_v27, %v5744_v59  ;;  %vm8631_vm10 = vcmask 1041408   ;;  %v7138_v27 = vld [vmem:[#allocation9 + $0x3c4] sm:$0xf] }
 0x1a3   : > { %v1837_v0 = vsel %vm1835_vm7, %v1825_v57, %v1836_v22  ;;  %vm3631_vm1 = vmand %vm8628_vm9, %vm3630_vm14  ;;  %3182 = vmatpush.bf16.msra.mxu2 %v5635_v38  ;;  %3196 = vmatpush.bf16.msra.mxu3 %v5763_v53  ;;  %v1696_v30 = vsel %vm8631_vm10, %v1452_v8, -inf  ;;  %v5603_v13 = vor.u32 %v7018_v43, %v5600_v31  ;;  %v5731_v60 = vor.u32 %v7050_v21, %v5728_v54  ;;  %v7102_v38 = vld [vmem:[#allocation9 + $0x2a4] sm:$0xf]  ;;  %v5936_v8 = vld [vmem:[#allocation9 + $0x2b0] sm:$0xf0] }
 0x1a4   : > { %1838 = vst [vmem:[#allocation2 + $0x8] sm:$0xff] %v1837_v0  ;;  %vm8378_vm8 = vmor %vm3631_vm1, %vm8273_vm12  ;;  %v1697_v42 = vrot.slane %v1696_v30, 4  ;;  %v1851_v7 = vshrl.u32 %v1837_v0, 16  ;;  %v1854_v10 = vshll.u32 %v1837_v0, 16  ;;  %v1860_v12 = vshll.u32 %v8373_v41, 16 }
 0x1a5   : > { %vm8632_vm7 = vmmov %vm8631_vm10  ;;  %1845 = vst [vmem:[#allocation4] sm:$0xff] %v1837_v0  ;;  %v5971_v47 = vor.u32 %v7110_v34, %v5968_v17  ;;  %v6099_v2 = vor.u32 %v7142_v62, %v6096_v19  ;;  %v5955_v6 = vor.u32 %v7106_v4, %v5952_v9  ;;  %v6083_v50 = vor.u32 %v7138_v27, %v6080_v16  ;;  %v7134_v0 = vld [vmem:[#allocation9 + $0x3a4] sm:$0xf]  ;;  %v6224_v9 = vld [vmem:[#allocation9 + $0x4f0] sm:$0xf0] }
 0x1a6   : > { %v1703_v23 = vsel %vm8632_vm7, %v1453_v51, -inf  ;;  %vm8633_vm2 = vmor %vm8342_vm6, %vm8328_vm0  ;;  %1846 = vst [vmem:[#allocation4 + $0x18] sm:$0xff] %v8373_v41  ;;  %v1698_v33 = vmax.f32 %v1696_v30, %v1697_v42  ;;  %v1853_v20 = vrot.slane %v1851_v7, 4  ;;  %v1856_v25 = vrot.slane %v1854_v10, 5  ;;  %v7098_v42 = vld [vmem:[#allocation9 + $0x284] sm:$0xf] }
 0x1a7   : > { %v1704_v28 = vrot.slane %v1703_v23, 4  ;;  %v1726_v46 = vsel %vm8633_vm2, 0, %v1725_v11  ;;  %3183 = vmatpush.bf16.msra.mxu2 %v5619_v39  ;;  %3197 = vmatpush.bf16.msra.mxu3 %v5747_v45  ;;  %v8391_v56 = vrot.slane %v1860_v12, 5  ;;  %v1864_v51 = vshrl.u32 %v8373_v41, 16  ;;  %v6064_v39 = vld [vmem:[#allocation9 + $0x3b0] sm:$0xf0]  ;;  %vm8634_vm6 = vmor %vm8278_vm15, %vm8273_vm12 }
 0x1a8   : > { %1727 = vst [vmem:[#allocation2] sm:$0x11] %v1726_v46  ;;  %v1699_v18 = vrot.slane %v1698_v33, 2  ;;  %v1857_v26 = vor.u32 %v1856_v25, %v1853_v20  ;;  %v1886_v11 = vrot.slane %v8373_v41, 5  ;;  %v5939_v21 = vor.u32 %v7102_v38, %v5936_v8  ;;  %v6048_v41 = vld [vmem:[#allocation9 + $0x390] sm:$0xf0] }
 0x1a9   : > { %v1705_v35 = vmax.f32 %v1703_v23, %v1704_v28  ;;  %v6067_v30 = vor.u32 %v7134_v0, %v6064_v39  ;;  %v1866_v54 = vrot.slane %v1864_v51, 4  ;;  %v5920_v23 = vld [vmem:[#allocation9 + $0x290] sm:$0xf0]  ;;  %v7130_v28 = vld [vmem:[#allocation9 + $0x384] sm:$0xf]  ;;  %vm8637_vm12 = vcmask 1045508  }
 0x1aa   : > { %v1700_v3 = vmax.f32 %v1698_v33, %v1699_v18  ;;  %v1858_v37 = vrot.slane %v1857_v26, 4  ;;  %v5923_v40 = vor.u32 %v7098_v42, %v5920_v23  ;;  %v6051_v14 = vor.u32 %v7130_v28, %v6048_v41  ;;  %v7094_v46 = vld [vmem:[#allocation9 + $0x264] sm:$0xf]  ;;  %v5904_v10 = vld [vmem:[#allocation9 + $0x270] sm:$0xf0]  ;;  %vm8643_vm14 = vmmov %vm8637_vm12 }
 0x1ab   : > { %v1706_v32 = vrot.slane %v1705_v35, 2  ;;  %3184 = vmatpush.bf16.msra.mxu2 %v5603_v13  ;;  %3198 = vmatpush.bf16.msra.mxu3 %v5731_v60  ;;  %v1878_v22 = vld [vmem:[#allocation2 + $0x8] sm:$0xee]  ;;  %v1867_v7 = vor.u32 %v1866_v54, %v8391_v56  ;;  %v6032_v33 = vld [vmem:[#allocation9 + $0x370] sm:$0xf0]  ;;  %v1888_v20 = vrot.slane %v1886_v11, 4  ;;  %v5907_v18 = vor.u32 %v7094_v46, %v5904_v10 }
 0x1ac   : > { %v5574_v24 = vld [vmem:[#allocation4] sm:$0xf]  ;;  %v7012_v49 = vld [vmem:[#allocation4 + $0x4] sm:$0xf]  ;;  %v1701_v44 = vrot.slane %v1700_v3, 1  ;;  %v1863_v5 = vsel %vm7783_vm5, %v1858_v37, %v8391_v56  ;;  %v5571_v43 = vrot.slane %v1878_v22, 9 }
 0x1ad   : > { %v1707_v15 = vmax.f32 %v1705_v35, %v1706_v32  ;;  %v7015_v61 = vld [vmem:[#allocation4 + $0x14] sm:$0xf0]  ;;  %v5576_v36 = vld [vmem:[#allocation4 + $0x18] sm:$0xf0]  ;;  %1876 = vst [vmem:[#allocation4 + $0x8] sm:$0xff] %v1863_v5  ;;  %v1868_v17 = vrot.slane %v1867_v7, 4 }
 0x1ae   : > { %v8396_v1 = vor.u32 %v7015_v61, %v5574_v24  ;;  %v8398_v63 = vor.u32 %v7012_v49, %v5576_v36  ;;  %v1702_v55 = vmax.f32 %v1700_v3, %v1701_v44  ;;  %v1887_v31 = vsel %vm7775_vm4, %v5571_v43, %v1886_v11  ;;  %v7126_v13 = vld [vmem:[#allocation9 + $0x364] sm:$0xf]  ;;  %v5888_v26 = vld [vmem:[#allocation9 + $0x250] sm:$0xf0]  ;;  %v5718_v51 = vld [vmem:[#allocation9 + $0xe8] sm:$0xf] }
 0x1af   : > { %v1708_v58 = vrot.slane %v1707_v15, 1  ;;  %v1840_v59 = vld [vmem:[#allocation2] sm:$0x11]  ;;  %1893 = vst [vmem:[#allocation4 + $0x10] sm:$0xff] %v1887_v31  ;;  %v6035_v34 = vor.u32 %v7126_v13, %v6032_v33  ;;  %v7090_v32 = vld [vmem:[#allocation9 + $0x244] sm:$0xf] }
 0x1b0   : > { %3101 = vmatmul.bf16.vlgmr.msrb.gmra.mxu0 %v8396_v1  ;;  %3115 = vmatmul.bf16.vlgmr.msrb.gmra.mxu1 %v8398_v63  ;;  %v7122_v56 = vld [vmem:[#allocation9 + $0x344] sm:$0xf]  ;;  %v6016_v3 = vld [vmem:[#allocation9 + $0x350] sm:$0xf0]  ;;  %v5891_v37 = vor.u32 %v7090_v32, %v5888_v26  ;;  %v7049_v0 = vld [vmem:[#allocation9 + $0xf4] sm:$0xf0] }
 0x1b1   : > { %v1709_v57 = vmax.f32 %v1707_v15, %v1708_v58  ;;  %3205 = vmatpush.bf16.msrb.mxu0 %v5971_v47  ;;  %3219 = vmatpush.bf16.msrb.mxu1 %v6099_v2  ;;  %v6019_v24 = vor.u32 %v7122_v56, %v6016_v3  ;;  %v7086_v49 = vld [vmem:[#allocation9 + $0x224] sm:$0xf]  ;;  %v5872_v61 = vld [vmem:[#allocation9 + $0x230] sm:$0xf0]  ;;  %v5846_v39 = vld [vmem:[#allocation9 + $0x1e8] sm:$0xf]  ;;  %v5719_v46 = vor.u32 %v7049_v0, %v5718_v51 }
 0x1b2   : > { %v7174_v4 = vld [vmem:[#allocation9 + $0x4e4] sm:$0xf]  ;;  %v6000_v47 = vld [vmem:[#allocation9 + $0x330] sm:$0xf0]  ;;  %v5702_v10 = vld [vmem:[#allocation9 + $0xc8] sm:$0xf] }
 0x1b3   : > { %v1743_v53 = vpack.c.bf16 %v1709_v57, %v1702_v55  ;;  %v7206_v44 = vld [vmem:[#allocation9 + $0x5e4] sm:$0xf]  ;;  %v6208_v42 = vld [vmem:[#allocation9 + $0x4d0] sm:$0xf0]  ;;  %v7041_v56 = vld [vmem:[#allocation9 + $0xb4] sm:$0xf0] }
 0x1b4   : > { %v7118_v36 = vld [vmem:[#allocation9 + $0x324] sm:$0xf]  ;;  %v5582_v16 = vld [vmem:[#allocation4 + $0x8] sm:$0xf]  ;;  %v7013_v55 = vld [vmem:[#allocation4 + $0xc] sm:$0xf]  ;;  %v6355_v31 = vor.u32 %v7206_v44, %v6352_v48 }
 0x1b5   : > { %v1841_v45 = vsel %vm8634_vm6, %v1743_v53, %v1840_v59  ;;  %3206 = vmatpush.bf16.msrb.mxu0 %v5955_v6  ;;  %3220 = vmatpush.bf16.msrb.mxu1 %v6083_v50  ;;  %v7082_v5 = vld [vmem:[#allocation9 + $0x204] sm:$0xf]  ;;  %v5875_v59 = vor.u32 %v7086_v49, %v5872_v61  ;;  %v6003_v6 = vor.u32 %v7118_v36, %v6000_v47  ;;  %v5984_v50 = vld [vmem:[#allocation9 + $0x310] sm:$0xf0]  ;;  %v5814_v3 = vld [vmem:[#allocation9 + $0x1a8] sm:$0xf] }
 0x1b6   : > { %1842 = vst [vmem:[#allocation2] sm:$0x11] %v1841_v45  ;;  %v5590_v2 = vld [vmem:[#allocation4 + $0x10] sm:$0xf]  ;;  %v7014_v58 = vld [vmem:[#allocation4 + $0x14] sm:$0xf]  ;;  %v6227_v45 = vor.u32 %v7174_v4, %v6224_v9  ;;  %v5859_v41 = vor.u32 %v7082_v5, %v5856_v52 }
 0x1b7   : > { %v7114_v27 = vld [vmem:[#allocation9 + $0x304] sm:$0xf]  ;;  %v6336_v28 = vld [vmem:[#allocation9 + $0x5d0] sm:$0xf0]  ;;  %v7037_v5 = vld [vmem:[#allocation9 + $0x94] sm:$0xf0] }
 0x1b8   : > { %v7170_v38 = vld [vmem:[#allocation9 + $0x4c4] sm:$0xf]  ;;  %v6304_v49 = vld [vmem:[#allocation9 + $0x590] sm:$0xf0]  ;;  %v5798_v52 = vld [vmem:[#allocation9 + $0x188] sm:$0xf] }
 0x1b9   : > { %3207 = vmatpush.bf16.msrb.mxu0 %v5939_v21  ;;  %3221 = vmatpush.bf16.msrb.mxu1 %v6067_v30  ;;  %v7081_v21 = vld [vmem:[#allocation9 + $0x1f4] sm:$0xf0]  ;;  %v7202_v23 = vld [vmem:[#allocation9 + $0x5c4] sm:$0xf]  ;;  %v6211_v13 = vor.u32 %v7170_v38, %v6208_v42  ;;  %v6160_v47 = vld [vmem:[#allocation9 + $0x470] sm:$0xf0] }
 0x1ba   : > { %v5847_v7 = vor.u32 %v7081_v21, %v5846_v39  ;;  %v6339_v33 = vor.u32 %v7202_v23, %v6336_v28  ;;  %v7158_v36 = vld [vmem:[#allocation9 + $0x464] sm:$0xf]  ;;  %v5654_v51 = vld [vmem:[#allocation9 + $0x68] sm:$0xf]  ;;  %v7033_v0 = vld [vmem:[#allocation9 + $0x74] sm:$0xf0] }
 0x1bb   : > { %v7190_v48 = vld [vmem:[#allocation9 + $0x564] sm:$0xf]  ;;  %v5782_v39 = vld [vmem:[#allocation9 + $0x168] sm:$0xf]  ;;  %v6128_v21 = vld [vmem:[#allocation9 + $0x430] sm:$0xf0]  ;;  %v5655_v28 = vor.u32 %v7033_v0, %v5654_v51 }
 0x1bc   : > { %v7182_v42 = vld [vmem:[#allocation9 + $0x524] sm:$0xf]  ;;  %v6256_v23 = vld [vmem:[#allocation9 + $0x530] sm:$0xf0]  ;;  %vm8638_vm15 = vcmask 1045504  }
 0x1bd   : > { %v1849_v12 = vld [vmem:[#allocation2] sm:$0x11]  ;;  %3208 = vmatpush.bf16.msrb.mxu0 %v5923_v40  ;;  %3222 = vmatpush.bf16.msrb.mxu1 %v6051_v14  ;;  %v5987_v40 = vor.u32 %v7114_v27, %v5984_v50  ;;  %v7166_v14 = vld [vmem:[#allocation9 + $0x4a4] sm:$0xf]  ;;  %vm8644_vm9 = vmmov %vm8638_vm15 }
 0x1be   : > { %v1880_v60 = vld [vmem:[#allocation2] sm:$0x11]  ;;  %v1870_v35 = vshll.u32 %v1849_v12, 16 }
 0x1bf   : > { %v1889_v25 = vrot.slane %v1880_v60, 5  ;;  %v7045_v12 = vld [vmem:[#allocation9 + $0xd4] sm:$0xf0]  ;;  %v5830_v60 = vld [vmem:[#allocation9 + $0x1c8] sm:$0xf] }
 0x1c0   : > { %v1872_v62 = vrot.slane %v1870_v35, 5  ;;  %v7077_v35 = vld [vmem:[#allocation9 + $0x1d4] sm:$0xf0]  ;;  %v5703_v32 = vor.u32 %v7045_v12, %v5702_v10  ;;  %v6112_v12 = vld [vmem:[#allocation9 + $0x410] sm:$0xf0] }
 0x1c1   : > { %v1890_v19 = vsel %vm7775_vm4, %v1888_v20, %v1889_v25  ;;  %3209 = vmatpush.bf16.msrb.mxu0 %v5907_v18  ;;  %3223 = vmatpush.bf16.msrb.mxu1 %v6035_v34  ;;  %v6192_v20 = vld [vmem:[#allocation9 + $0x4b0] sm:$0xf0]  ;;  %v7198_v25 = vld [vmem:[#allocation9 + $0x5a4] sm:$0xf]  ;;  %v5831_v26 = vor.u32 %v7077_v35, %v5830_v60  ;;  %v7069_v27 = vld [vmem:[#allocation9 + $0x194] sm:$0xf0] }
 0x1c2   : > { %1894 = vst [vmem:[#allocation4 + $0x28] sm:$0xff] %v1890_v19  ;;  %v1873_v15 = vsel %vm7783_vm5, %v1868_v17, %v1872_v62  ;;  %v6320_v18 = vld [vmem:[#allocation9 + $0x5b0] sm:$0xf0]  ;;  %v7162_v34 = vld [vmem:[#allocation9 + $0x484] sm:$0xf]  ;;  %v6195_v62 = vor.u32 %v7166_v14, %v6192_v20  ;;  %v5799_v38 = vor.u32 %v7069_v27, %v5798_v52  ;;  %vm8635_vm4 = vmmov %vm8632_vm7  ;;  %vm8636_vm5 = vcmask 1043458  }
 0x1c3   : > { %1877 = vst [vmem:[#allocation4 + $0x20] sm:$0xff] %v1873_v15  ;;  %v5686_v17 = vld [vmem:[#allocation9 + $0xa8] sm:$0xf]  ;;  %v6323_v19 = vor.u32 %v7198_v25, %v6320_v18  ;;  %v7073_v15 = vld [vmem:[#allocation9 + $0x1b4] sm:$0xf0]  ;;  %vm8639_vm0 = vmmov %vm8635_vm4 }
 0x1c4   : > { %v5687_v4 = vor.u32 %v7041_v56, %v5686_v17  ;;  %v5815_v9 = vor.u32 %v7073_v15, %v5814_v3  ;;  %v7029_v14 = vld [vmem:[#allocation9 + $0x54] sm:$0xf0]  ;;  %v7178_v60 = vld [vmem:[#allocation9 + $0x504] sm:$0xf]  ;;  %v6240_v35 = vld [vmem:[#allocation9 + $0x510] sm:$0xf0] }
 0x1c5   : > { %3210 = vmatpush.bf16.msrb.mxu0 %v5891_v37  ;;  %3224 = vmatpush.bf16.msrb.mxu1 %v6019_v24  ;;  %v6176_v37 = vld [vmem:[#allocation9 + $0x490] sm:$0xf0]  ;;  %v7194_v24 = vld [vmem:[#allocation9 + $0x584] sm:$0xf]  ;;  %v5974_v20 = vld [vmem:[#allocation9 + $0x2e8] sm:$0xf]  ;;  %v6243_v15 = vor.u32 %v7178_v60, %v6240_v35 }
 0x1c6   : > { %v6179_v44 = vor.u32 %v7162_v34, %v6176_v37  ;;  %v6307_v61 = vor.u32 %v7194_v24, %v6304_v49  ;;  %v7113_v25 = vld [vmem:[#allocation9 + $0x2f4] sm:$0xf0]  ;;  %v5622_v17 = vld [vmem:[#allocation9 + $0x28] sm:$0xf]  ;;  %vm8640_vm3 = vmmov %vm8639_vm0 }
 0x1c7   : > { %v7057_v56 = vld [vmem:[#allocation9 + $0x134] sm:$0xf0]  ;;  %v5975_v37 = vor.u32 %v7113_v25, %v5974_v20  ;;  %v5958_v49 = vld [vmem:[#allocation9 + $0x2c8] sm:$0xf]  ;;  %vm8641_vm11 = vmmov %vm8639_vm0 }
 0x1c8   : > { %v7177_v52 = vld [vmem:[#allocation9 + $0x4f4] sm:$0xf0]  ;;  %v6358_v27 = vld [vmem:[#allocation9 + $0x5e8] sm:$0xf]  ;;  %vm8642_vm13 = vmmov %vm8636_vm5 }
 0x1c9   : > { %v7017_v57 = vld [vmem:[#allocation4 + $0x24] sm:$0xf0]  ;;  %v5592_v22 = vld [vmem:[#allocation4 + $0x28] sm:$0xf0]  ;;  %3211 = vmatpush.bf16.msrb.mxu0 %v5875_v59  ;;  %3225 = vmatpush.bf16.msrb.mxu1 %v6003_v6  ;;  %v7186_v59 = vld [vmem:[#allocation9 + $0x544] sm:$0xf] }
 0x1ca   : > { %v8416_v8 = vor.u32 %v7017_v57, %v5590_v2  ;;  %v8418_v53 = vor.u32 %v7014_v58, %v5592_v22  ;;  %v7016_v43 = vld [vmem:[#allocation4 + $0x1c] sm:$0xf0]  ;;  %v5584_v11 = vld [vmem:[#allocation4 + $0x20] sm:$0xf0]  ;;  %v6288_v2 = vld [vmem:[#allocation9 + $0x570] sm:$0xf0] }
 0x1cb   : > { %v8420_v30 = vor.u32 %v7016_v43, %v5582_v16  ;;  %v8422_v54 = vor.u32 %v7013_v55, %v5584_v11  ;;  %v5670_v58 = vld [vmem:[#allocation9 + $0x88] sm:$0xf]  ;;  %v6163_v16 = vor.u32 %v7158_v36, %v6160_v47  ;;  %v6291_v55 = vor.u32 %v7190_v48, %v6288_v2  ;;  %v7154_v57 = vld [vmem:[#allocation9 + $0x444] sm:$0xf]  ;;  %v6144_v22 = vld [vmem:[#allocation9 + $0x450] sm:$0xf0] }
 0x1cc   : > { %3157 = vmatmul.bf16.vlgmr.msra.gmra.mxu0 %v8416_v8  ;;  %3171 = vmatmul.bf16.vlgmr.msra.gmra.mxu1 %v8418_v53  ;;  %v6272_v6 = vld [vmem:[#allocation9 + $0x550] sm:$0xf0]  ;;  %v5671_v50 = vor.u32 %v7037_v5, %v5670_v58  ;;  %v7065_v43 = vld [vmem:[#allocation9 + $0x174] sm:$0xf0]  ;;  %v6147_v11 = vor.u32 %v7154_v57, %v6144_v22  ;;  %v5606_v47 = vld [vmem:[#allocation9 + $0x8] sm:$0xf] }
 0x1cd   : > { %3129 = vmatmul.bf16.vlgmr.msrb.gmra.mxu2 %v8420_v30  ;;  %3143 = vmatmul.bf16.vlgmr.msrb.gmra.mxu3 %v8422_v54  ;;  %v7021_v48 = vld [vmem:[#allocation9 + $0x14] sm:$0xf0]  ;;  %v5734_v2 = vld [vmem:[#allocation9 + $0x108] sm:$0xf]  ;;  %vm8645_vm1 = vmmov %vm8639_vm0 }
 0x1ce   : > { %3233 = vmatpush.bf16.msrb.mxu2 %v6227_v45  ;;  %3247 = vmatpush.bf16.msrb.mxu3 %v6355_v31  ;;  %v6275_v45 = vor.u32 %v7186_v59, %v6272_v6  ;;  %v7150_v31 = vld [vmem:[#allocation9 + $0x424] sm:$0xf]  ;;  %v7053_v58 = vld [vmem:[#allocation9 + $0x114] sm:$0xf0]  ;;  %v6230_v5 = vld [vmem:[#allocation9 + $0x4e8] sm:$0xf] }
 0x1cf   : > { %3212 = vmatpush.bf16.msrb.mxu0 %v5859_v41  ;;  %3226 = vmatpush.bf16.msrb.mxu1 %v5987_v40  ;;  %v5783_v41 = vor.u32 %v7065_v43, %v5782_v39  ;;  %v5638_v40 = vld [vmem:[#allocation9 + $0x48] sm:$0xf]  ;;  %v6131_v10 = vor.u32 %v7150_v31, %v6128_v21  ;;  %v7105_v59 = vld [vmem:[#allocation9 + $0x2b4] sm:$0xf0]  ;;  %v5735_v51 = vor.u32 %v7053_v58, %v5734_v2  ;;  %vm8646_vm10 = vmmov %vm8639_vm0 }
 0x1d0   : > { %v5639_v18 = vor.u32 %v7029_v14, %v5638_v40  ;;  %v5942_v22 = vld [vmem:[#allocation9 + $0x2a8] sm:$0xf]  ;;  %v6231_v0 = vor.u32 %v7177_v52, %v6230_v5  ;;  %v7205_v31 = vld [vmem:[#allocation9 + $0x5d4] sm:$0xf0]  ;;  %vm8647_vm7 = vmmov %vm8639_vm0 }
 0x1d1   : > { %v6070_v6 = vld [vmem:[#allocation9 + $0x3a8] sm:$0xf]  ;;  %v5943_v21 = vor.u32 %v7105_v59, %v5942_v22  ;;  %v7133_v40 = vld [vmem:[#allocation9 + $0x394] sm:$0xf0]  ;;  %vm8648_vm2 = vmmov %vm8639_vm0 }
 0x1d2   : > { %3234 = vmatpush.bf16.msrb.mxu2 %v6211_v13  ;;  %3248 = vmatpush.bf16.msrb.mxu3 %v6339_v33  ;;  %v6259_v13 = vor.u32 %v7182_v42, %v6256_v23  ;;  %v7146_v33 = vld [vmem:[#allocation9 + $0x404] sm:$0xf]  ;;  %v6214_v43 = vld [vmem:[#allocation9 + $0x4c8] sm:$0xf]  ;;  %v7097_v20 = vld [vmem:[#allocation9 + $0x274] sm:$0xf0] }
 0x1d3   : > { %3261 = vmatpush.bf16.msra.mxu0 %v5719_v46  ;;  %3275 = vmatpush.bf16.msra.mxu1 %v5847_v7  ;;  %v5766_v46 = vld [vmem:[#allocation9 + $0x148] sm:$0xf]  ;;  %v7061_v7 = vld [vmem:[#allocation9 + $0x154] sm:$0xf0]  ;;  %v6115_v3 = vor.u32 %v7146_v33, %v6112_v12  ;;  %vm8649_vm6 = vmmov %vm8639_vm0 }
 0x1d4   : > { %v5767_v34 = vor.u32 %v7061_v7, %v5766_v46  ;;  %v5926_v23 = vld [vmem:[#allocation9 + $0x288] sm:$0xf]  ;;  %v7201_v33 = vld [vmem:[#allocation9 + $0x5b4] sm:$0xf0] }
 0x1d5   : > { %v6198_v7 = vld [vmem:[#allocation9 + $0x4a8] sm:$0xf]  ;;  %v7089_v5 = vld [vmem:[#allocation9 + $0x234] sm:$0xf0] }
 0x1d6   : > { %3235 = vmatpush.bf16.msrb.mxu2 %v6195_v62  ;;  %3249 = vmatpush.bf16.msrb.mxu3 %v6323_v19  ;;  %v7025_v62 = vld [vmem:[#allocation9 + $0x34] sm:$0xf0]  ;;  %v5750_v19 = vld [vmem:[#allocation9 + $0x128] sm:$0xf] }
 0x1d7   : > { %3262 = vmatpush.bf16.msra.mxu0 %v5703_v32  ;;  %3276 = vmatpush.bf16.msra.mxu1 %v5831_v26  ;;  %v6102_v32 = vld [vmem:[#allocation9 + $0x3e8] sm:$0xf]  ;;  %v7145_v26 = vld [vmem:[#allocation9 + $0x3f4] sm:$0xf0]  ;;  %v5751_v36 = vor.u32 %v7057_v56, %v5750_v19 }
 0x1d8   : > { %v6103_v24 = vor.u32 %v7145_v26, %v6102_v32  ;;  %v5910_v35 = vld [vmem:[#allocation9 + $0x268] sm:$0xf]  ;;  %v7197_v19 = vld [vmem:[#allocation9 + $0x594] sm:$0xf0] }
 0x1d9   : > { %v6038_v25 = vld [vmem:[#allocation9 + $0x368] sm:$0xf]  ;;  %v5911_v56 = vor.u32 %v7097_v20, %v5910_v35  ;;  %v7157_v22 = vld [vmem:[#allocation9 + $0x454] sm:$0xf0]  ;;  %v5832_v35 = vld [vmem:[#allocation9 + $0x1d8] sm:$0xf0] }
 0x1da   : > { %3236 = vmatpush.bf16.msrb.mxu2 %v6179_v44  ;;  %3250 = vmatpush.bf16.msrb.mxu3 %v6307_v61  ;;  %v7141_v44 = vld [vmem:[#allocation9 + $0x3d4] sm:$0xf0]  ;;  %v5623_v61 = vor.u32 %v7025_v62, %v5622_v17  ;;  %v6182_v26 = vld [vmem:[#allocation9 + $0x488] sm:$0xf] }
 0x1db   : > { %3263 = vmatpush.bf16.msra.mxu0 %v5687_v4  ;;  %3277 = vmatpush.bf16.msra.mxu1 %v5815_v9  ;;  %v7109_v4 = vld [vmem:[#allocation9 + $0x2d4] sm:$0xf0]  ;;  %v6086_v9 = vld [vmem:[#allocation9 + $0x3c8] sm:$0xf] }
 0x1dc   : > { %3213 = vmatmul.bf16.vlgmr.msrb.gmra.mxu0 %v8420_v30  ;;  %3227 = vmatmul.bf16.vlgmr.msrb.gmra.mxu1 %v8422_v54  ;;  %v6087_v57 = vor.u32 %v7141_v44, %v6086_v9  ;;  %v7165_v17 = vld [vmem:[#allocation9 + $0x494] sm:$0xf0]  ;;  %v6310_v62 = vld [vmem:[#allocation9 + $0x588] sm:$0xf] }
 0x1dd   : > { %3185 = vmatmul.bf16.vlgmr.msra.gmra.mxu2 %v8396_v1  ;;  %3199 = vmatmul.bf16.vlgmr.msra.gmra.mxu3 %v8398_v63  ;;  %v6311_v9 = vor.u32 %v7197_v19, %v6310_v62  ;;  %v6166_v44 = vld [vmem:[#allocation9 + $0x468] sm:$0xf]  ;;  %v5976_v62 = vld [vmem:[#allocation9 + $0x2f8] sm:$0xf0]  ;;  %v7143_v19 = vld [vmem:[#allocation9 + $0x3ec] sm:$0xf] }
 0x1de   : > { %3237 = vmatpush.bf16.msrb.mxu2 %v6163_v16  ;;  %3251 = vmatpush.bf16.msrb.mxu3 %v6291_v55  ;;  %v7209_v16 = vld [vmem:[#allocation9 + $0x5f4] sm:$0xf0]  ;;  %v5959_v55 = vor.u32 %v7109_v4, %v5958_v49  ;;  %v6183_v4 = vor.u32 %v7165_v17, %v6182_v26  ;;  %v5878_v58 = vld [vmem:[#allocation9 + $0x228] sm:$0xf]  ;;  %v7111_v17 = vld [vmem:[#allocation9 + $0x2ec] sm:$0xf] }
 0x1df   : > { %3264 = vmatpush.bf16.msra.mxu0 %v5671_v50  ;;  %3278 = vmatpush.bf16.msra.mxu1 %v5799_v38  ;;  %v7137_v50 = vld [vmem:[#allocation9 + $0x3b4] sm:$0xf0]  ;;  %v5607_v38 = vor.u32 %v7021_v48, %v5606_v47  ;;  %v6359_v39 = vor.u32 %v7209_v16, %v6358_v27  ;;  %v6006_v52 = vld [vmem:[#allocation9 + $0x328] sm:$0xf] }
 0x1e0   : > { %v6071_v42 = vor.u32 %v7137_v50, %v6070_v6  ;;  %v7125_v49 = vld [vmem:[#allocation9 + $0x354] sm:$0xf0]  ;;  %v6278_v59 = vld [vmem:[#allocation9 + $0x548] sm:$0xf]  ;;  %v5879_v50 = vor.u32 %v7089_v5, %v5878_v58  ;;  %v6088_v58 = vld [vmem:[#allocation9 + $0x3d8] sm:$0xf0] }
 0x1e1   : > { %v7193_v47 = vld [vmem:[#allocation9 + $0x574] sm:$0xf0] }
 0x1e2   : > { %3238 = vmatpush.bf16.msrb.mxu2 %v6147_v11  ;;  %3252 = vmatpush.bf16.msrb.mxu3 %v6275_v45  ;;  %v7173_v11 = vld [vmem:[#allocation9 + $0x4d4] sm:$0xf0]  ;;  %v6342_v45 = vld [vmem:[#allocation9 + $0x5c8] sm:$0xf] }
 0x1e3   : > { %3265 = vmatpush.bf16.msra.mxu0 %v5655_v28  ;;  %3279 = vmatpush.bf16.msra.mxu1 %v5783_v41  ;;  %v7101_v28 = vld [vmem:[#allocation9 + $0x294] sm:$0xf0]  ;;  %v6054_v41 = vld [vmem:[#allocation9 + $0x388] sm:$0xf]  ;;  %v6215_v14 = vor.u32 %v7173_v11, %v6214_v43  ;;  %v6343_v46 = vor.u32 %v7205_v31, %v6342_v45  ;;  %v7047_v11 = vld [vmem:[#allocation9 + $0xec] sm:$0xf] }
 0x1e4   : > { %v5927_v12 = vor.u32 %v7101_v28, %v5926_v23  ;;  %v6055_v60 = vor.u32 %v7133_v40, %v6054_v41  ;;  %v7121_v27 = vld [vmem:[#allocation9 + $0x334] sm:$0xf0]  ;;  %v5720_v45 = vld [vmem:[#allocation9 + $0xf8] sm:$0xf0]  ;;  %v7079_v31 = vld [vmem:[#allocation9 + $0x1ec] sm:$0xf] }
 0x1e5   : > { %v7189_v6 = vld [vmem:[#allocation9 + $0x554] sm:$0xf0]  ;;  %v6134_v28 = vld [vmem:[#allocation9 + $0x428] sm:$0xf] }
 0x1e6   : > { %3239 = vmatpush.bf16.msrb.mxu2 %v6131_v10  ;;  %3253 = vmatpush.bf16.msrb.mxu3 %v6259_v13  ;;  %v7169_v10 = vld [vmem:[#allocation9 + $0x4b4] sm:$0xf0]  ;;  %v6326_v13 = vld [vmem:[#allocation9 + $0x5a8] sm:$0xf]  ;;  %v6279_v23 = vor.u32 %v7189_v6, %v6278_v59  ;;  %v7103_v6 = vld [vmem:[#allocation9 + $0x2ac] sm:$0xf] }
 0x1e7   : > { %3266 = vmatpush.bf16.msra.mxu0 %v5639_v18  ;;  %3280 = vmatpush.bf16.msra.mxu1 %v5767_v34  ;;  %v7129_v18 = vld [vmem:[#allocation9 + $0x374] sm:$0xf0]  ;;  %v6199_v34 = vor.u32 %v7169_v10, %v6198_v7  ;;  %v6327_v32 = vor.u32 %v7201_v33, %v6326_v13  ;;  %v6262_v40 = vld [vmem:[#allocation9 + $0x528] sm:$0xf]  ;;  %v5723_v10 = vor.u32 %v7047_v11, %v5720_v45  ;;  %v7043_v33 = vld [vmem:[#allocation9 + $0xcc] sm:$0xf] }
 0x1e8   : > { %v7117_v43 = vld [vmem:[#allocation9 + $0x314] sm:$0xf0]  ;;  %v5656_v11 = vld [vmem:[#allocation9 + $0x78] sm:$0xf0]  ;;  %v7063_v45 = vld [vmem:[#allocation9 + $0x16c] sm:$0xf] }
 0x1e9   : > { %v7153_v41 = vld [vmem:[#allocation9 + $0x434] sm:$0xf0] }
 0x1ea   : > { %3240 = vmatpush.bf16.msrb.mxu2 %v6115_v3  ;;  %3254 = vmatpush.bf16.msrb.mxu3 %v6243_v15  ;;  %v6039_v3 = vor.u32 %v7129_v18, %v6038_v25  ;;  %v5894_v15 = vld [vmem:[#allocation9 + $0x248] sm:$0xf]  ;;  %v6135_v20 = vor.u32 %v7153_v41, %v6134_v28  ;;  %v7181_v26 = vld [vmem:[#allocation9 + $0x514] sm:$0xf0]  ;;  %v5928_v28 = vld [vmem:[#allocation9 + $0x298] sm:$0xf0] }
 0x1eb   : > { %3267 = vmatpush.bf16.msra.mxu0 %v5623_v61  ;;  %3281 = vmatpush.bf16.msra.mxu1 %v5751_v36  ;;  %v7161_v61 = vld [vmem:[#allocation9 + $0x474] sm:$0xf0]  ;;  %v6294_v36 = vld [vmem:[#allocation9 + $0x568] sm:$0xf]  ;;  %v7131_v41 = vld [vmem:[#allocation9 + $0x38c] sm:$0xf] }
 0x1ec   : > { %v6167_v16 = vor.u32 %v7161_v61, %v6166_v44  ;;  %v6118_v18 = vld [vmem:[#allocation9 + $0x408] sm:$0xf]  ;;  %v5979_v61 = vor.u32 %v7111_v17, %v5976_v62  ;;  %v5624_v17 = vld [vmem:[#allocation9 + $0x38] sm:$0xf0]  ;;  %v7055_v62 = vld [vmem:[#allocation9 + $0x12c] sm:$0xf] }
 0x1ed   : > { %3241 = vmatmul.bf16.vlgmr.msrb.gmra.mxu2 %v8416_v8  ;;  %3255 = vmatmul.bf16.vlgmr.msrb.gmra.mxu3 %v8418_v53 }
 0x1ee   : > { %3289 = vmatpush.bf16.msra.mxu2 %v5975_v37  ;;  %3303 = vmatpush.bf16.msra.mxu3 %v6103_v24  ;;  %v7093_v37 = vld [vmem:[#allocation9 + $0x254] sm:$0xf0]  ;;  %v6022_v24 = vld [vmem:[#allocation9 + $0x348] sm:$0xf] }
 0x1ef   : > { %3268 = vmatpush.bf16.msra.mxu0 %v5607_v38  ;;  %3282 = vmatpush.bf16.msra.mxu1 %v5735_v51  ;;  %v5895_v48 = vor.u32 %v7093_v37, %v5894_v15  ;;  %v6023_v2 = vor.u32 %v7125_v49, %v6022_v24  ;;  %v6007_v38 = vor.u32 %v7121_v27, %v6006_v52  ;;  %v5862_v51 = vld [vmem:[#allocation9 + $0x208] sm:$0xf]  ;;  %v7039_v37 = vld [vmem:[#allocation9 + $0xac] sm:$0xf]  ;;  %v5688_v24 = vld [vmem:[#allocation9 + $0xb8] sm:$0xf0] }
 0x1f0   : > { %v7071_v49 = vld [vmem:[#allocation9 + $0x1ac] sm:$0xf]  ;;  %v5691_v5 = vor.u32 %v7039_v37, %v5688_v24  ;;  %v5896_v37 = vld [vmem:[#allocation9 + $0x258] sm:$0xf0] }
 0x1f1   : > { %v7035_v27 = vld [vmem:[#allocation9 + $0x8c] sm:$0xf] }
 0x1f2   : > { %3290 = vmatpush.bf16.msra.mxu2 %v5959_v55  ;;  %3304 = vmatpush.bf16.msra.mxu3 %v6087_v57  ;;  %v6295_v55 = vor.u32 %v7193_v47, %v6294_v36  ;;  %v6150_v57 = vld [vmem:[#allocation9 + $0x448] sm:$0xf]  ;;  %v7107_v47 = vld [vmem:[#allocation9 + $0x2cc] sm:$0xf] }
 0x1f3   : > { %3317 = vmatpush.bf16.msrb.mxu0 %v6231_v0  ;;  %3331 = vmatpush.bf16.msrb.mxu1 %v6359_v39  ;;  %v7085_v0 = vld [vmem:[#allocation9 + $0x214] sm:$0xf0]  ;;  %v5990_v39 = vld [vmem:[#allocation9 + $0x308] sm:$0xf]  ;;  %v7123_v24 = vld [vmem:[#allocation9 + $0x34c] sm:$0xf] }
 0x1f4   : > { %3269 = vmatmul.bf16.vlgmr.msra.gmra.mxu0 %v8396_v1  ;;  %3283 = vmatmul.bf16.vlgmr.msra.gmra.mxu1 %v8398_v63  ;;  %v5991_v7 = vor.u32 %v7117_v43, %v5990_v39  ;;  %v7031_v43 = vld [vmem:[#allocation9 + $0x6c] sm:$0xf] }
 0x1f6   : > { %3291 = vmatpush.bf16.msra.mxu2 %v5943_v21  ;;  %3305 = vmatpush.bf16.msra.mxu3 %v6071_v42  ;;  %v5848_v21 = vld [vmem:[#allocation9 + $0x1f8] sm:$0xf0]  ;;  %v6151_v42 = vor.u32 %v7157_v22, %v6150_v57 }
 0x1f7   : > { %3318 = vmatpush.bf16.msrb.mxu0 %v6215_v14  ;;  %3332 = vmatpush.bf16.msrb.mxu1 %v6343_v46  ;;  %v7185_v14 = vld [vmem:[#allocation9 + $0x534] sm:$0xf0]  ;;  %v5863_v46 = vor.u32 %v7085_v0, %v5862_v51  ;;  %v5851_v13 = vor.u32 %v7079_v31, %v5848_v21  ;;  %v5800_v57 = vld [vmem:[#allocation9 + $0x198] sm:$0xf0] }
 0x1f8   : > { %v6263_v25 = vor.u32 %v7185_v14, %v6262_v40  ;;  %v6072_v51 = vld [vmem:[#allocation9 + $0x3b8] sm:$0xf0]  ;;  %v5659_v14 = vor.u32 %v7031_v43, %v5656_v11 }
 0x1f9   : > { %v5784_v31 = vld [vmem:[#allocation9 + $0x178] sm:$0xf0] }
 0x1fa   : > { %3292 = vmatpush.bf16.msra.mxu2 %v5927_v12  ;;  %3306 = vmatpush.bf16.msra.mxu3 %v6055_v60  ;;  %v5704_v12 = vld [vmem:[#allocation9 + $0xd8] sm:$0xf0]  ;;  %v7075_v60 = vld [vmem:[#allocation9 + $0x1cc] sm:$0xf] }
 0x1fb   : > { %3319 = vmatpush.bf16.msrb.mxu0 %v6199_v34  ;;  %3333 = vmatpush.bf16.msrb.mxu1 %v6327_v32  ;;  %v7149_v34 = vld [vmem:[#allocation9 + $0x414] sm:$0xf0]  ;;  %v6246_v32 = vld [vmem:[#allocation9 + $0x508] sm:$0xf]  ;;  %v5835_v15 = vor.u32 %v7075_v60, %v5832_v35  ;;  %v6056_v40 = vld [vmem:[#allocation9 + $0x398] sm:$0xf0] }
 0x1fc   : > { %v6247_v44 = vor.u32 %v7181_v26, %v6246_v32  ;;  %v6059_v60 = vor.u32 %v7131_v41, %v6056_v40  ;;  %v7095_v35 = vld [vmem:[#allocation9 + $0x26c] sm:$0xf]  ;;  %v6344_v43 = vld [vmem:[#allocation9 + $0x5d8] sm:$0xf0] }
 0x1fd   : > { %v7023_v26 = vld [vmem:[#allocation9 + $0x2c] sm:$0xf] }
 0x1fe   : > { %3293 = vmatpush.bf16.msra.mxu2 %v5911_v56  ;;  %3307 = vmatpush.bf16.msra.mxu3 %v6039_v3  ;;  %v6104_v56 = vld [vmem:[#allocation9 + $0x3f8] sm:$0xf0]  ;;  %v5707_v3 = vor.u32 %v7043_v33, %v5704_v12  ;;  %v7167_v40 = vld [vmem:[#allocation9 + $0x4ac] sm:$0xf] }
 0x1ff   : > { %3320 = vmatpush.bf16.msrb.mxu0 %v6183_v4  ;;  %3334 = vmatpush.bf16.msrb.mxu1 %v6311_v9  ;;  %v5816_v4 = vld [vmem:[#allocation9 + $0x1b8] sm:$0xf0]  ;;  %v6119_v9 = vor.u32 %v7149_v34, %v6118_v18  ;;  %v6107_v36 = vor.u32 %v7143_v19, %v6104_v56 }
 0x200   : > { %v5819_v52 = vor.u32 %v7071_v49, %v5816_v4  ;;  %v5768_v33 = vld [vmem:[#allocation9 + $0x158] sm:$0xf0]  ;;  %v5627_v4 = vor.u32 %v7023_v26, %v5624_v17  ;;  %v7191_v17 = vld [vmem:[#allocation9 + $0x56c] sm:$0xf] }
 0x201   : > { %v6040_v18 = vld [vmem:[#allocation9 + $0x378] sm:$0xf0] }
 0x202   : > { %3294 = vmatpush.bf16.msra.mxu2 %v5895_v48  ;;  %3308 = vmatpush.bf16.msra.mxu3 %v6023_v2  ;;  %v5960_v48 = vld [vmem:[#allocation9 + $0x2d8] sm:$0xf0]  ;;  %v7139_v2 = vld [vmem:[#allocation9 + $0x3cc] sm:$0xf] }
 0x203   : > { %3321 = vmatpush.bf16.msrb.mxu0 %v6167_v16  ;;  %3335 = vmatpush.bf16.msrb.mxu1 %v6295_v55  ;;  %v5672_v16 = vld [vmem:[#allocation9 + $0x98] sm:$0xf0]  ;;  %v7067_v55 = vld [vmem:[#allocation9 + $0x18c] sm:$0xf]  ;;  %v5963_v22 = vor.u32 %v7107_v47, %v5960_v48  ;;  %v6091_v59 = vor.u32 %v7139_v2, %v6088_v58 }
 0x204   : > { %v5675_v0 = vor.u32 %v7035_v27, %v5672_v16  ;;  %v5803_v39 = vor.u32 %v7067_v55, %v5800_v57  ;;  %v5752_v19 = vld [vmem:[#allocation9 + $0x138] sm:$0xf0]  ;;  %v7175_v48 = vld [vmem:[#allocation9 + $0x4ec] sm:$0xf] }
 0x205   : > { %v6024_v49 = vld [vmem:[#allocation9 + $0x358] sm:$0xf0]  ;;  %v7207_v58 = vld [vmem:[#allocation9 + $0x5ec] sm:$0xf] }
 0x206   : > { %3295 = vmatpush.bf16.msra.mxu2 %v5879_v50  ;;  %3309 = vmatpush.bf16.msra.mxu3 %v6007_v38  ;;  %v5944_v50 = vld [vmem:[#allocation9 + $0x2b8] sm:$0xf0]  ;;  %v7135_v38 = vld [vmem:[#allocation9 + $0x3ac] sm:$0xf]  ;;  %v6027_v27 = vor.u32 %v7123_v24, %v6024_v49 }
 0x207   : > { %3322 = vmatpush.bf16.msrb.mxu0 %v6151_v42  ;;  %3336 = vmatpush.bf16.msrb.mxu1 %v6279_v23  ;;  %v5947_v21 = vor.u32 %v7103_v6, %v5944_v50  ;;  %v6075_v42 = vor.u32 %v7135_v38, %v6072_v51  ;;  %v7099_v23 = vld [vmem:[#allocation9 + $0x28c] sm:$0xf]  ;;  %v5736_v47 = vld [vmem:[#allocation9 + $0x118] sm:$0xf0] }
 0x208   : > { %v5931_v12 = vor.u32 %v7099_v23, %v5928_v28  ;;  %v6232_v2 = vld [vmem:[#allocation9 + $0x4f8] sm:$0xf0]  ;;  %v7087_v16 = vld [vmem:[#allocation9 + $0x22c] sm:$0xf] }
 0x209   : > { %v5880_v55 = vld [vmem:[#allocation9 + $0x238] sm:$0xf0]  ;;  %v7119_v57 = vld [vmem:[#allocation9 + $0x32c] sm:$0xf]  ;;  %v6235_v50 = vor.u32 %v7175_v48, %v6232_v2 }
 0x20a   : > { %3296 = vmatpush.bf16.msra.mxu2 %v5863_v46  ;;  %3310 = vmatpush.bf16.msra.mxu3 %v5991_v7  ;;  %v5787_v46 = vor.u32 %v7063_v45, %v5784_v31  ;;  %v7027_v7 = vld [vmem:[#allocation9 + $0x4c] sm:$0xf]  ;;  %v5883_v11 = vor.u32 %v7087_v16, %v5880_v55  ;;  %v5992_v23 = vld [vmem:[#allocation9 + $0x318] sm:$0xf0] }
 0x20b   : > { %3323 = vmatpush.bf16.msrb.mxu0 %v6135_v20  ;;  %3337 = vmatpush.bf16.msrb.mxu1 %v6263_v25  ;;  %v5912_v20 = vld [vmem:[#allocation9 + $0x278] sm:$0xf0]  ;;  %v7127_v25 = vld [vmem:[#allocation9 + $0x36c] sm:$0xf] }
 0x20c   : > { %v5915_v56 = vor.u32 %v7095_v35, %v5912_v20  ;;  %v7171_v51 = vld [vmem:[#allocation9 + $0x4cc] sm:$0xf]  ;;  %v8445_v35 = vld [vmem:[%s8590_s4] sm:$0xf]  ;;  %v6184_v20 = vld [vmem:[#allocation9 + $0x498] sm:$0xf0] }
 0x20d   : > { %3297 = vmatmul.bf16.vlgmr.msra.gmra.mxu2 %v8420_v30  ;;  %3311 = vmatmul.bf16.vlgmr.msra.gmra.mxu3 %v8422_v54  ;;  %v7083_v31 = vld [vmem:[#allocation9 + $0x20c] sm:$0xf]  ;;  %v6168_v26 = vld [vmem:[#allocation9 + $0x478] sm:$0xf0] }
 0x20e   : > { %3345 = vmatpush.bf16.msrb.mxu2 %v5723_v10  ;;  %3359 = vmatpush.bf16.msrb.mxu3 %v5851_v13  ;;  %v5640_v10 = vld [vmem:[#allocation9 + $0x58] sm:$0xf0]  ;;  %v7059_v13 = vld [vmem:[#allocation9 + $0x14c] sm:$0xf] }
 0x20f   : > { %3324 = vmatpush.bf16.msrb.mxu0 %v6119_v9  ;;  %3338 = vmatpush.bf16.msrb.mxu1 %v6247_v44  ;;  %v5643_v34 = vor.u32 %v7027_v7, %v5640_v10  ;;  %v5771_v32 = vor.u32 %v7059_v13, %v5768_v33  ;;  %v5755_v9 = vor.u32 %v7055_v62, %v5752_v19  ;;  %v7019_v44 = vld [vmem:[#allocation9 + $0xc] sm:$0xf]  ;;  %v6328_v7 = vld [vmem:[#allocation9 + $0x5b8] sm:$0xf0] }
 0x210   : > { %v6296_v62 = vld [vmem:[#allocation9 + $0x578] sm:$0xf0]  ;;  %v7155_v24 = vld [vmem:[#allocation9 + $0x44c] sm:$0xf] }
 0x211   : > { %v6152_v49 = vld [vmem:[#allocation9 + $0x458] sm:$0xf0]  ;;  %v7183_v48 = vld [vmem:[#allocation9 + $0x52c] sm:$0xf] }
 0x212   : > { %3346 = vmatpush.bf16.msrb.mxu2 %v5707_v3  ;;  %3360 = vmatpush.bf16.msrb.mxu3 %v5835_v15  ;;  %v6043_v3 = vor.u32 %v7127_v25, %v6040_v18  ;;  %v7091_v15 = vld [vmem:[#allocation9 + $0x24c] sm:$0xf]  ;;  %v6312_v18 = vld [vmem:[#allocation9 + $0x598] sm:$0xf0] }
 0x213   : > { %3373 = vmatpush.bf16.msra.mxu0 %v5979_v61  ;;  %3387 = vmatpush.bf16.msra.mxu1 %v6107_v36  ;;  %v5608_v61 = vld [vmem:[#allocation9 + $0x18] sm:$0xf0]  ;;  %v7051_v36 = vld [vmem:[#allocation9 + $0x10c] sm:$0xf] }
 0x214   : > { %3325 = vmatmul.bf16.vlgmr.msrb.gmra.mxu0 %v8416_v8  ;;  %3339 = vmatmul.bf16.vlgmr.msrb.gmra.mxu1 %v8418_v53  ;;  %v5739_v6 = vor.u32 %v7051_v36, %v5736_v47  ;;  %v7195_v25 = vld [vmem:[#allocation9 + $0x58c] sm:$0xf]  ;;  %v6120_v55 = vld [vmem:[#allocation9 + $0x418] sm:$0xf0] }
 0x215   : > { %v7151_v47 = vld [vmem:[#allocation9 + $0x42c] sm:$0xf] }
 0x216   : > { %3347 = vmatpush.bf16.msrb.mxu2 %v5691_v5  ;;  %3361 = vmatpush.bf16.msrb.mxu3 %v5819_v52  ;;  %v6360_v5 = vld [vmem:[#allocation9 + $0x5f8] sm:$0xf0]  ;;  %v5899_v52 = vor.u32 %v7091_v15, %v5896_v37  ;;  %v6299_v37 = vor.u32 %v7191_v17, %v6296_v62 }
 0x217   : > { %3374 = vmatpush.bf16.msra.mxu0 %v5963_v22  ;;  %3388 = vmatpush.bf16.msra.mxu1 %v6091_v59  ;;  %v6008_v22 = vld [vmem:[#allocation9 + $0x338] sm:$0xf0]  ;;  %v5611_v59 = vor.u32 %v7019_v44, %v5608_v61  ;;  %v6363_v38 = vor.u32 %v7207_v58, %v6360_v5  ;;  %v6155_v61 = vor.u32 %v7155_v24, %v6152_v49 }
 0x218   : > { %v6011_v45 = vor.u32 %v7119_v57, %v6008_v22  ;;  %v7179_v57 = vld [vmem:[#allocation9 + $0x50c] sm:$0xf]  ;;  %v6248_v22 = vld [vmem:[#allocation9 + $0x518] sm:$0xf0] }
 0x21a   : > { %3348 = vmatpush.bf16.msrb.mxu2 %v5675_v0  ;;  %3362 = vmatpush.bf16.msrb.mxu3 %v5803_v39  ;;  %v6216_v0 = vld [vmem:[#allocation9 + $0x4d8] sm:$0xf0]  ;;  %v7203_v39 = vld [vmem:[#allocation9 + $0x5cc] sm:$0xf] }
 0x21b   : > { %3375 = vmatpush.bf16.msra.mxu0 %v5947_v21  ;;  %3389 = vmatpush.bf16.msra.mxu1 %v6075_v42  ;;  %v5864_v21 = vld [vmem:[#allocation9 + $0x218] sm:$0xf0]  ;;  %v7115_v42 = vld [vmem:[#allocation9 + $0x30c] sm:$0xf]  ;;  %v6219_v28 = vor.u32 %v7171_v51, %v6216_v0  ;;  %v6347_v41 = vor.u32 %v7203_v39, %v6344_v43 }
 0x21c   : > { %v5867_v10 = vor.u32 %v7083_v31, %v5864_v21  ;;  %v5995_v13 = vor.u32 %v7115_v42, %v5992_v23 }
 0x21e   : > { %3349 = vmatpush.bf16.msrb.mxu2 %v5659_v14  ;;  %3363 = vmatpush.bf16.msrb.mxu3 %v5787_v46  ;;  %v6200_v14 = vld [vmem:[#allocation9 + $0x4b8] sm:$0xf0]  ;;  %v7199_v46 = vld [vmem:[#allocation9 + $0x5ac] sm:$0xf] }
 0x21f   : > { %3376 = vmatpush.bf16.msra.mxu0 %v5931_v12  ;;  %3390 = vmatpush.bf16.msra.mxu1 %v6059_v60  ;;  %v6203_v33 = vor.u32 %v7167_v40, %v6200_v14  ;;  %v6331_v12 = vor.u32 %v7199_v46, %v6328_v7  ;;  %v7163_v60 = vld [vmem:[#allocation9 + $0x48c] sm:$0xf]  ;;  %v2096_v7 = vperm.slane %v8445_v35, 1 }
 0x222   : > { %3350 = vmatpush.bf16.msrb.mxu2 %v5643_v34  ;;  %3364 = vmatpush.bf16.msrb.mxu3 %v5771_v32  ;;  %v2095_v34 = vperm.slane %v8445_v35, 0  ;;  %v7159_v32 = vld [vmem:[#allocation9 + $0x46c] sm:$0xf] }
 0x223   : > { %3377 = vmatpush.bf16.msra.mxu0 %v5915_v56  ;;  %3391 = vmatpush.bf16.msra.mxu1 %v6043_v3  ;;  %v6171_v15 = vor.u32 %v7159_v32, %v6168_v26 }
 0x226   : > { %3351 = vmatpush.bf16.msrb.mxu2 %v5627_v4  ;;  %3365 = vmatpush.bf16.msrb.mxu3 %v5755_v9  ;;  %v7187_v4 = vld [vmem:[#allocation9 + $0x54c] sm:$0xf]  ;;  %v6280_v9 = vld [vmem:[#allocation9 + $0x558] sm:$0xf0] }
 0x227   : > { %3378 = vmatpush.bf16.msra.mxu0 %v5899_v52  ;;  %3392 = vmatpush.bf16.msra.mxu1 %v6027_v27  ;;  %v6283_v36 = vor.u32 %v7187_v4, %v6280_v9  ;;  %v7147_v27 = vld [vmem:[#allocation9 + $0x40c] sm:$0xf]  ;;  %v2097_v4 = vperm.slane %v8445_v35, 2 }
 0x22a   : > { %3352 = vmatpush.bf16.msrb.mxu2 %v5611_v59  ;;  %3366 = vmatpush.bf16.msrb.mxu3 %v5739_v6  ;;  %v6123_v6 = vor.u32 %v7147_v27, %v6120_v55 }
 0x22b   : > { %3379 = vmatpush.bf16.msra.mxu0 %v5883_v11  ;;  %3393 = vmatpush.bf16.msra.mxu1 %v6011_v45 }
 0x22d   : > { %3353 = vmatmul.bf16.vlgmr.msrb.gmra.mxu2 %v8396_v1  ;;  %3367 = vmatmul.bf16.vlgmr.msrb.gmra.mxu3 %v8398_v63  ;;  %v6187_v1 = vor.u32 %v7163_v60, %v6184_v20  ;;  %v6315_v63 = vor.u32 %v7195_v25, %v6312_v18  ;;  %v3102_v19 = vpop.f32.mrf.mxu0  ;;  %v3116_v56 = vpop.f32.mrf.mxu1 }
 0x22e   : > { %3401 = vmatpush.bf16.msra.mxu2 %v6235_v50  ;;  %3415 = vmatpush.bf16.msra.mxu3 %v6363_v38  ;;  %v3103_v3 = vadd.f32 %v3102_v19, %v2095_v34  ;;  %v6251_v50 = vor.u32 %v7179_v57, %v6248_v22 }
 0x22f   : > { %3380 = vmatpush.bf16.msra.mxu0 %v5867_v10  ;;  %3394 = vmatpush.bf16.msra.mxu1 %v5995_v13 }
 0x230   : > { %v3117_v44 = vadd.f32 %v3116_v56, %v3103_v3 }
 0x232   : > { %3402 = vmatpush.bf16.msra.mxu2 %v6219_v28  ;;  %3416 = vmatpush.bf16.msra.mxu3 %v6347_v41 }
 0x233   : > { %3381 = vmatmul.bf16.vlgmr.msra.gmra.mxu0 %v8420_v30  ;;  %3395 = vmatmul.bf16.vlgmr.msra.gmra.mxu1 %v8422_v54  ;;  %v6136_v30 = vld [vmem:[#allocation9 + $0x438] sm:$0xf0] }
 0x234   : > { %v6264_v54 = vld [vmem:[#allocation9 + $0x538] sm:$0xf0]  ;;  %v6139_v5 = vor.u32 %v7151_v47, %v6136_v30  ;;  %v2098_v30 = vperm.slane %v8445_v35, 3 }
 0x235   : > { %v3104_v2 = vpop.f32.mrf.mxu0  ;;  %v6267_v52 = vor.u32 %v7183_v48, %v6264_v54  ;;  %v3118_v16 = vpop.f32.mrf.mxu1 }
 0x236   : > { %3403 = vmatpush.bf16.msra.mxu2 %v6203_v33  ;;  %3417 = vmatpush.bf16.msra.mxu3 %v6331_v12  ;;  %v3105_v58 = vadd.f32 %v3104_v2, %v2095_v34 }
 0x238   : > { %v3119_v59 = vadd.f32 %v3118_v16, %v3105_v58 }
 0x23a   : > { %3404 = vmatpush.bf16.msra.mxu2 %v6187_v1  ;;  %3418 = vmatpush.bf16.msra.mxu3 %v6315_v63 }
 0x23e   : > { %3405 = vmatpush.bf16.msra.mxu2 %v6171_v15  ;;  %3419 = vmatpush.bf16.msra.mxu3 %v6299_v37 }
 0x242   : > { %3406 = vmatpush.bf16.msra.mxu2 %v6155_v61  ;;  %3420 = vmatpush.bf16.msra.mxu3 %v6283_v36 }
 0x246   : > { %3407 = vmatpush.bf16.msra.mxu2 %v6139_v5  ;;  %3421 = vmatpush.bf16.msra.mxu3 %v6267_v52 }
 0x249   : > { %v3158_v39 = vpop.f32.mrf.mxu0  ;;  %v3172_v11 = vpop.f32.mrf.mxu1 }
 0x24a   : > { %3408 = vmatpush.bf16.msra.mxu2 %v6123_v6  ;;  %3422 = vmatpush.bf16.msra.mxu3 %v6251_v50 }
 0x24d   : > { %3409 = vmatmul.bf16.vlgmr.msra.gmra.mxu2 %v8416_v8  ;;  %3423 = vmatmul.bf16.vlgmr.msra.gmra.mxu3 %v8418_v53 }
 0x250   : > { %v3130_v38 = vpop.f32.mrf.mxu2  ;;  %v3144_v51 = vpop.f32.mrf.mxu3 }
 0x251   : > { %v3131_v0 = vadd.f32 %v3130_v38, %v3117_v44  ;;  %v3160_v41 = vpop.f32.mrf.mxu0  ;;  %v3174_v14 = vpop.f32.mrf.mxu1 }
 0x253   : > { %v3145_v43 = vadd.f32 %v3144_v51, %v3131_v0 }
 0x255   : > { %v3159_v45 = vadd.f32 %v3158_v39, %v3145_v43 }
 0x257   : > { %v8452_v31 = vadd.f32 %v3172_v11, %v3159_v45 }
 0x258   : > { %v3132_v21 = vpop.f32.mrf.mxu2  ;;  %v3146_v42 = vpop.f32.mrf.mxu3 }
 0x259   : > { %v3133_v23 = vadd.f32 %v3132_v21, %v3119_v59  ;;  %v3214_v60 = vpop.f32.mrf.mxu0  ;;  %v3228_v20 = vpop.f32.mrf.mxu1 }
 0x25b   : > { %v3147_v28 = vadd.f32 %v3146_v42, %v3133_v23  ;;  %v7217_v23 = vld [vmem:[#allocation11 + $0x38] sm:$0xff] }
 0x25c   : > { %4762 = vmatpush.bf16.msrb.mxu0 %v7217_v23 }
 0x25d   : > { %v3161_v40 = vadd.f32 %v3160_v41, %v3147_v28  ;;  %v7225_v28 = vld [vmem:[#allocation11 + $0x78] sm:$0xff] }
 0x25e   : > { %v7233_v41 = vld [vmem:[#allocation11 + $0xb8] sm:$0xff]  ;;  %4775 = vmatpush.bf16.msrb.mxu1 %v7225_v28 }
 0x25f   : > { %v8454_v46 = vadd.f32 %v3174_v14, %v3161_v40  ;;  %4788 = vmatpush.bf16.msrb.mxu2 %v7233_v41 }
 0x260   : > { %v3186_v8 = vpop.f32.mrf.mxu2  ;;  %v3200_v53 = vpop.f32.mrf.mxu3 }
 0x261   : > { %v3216_v25 = vpop.f32.mrf.mxu0  ;;  %v3230_v1 = vpop.f32.mrf.mxu1  ;;  %v3187_v61 = vadd.f32 %v3186_v8, %v2096_v7 }
 0x263   : > { %v3201_v48 = vadd.f32 %v3200_v53, %v3187_v61 }
 0x265   : > { %v3215_v52 = vadd.f32 %v3214_v60, %v3201_v48 }
 0x267   : > { %v3229_v59 = vadd.f32 %v3228_v20, %v3215_v52  ;;  %v7216_v20 = vld [vmem:[#allocation11 + $0x30] sm:$0xff]  ;;  %v7214_v52 = vld [vmem:[#allocation11 + $0x20] sm:$0xff] }
 0x268   : > { %v3188_v10 = vpop.f32.mrf.mxu2  ;;  %v3202_v33 = vpop.f32.mrf.mxu3  ;;  %4763 = vmatpush.bf16.msrb.mxu0 %v7216_v20  ;;  %v7212_v20 = vld [vmem:[#allocation11 + $0x10] sm:$0xff] }
 0x269   : > { %v3189_v13 = vadd.f32 %v3188_v10, %v2096_v7  ;;  %v7241_v10 = vld [vmem:[#allocation11 + $0xf8] sm:$0xff] }
 0x26a   : > { %4801 = vmatpush.bf16.msrb.mxu3 %v7241_v10 }
 0x26b   : > { %v3203_v12 = vadd.f32 %v3202_v33, %v3189_v13 }
 0x26d   : > { %v3217_v43 = vadd.f32 %v3216_v25, %v3203_v12  ;;  %v7224_v25 = vld [vmem:[#allocation11 + $0x70] sm:$0xff] }
 0x26e   : > { %4776 = vmatpush.bf16.msrb.mxu1 %v7224_v25  ;;  %v7220_v25 = vld [vmem:[#allocation11 + $0x50] sm:$0xff] }
 0x26f   : > { %v3231_v13 = vadd.f32 %v3230_v1, %v3217_v43  ;;  %v3429_v1 = vmax.f32 %v8452_v31, 0.0 }
 0x270   : > { %v3242_v18 = vpop.f32.mrf.mxu2  ;;  %v3256_v34 = vpop.f32.mrf.mxu3 }
 0x271   : > { %v3270_v63 = vpop.f32.mrf.mxu0  ;;  %v3284_v17 = vpop.f32.mrf.mxu1  ;;  %v3243_v51 = vadd.f32 %v3242_v18, %v3229_v59  ;;  %v7232_v18 = vld [vmem:[#allocation11 + $0xb0] sm:$0xff] }
 0x272   : > { %v3271_v47 = vadd.f32 %v3270_v63, %v2097_v4  ;;  %4789 = vmatpush.bf16.msrb.mxu2 %v7232_v18 }
 0x273   : > { %v3257_v40 = vadd.f32 %v3256_v34, %v3243_v51  ;;  %v7221_v51 = vld [vmem:[#allocation11 + $0x58] sm:$0xff] }
 0x274   : > { %v3285_v2 = vadd.f32 %v3284_v17, %v3271_v47 }
 0x275   : > { %v3430_v63 = vmax.f32 %v3257_v40, 0.0 }
 0x278   : > { %v8457_v32 = vpop.f32.mrf.mxu2  ;;  %v8459_v26 = vpop.f32.mrf.mxu3 }
 0x279   : > { %v3272_v62 = vpop.f32.mrf.mxu0  ;;  %v3286_v3 = vpop.f32.mrf.mxu1  ;;  %v3245_v17 = vadd.f32 %v8457_v32, %v3231_v13 }
 0x27a   : > { %v3273_v22 = vadd.f32 %v3272_v62, %v2097_v4  ;;  %v7223_v4 = vld [vmem:[#allocation11 + $0x68] sm:$0xff] }
 0x27b   : > { %v3259_v61 = vadd.f32 %v8459_v26, %v3245_v17  ;;  %4777 = vmatpush.bf16.msrb.mxu1 %v7223_v4  ;;  %v7228_v17 = vld [vmem:[#allocation11 + $0x90] sm:$0xff]  ;;  %v7235_v4 = vld [vmem:[#allocation11 + $0xc8] sm:$0xff] }
 0x27c   : > { %v3287_v35 = vadd.f32 %v3286_v3, %v3273_v22 }
 0x27d   : > { %v3434_v26 = vmax.f32 %v3259_v61, 0.0 }
 0x290   : > { %v3298_v19 = vpop.f32.mrf.mxu2  ;;  %v3312_v56 = vpop.f32.mrf.mxu3 }
 0x291   : > { %v3326_v15 = vpop.f32.mrf.mxu0  ;;  %v3340_v49 = vpop.f32.mrf.mxu1  ;;  %v3299_v27 = vadd.f32 %v3298_v19, %v3285_v2  ;;  %v7240_v19 = vld [vmem:[#allocation11 + $0xf0] sm:$0xff] }
 0x292   : > { %4802 = vmatpush.bf16.msrb.mxu3 %v7240_v19 }
 0x293   : > { %v3313_v6 = vadd.f32 %v3312_v56, %v3299_v27  ;;  %v7222_v27 = vld [vmem:[#allocation11 + $0x60] sm:$0xff] }
 0x294   : > { %4778 = vmatpush.bf16.msrb.mxu1 %v7222_v27  ;;  %v7226_v27 = vld [vmem:[#allocation11 + $0x80] sm:$0xff] }
 0x295   : > { %v3327_v0 = vadd.f32 %v3326_v15, %v3313_v6  ;;  %v3433_v6 = vmax.f32 %v8454_v46, 0.0 }
 0x297   : > { %v3341_v14 = vadd.f32 %v3340_v49, %v3327_v0  ;;  %v7215_v49 = vld [vmem:[#allocation11 + $0x28] sm:$0xff]  ;;  %v7229_v0 = vld [vmem:[#allocation11 + $0x98] sm:$0xff] }
 0x298   : > { %v3300_v37 = vpop.f32.mrf.mxu2  ;;  %v3314_v24 = vpop.f32.mrf.mxu3  ;;  %4764 = vmatpush.bf16.msrb.mxu0 %v7215_v49  ;;  %4779 = vmatpush.bf16.msrb.mxu1 %v7221_v51  ;;  %v7227_v49 = vld [vmem:[#allocation11 + $0x88] sm:$0xff] }
 0x299   : > { %v3328_v9 = vpop.f32.mrf.mxu0  ;;  %v8463_v54 = vpop.f32.mrf.mxu1  ;;  %v3301_v45 = vadd.f32 %v3300_v37, %v3287_v35  ;;  %v3431_v34 = vmax.f32 %v3341_v14, 0.0 }
 0x29b   : > { %v3315_v12 = vadd.f32 %v3314_v24, %v3301_v45  ;;  %v3437_v32 = vmax.f32 %v3429_v1, %v3431_v34  ;;  %v7236_v34 = vld [vmem:[#allocation11 + $0xd0] sm:$0xff] }
 0x29c   : > { %4765 = vmatpush.bf16.msrb.mxu0 %v7214_v52  ;;  %4780 = vmatpush.bf16.msrb.mxu1 %v7220_v25 }
 0x29d   : > { %v3329_v56 = vadd.f32 %v3328_v9, %v3315_v12 }
 0x29f   : > { %v3343_v9 = vadd.f32 %v8463_v54, %v3329_v56  ;;  %v7230_v54 = vld [vmem:[#allocation11 + $0xa0] sm:$0xff]  ;;  %v7211_v56 = vld [vmem:[#allocation11 + $0x8] sm:$0xff] }
 0x2b0   : > { %v3354_v44 = vpop.f32.mrf.mxu2  ;;  %v3368_v36 = vpop.f32.mrf.mxu3 }
 0x2b1   : > { %v3355_v58 = vadd.f32 %v3354_v44, %v2098_v30  ;;  %v3382_v5 = vpop.f32.mrf.mxu0  ;;  %v3396_v38 = vpop.f32.mrf.mxu1  ;;  %v7231_v44 = vld [vmem:[#allocation11 + $0xa8] sm:$0xff] }
 0x2b2   : > { %4790 = vmatpush.bf16.msrb.mxu2 %v7231_v44 }
 0x2b3   : > { %v3369_v55 = vadd.f32 %v3368_v36, %v3355_v58 }
 0x2b5   : > { %v3383_v50 = vadd.f32 %v3382_v5, %v3369_v55 }
 0x2b6   : > { %4791 = vmatpush.bf16.msrb.mxu2 %v7230_v54 }
 0x2b7   : > { %v3397_v11 = vadd.f32 %v3396_v38, %v3383_v50  ;;  %v7213_v38 = vld [vmem:[#allocation11 + $0x18] sm:$0xff] }
 0x2b8   : > { %v3356_v16 = vpop.f32.mrf.mxu2  ;;  %v3370_v57 = vpop.f32.mrf.mxu3  ;;  %4766 = vmatpush.bf16.msrb.mxu0 %v7213_v38 }
 0x2b9   : > { %v3357_v39 = vadd.f32 %v3356_v16, %v2098_v30  ;;  %v3384_v21 = vpop.f32.mrf.mxu0  ;;  %v3398_v3 = vpop.f32.mrf.mxu1  ;;  %v7239_v30 = vld [vmem:[#allocation11 + $0xe8] sm:$0xff]  ;;  %v3435_v16 = vmax.f32 %v3343_v9, 0.0  ;;  %v7210_v9 = vld [vmem:[#allocation11] sm:$0xff] }
 0x2ba   : > { %4803 = vmatpush.bf16.msrb.mxu3 %v7239_v30  ;;  %4792 = vmatpush.bf16.msrb.mxu2 %v7229_v0  ;;  %v7257_v0 = vld [vmem:[#allocation11 + $0x178] sm:$0xff] }
 0x2bb   : > { %v3371_v8 = vadd.f32 %v3370_v57, %v3357_v39  ;;  %v7238_v57 = vld [vmem:[#allocation11 + $0xe0] sm:$0xff]  ;;  %v7237_v39 = vld [vmem:[#allocation11 + $0xd8] sm:$0xff]  ;;  %v3439_v35 = vmax.f32 %v3433_v6, %v3435_v16 }
 0x2bc   : > { %4767 = vmatpush.bf16.msrb.mxu0 %v7212_v20  ;;  %v7234_v16 = vld [vmem:[#allocation11 + $0xc0] sm:$0xff] }
 0x2bd   : > { %v3385_v33 = vadd.f32 %v3384_v21, %v3371_v8 }
 0x2be   : > { %4804 = vmatpush.bf16.msrb.mxu3 %v7238_v57  ;;  %4793 = vmatpush.bf16.msrb.mxu2 %v7228_v17 }
 0x2bf   : > { %v3399_v15 = vadd.f32 %v3398_v3, %v3385_v33  ;;  %v7219_v3 = vld [vmem:[#allocation11 + $0x48] sm:$0xff] }
 0x2c0   : > { %4768 = vmatpush.bf16.msrb.mxu0 %v7211_v56  ;;  %4781 = vmatpush.bf16.msrb.mxu1 %v7219_v3 }
 0x2c2   : > { %4805 = vmatpush.bf16.msrb.mxu3 %v7237_v39  ;;  %4794 = vmatpush.bf16.msrb.mxu2 %v7227_v49 }
 0x2c4   : > { %4769 = vmatpush.bf16.msrb.mxu0 %v7210_v9 }
 0x2c6   : > { %4806 = vmatpush.bf16.msrb.mxu3 %v7236_v34  ;;  %4795 = vmatpush.bf16.msrb.mxu2 %v7226_v27  ;;  %v3642_v34 = vld [vmem:[#allocation5 + $0x2] sm:$0x3] }
 0x2ca   : > { %4807 = vmatpush.bf16.msrb.mxu3 %v7235_v4 }
 0x2ce   : > { %4808 = vmatpush.bf16.msrb.mxu3 %v7234_v16 }
 0x2d0   : > { %v3410_v42 = vpop.f32.mrf.mxu2  ;;  %v3424_v7 = vpop.f32.mrf.mxu3 }
 0x2d1   : > { %v3411_v53 = vadd.f32 %v3410_v42, %v3397_v11 }
 0x2d3   : > { %v3425_v60 = vadd.f32 %v3424_v7, %v3411_v53 }
 0x2d5   : > { %v3432_v62 = vmax.f32 %v3425_v60, 0.0 }
 0x2d7   : > { %v3438_v37 = vmax.f32 %v3430_v63, %v3432_v62 }
 0x2d8   : > { %v3412_v24 = vpop.f32.mrf.mxu2  ;;  %v3426_v2 = vpop.f32.mrf.mxu3 }
 0x2d9   : > { %v3445_v36 = vrot.slane %v3438_v37, 6  ;;  %v3413_v47 = vadd.f32 %v3412_v24, %v3399_v15 }
 0x2db   : > { %v3447_v31 = vsel %vm8635_vm4, %v3437_v32, %v3445_v36  ;;  %v3448_v48 = vsel %vm8636_vm5, %v3437_v32, %v3445_v36  ;;  %v3427_v5 = vadd.f32 %v3426_v2, %v3413_v47  ;;  %v3450_v22 = vsel %vm8637_vm12, %v3437_v32, %v3445_v36  ;;  %vm8650_vm4 = vmmov %vm8639_vm0 }
 0x2dc   : > { %v3449_v58 = vrot.slane %v3448_v48, 2  ;;  %3461 = vst [vmem:[#allocation1] ss:$4 sm:$0xff] %v3447_v31  ;;  %v3452_v59 = vsel %vm8638_vm15, %v3445_v36, %v3437_v32  ;;  %v3451_v43 = vrot.slane %v3450_v22, 4  ;;  %v7218_v31 = vld [vmem:[#allocation11 + $0x40] sm:$0xff]  ;;  %vm8651_vm5 = vmmov %vm8639_vm0  ;;  %vm8653_vm15 = vcmask 1040384  }
 0x2dd   : > { %v3436_v55 = vmax.f32 %v3427_v5, 0.0  ;;  %v3453_v11 = vrot.slane %v3452_v59, 6  ;;  %v7249_v59 = vld [vmem:[#allocation11 + $0x138] sm:$0xff]  ;;  %4782 = vmatpush.bf16.msrb.mxu1 %v7218_v31  ;;  %vm8652_vm12 = vmmov %vm8639_vm0  ;;  %v7247_v31 = vld [vmem:[#allocation11 + $0x128] sm:$0xff] }
 0x2de   : > { %3465 = vst [vmem:[#allocation1 + $0x20] ss:$4 sm:$0xff] %v3449_v58  ;;  %4814 = vmatpush.bf16.msra.mxu0 %v7249_v59 }
 0x2df   : > { %v3440_v50 = vmax.f32 %v3434_v26, %v3436_v55 }
 0x2e1   : > { %v3446_v45 = vrot.slane %v3440_v50, 6  ;;  %4827 = vmatpush.bf16.msra.mxu1 %v7257_v0 }
 0x2e3   : > { %v3462_v21 = vld.sshfl [vmem:[#allocation1] sm:$0xff pattern:$0x73625140]  ;;  %v3463_v42 = vld.sshfl [vmem:[#allocation1 + $0x8] sm:$0xff pattern:$0x73625140]  ;;  %v3454_v28 = vsel %vm8641_vm11, %v3439_v35, %v3446_v45  ;;  %v3455_v41 = vsel %vm8642_vm13, %v3439_v35, %v3446_v45  ;;  %v8479_v8 = vsel %vm8643_vm14, %v3439_v35, %v3446_v45  ;;  %v8482_v53 = vsel %vm8644_vm9, %v3446_v45, %v3439_v35  ;;  %vm8656_vm11 = vmmov %vm8645_vm1 }
 0x2e4   : > { %3468 = vst [vmem:[#allocation1] ss:$4 sm:$0xff] %v3451_v43  ;;  %v3502_v23 = vsel %vm8639_vm0, %v3462_v21, -inf  ;;  %v3509_v46 = vsel %vm8640_vm3, %v3463_v42, -inf  ;;  %v3456_v37 = vrot.slane %v3455_v41, 2  ;;  %v3458_v24 = vrot.slane %v8479_v8, 4  ;;  %vm8654_vm0 = vmmov %vm8653_vm15 }
 0x2e5   : > { %v3466_v40 = vld.sshfl [vmem:[#allocation1 + $0x20] sm:$0xff pattern:$0x73625140]  ;;  %v3467_v14 = vld.sshfl [vmem:[#allocation1 + $0x28] sm:$0xff pattern:$0x73625140]  ;;  %vm8655_vm3 = vmmov %vm8645_vm1 }
 0x2e6   : > { %3471 = vst [vmem:[#allocation1 + $0x20] ss:$4 sm:$0xff] %v3453_v11  ;;  %v3503_v7 = vrot.slane %v3502_v23, 4  ;;  %v3510_v10 = vrot.slane %v3509_v46, 4  ;;  %v3516_v13 = vsel %vm8645_vm1, %v3466_v40, -inf  ;;  %v3523_v33 = vsel %vm8646_vm10, %v3467_v14, -inf  ;;  %vm8657_vm13 = vmmov %vm8645_vm1 }
 0x2e7   : > { %v3517_v60 = vrot.slane %v3516_v13, 4  ;;  %v3524_v12 = vrot.slane %v3523_v33, 4  ;;  %v7248_v41 = vld [vmem:[#allocation11 + $0x130] sm:$0xff]  ;;  %vm8658_vm14 = vmmov %vm8645_vm1 }
 0x2e8   : > { %v3504_v18 = vmax.f32 %v3502_v23, %v3503_v7  ;;  %v3511_v63 = vmax.f32 %v3509_v46, %v3510_v10  ;;  %v3460_v23 = vrot.slane %v8482_v53, 6  ;;  %v7265_v46 = vld [vmem:[#allocation11 + $0x1b8] sm:$0xff]  ;;  %v3633_v10 = vld [vmem:[#allocation5] sm:$0x3]  ;;  %4815 = vmatpush.bf16.msra.mxu0 %v7248_v41  ;;  %v7262_v41 = vld [vmem:[#allocation11 + $0x1a0] sm:$0xff] }
 0x2e9   : > { %v3518_v62 = vmax.f32 %v3516_v13, %v3517_v60  ;;  %v3525_v19 = vmax.f32 %v3523_v33, %v3524_v12  ;;  %4840 = vmatpush.bf16.msra.mxu2 %v7265_v46  ;;  %vm8659_vm9 = vmmov %vm8654_vm0 }
 0x2ea   : > { %v3505_v1 = vrot.slane %v3504_v18, 2  ;;  %v3512_v15 = vrot.slane %v3511_v63, 2  ;;  %vm8660_vm1 = vmmov %vm8654_vm0 }
 0x2eb   : > { %v3469_v44 = vld.sshfl [vmem:[#allocation1] sm:$0xff pattern:$0x73625140]  ;;  %v3470_v61 = vld.sshfl [vmem:[#allocation1 + $0x8] sm:$0xff pattern:$0x73625140]  ;;  %vm8661_vm10 = vmmov %vm8648_vm2 }
 0x2ec   : > { %v3506_v32 = vmax.f32 %v3504_v18, %v3505_v1  ;;  %v3513_v36 = vmax.f32 %v3511_v63, %v3512_v15  ;;  %v3519_v47 = vrot.slane %v3518_v62, 2  ;;  %v3526_v30 = vrot.slane %v3525_v19, 2  ;;  %3474 = vst [vmem:[#allocation1] ss:$4 sm:$0xff] %v3454_v28  ;;  %v7273_v28 = vld [vmem:[#allocation11 + $0x1f8] sm:$0xff]  ;;  %4816 = vmatpush.bf16.msra.mxu0 %v7247_v31 }
 0x2ed   : > { %v3472_v48 = vld.sshfl [vmem:[#allocation1 + $0x20] sm:$0xff pattern:$0x73625140]  ;;  %v3473_v2 = vld.sshfl [vmem:[#allocation1 + $0x28] sm:$0xff pattern:$0x73625140]  ;;  %4853 = vmatpush.bf16.msra.mxu3 %v7273_v28 }
 0x2ee   : > { %v3507_v58 = vrot.slane %v3506_v32, 1  ;;  %v3514_v5 = vrot.slane %v3513_v36, 1  ;;  %v3520_v52 = vmax.f32 %v3518_v62, %v3519_v47  ;;  %v3527_v26 = vmax.f32 %v3525_v19, %v3526_v30  ;;  %3477 = vst [vmem:[#allocation1 + $0x20] ss:$4 sm:$0xff] %v3456_v37  ;;  %v7256_v62 = vld [vmem:[#allocation11 + $0x170] sm:$0xff]  ;;  %v7254_v28 = vld [vmem:[#allocation11 + $0x160] sm:$0xff] }
 0x2ef   : > { %v3530_v55 = vsel %vm8647_vm7, %v3469_v44, -inf  ;;  %v3537_v54 = vsel %vm8648_vm2, %v3470_v61, -inf  ;;  %v3544_v57 = vsel %vm8649_vm6, %v3472_v48, -inf  ;;  %v3551_v22 = vsel %vm8650_vm4, %v3473_v2, -inf  ;;  %v7264_v61 = vld [vmem:[#allocation11 + $0x1b0] sm:$0xff]  ;;  %v7255_v48 = vld [vmem:[#allocation11 + $0x168] sm:$0xff]  ;;  %4828 = vmatpush.bf16.msra.mxu1 %v7256_v62  ;;  %vm8662_vm7 = vmmov %vm8648_vm2 }
 0x2f0   : > { %v3508_v6 = vmax.f32 %v3506_v32, %v3507_v58  ;;  %v3515_v50 = vmax.f32 %v3513_v36, %v3514_v5  ;;  %v3521_v38 = vrot.slane %v3520_v52, 1  ;;  %v3528_v51 = vrot.slane %v3527_v26, 1  ;;  %v7272_v32 = vld [vmem:[#allocation11 + $0x1f0] sm:$0xff]  ;;  %v7263_v2 = vld [vmem:[#allocation11 + $0x1a8] sm:$0xff]  ;;  %4841 = vmatpush.bf16.msra.mxu2 %v7264_v61  ;;  %v7245_v62 = vld [vmem:[#allocation11 + $0x118] sm:$0xff] }
 0x2f1   : > { %v3531_v39 = vrot.slane %v3530_v55, 4  ;;  %v3538_v35 = vrot.slane %v3537_v54, 4  ;;  %v3545_v43 = vrot.slane %v3544_v57, 4  ;;  %v3552_v11 = vrot.slane %v3551_v22, 4  ;;  %4854 = vmatpush.bf16.msra.mxu3 %v7272_v32  ;;  %v7269_v61 = vld [vmem:[#allocation11 + $0x1d8] sm:$0xff]  ;;  %vm8663_vm2 = vmmov %vm8654_vm0 }
 0x2f2   : > { %v3522_v45 = vmax.f32 %v3520_v52, %v3521_v38  ;;  %v3529_v21 = vmax.f32 %v3527_v26, %v3528_v51  ;;  %v3614_v42 = vpack.c.bf16 %v3515_v50, %v3508_v6  ;;  %vm8664_vm6 = vmmov %vm8654_vm0 }
 0x2f3   : > { %v3532_v40 = vmax.f32 %v3530_v55, %v3531_v39  ;;  %v3539_v14 = vmax.f32 %v3537_v54, %v3538_v35  ;;  %v3546_v8 = vmax.f32 %v3544_v57, %v3545_v43  ;;  %v3553_v7 = vmax.f32 %v3551_v22, %v3552_v11  ;;  %v3475_v13 = vld.sshfl [vmem:[#allocation1] sm:$0xff pattern:$0x73625140]  ;;  %v3476_v33 = vld.sshfl [vmem:[#allocation1 + $0x8] sm:$0xff pattern:$0x73625140]  ;;  %4829 = vmatpush.bf16.msra.mxu1 %v7255_v48  ;;  %vm8665_vm4 = vmmov %vm8654_vm0 }
 0x2f4   : > { %v3615_v60 = vpack.c.bf16 %v3529_v21, %v3522_v45  ;;  %v3623_v12 = vrot.slane %v3614_v42, 3  ;;  %3480 = vst [vmem:[#allocation1] ss:$4 sm:$0xff] %v3458_v24  ;;  %v3558_v20 = vsel %vm8651_vm5, %v3475_v13, -inf  ;;  %v3565_v53 = vsel %vm8652_vm12, %v3476_v33, -inf  ;;  %v7271_v57 = vld [vmem:[#allocation11 + $0x1e8] sm:$0xff]  ;;  %4842 = vmatpush.bf16.msra.mxu2 %v7263_v2  ;;  %vm8666_vm5 = vmmov %vm8654_vm0 }
 0x2f5   : > { %v3533_v25 = vrot.slane %v3532_v40, 2  ;;  %v3540_v18 = vrot.slane %v3539_v14, 2  ;;  %v3547_v63 = vrot.slane %v3546_v8, 2  ;;  %v3554_v17 = vrot.slane %v3553_v7, 2  ;;  %v7246_v11 = vld [vmem:[#allocation11 + $0x120] sm:$0xff]  ;;  %4855 = vmatpush.bf16.msra.mxu3 %v7271_v57 }
 0x2f6   : > { %v3627_v19 = vsel %vm8653_vm15, %v3614_v42, %v3623_v12  ;;  %v3637_v56 = vrot.slane %v3615_v60, 3  ;;  %v3478_v3 = vld.sshfl [vmem:[#allocation1 + $0x20] sm:$0xff pattern:$0x73625140]  ;;  %v3559_v1 = vrot.slane %v3558_v20, 4  ;;  %v3566_v15 = vrot.slane %v3565_v53, 4  ;;  %4817 = vmatpush.bf16.msra.mxu0 %v7246_v11 }
 0x2f7   : > { %v3534_v37 = vmax.f32 %v3532_v40, %v3533_v25  ;;  %v3541_v24 = vmax.f32 %v3539_v14, %v3540_v18  ;;  %v3548_v49 = vmax.f32 %v3546_v8, %v3547_v63  ;;  %v3555_v4 = vmax.f32 %v3553_v7, %v3554_v17  ;;  %v3479_v44 = vld.sshfl [vmem:[#allocation1 + $0x28] sm:$0xff pattern:$0x73625140]  ;;  %v3651_v42 = vld [vmem:[#allocation5 + $0x4] sm:$0x3]  ;;  %v7270_v13 = vld [vmem:[#allocation11 + $0x1e0] sm:$0xff]  ;;  %4830 = vmatpush.bf16.msra.mxu1 %v7254_v28 }
 0x2f8   : > { %v3634_v36 = vsel %vm8378_vm8, %v3627_v19, %v3633_v10  ;;  %v3640_v47 = vsel %vm8654_vm0, %v3615_v60, %v3637_v56  ;;  %3483 = vst [vmem:[#allocation1 + $0x20] ss:$4 sm:$0xff] %v3460_v23  ;;  %v3560_v30 = vmax.f32 %v3558_v20, %v3559_v1  ;;  %v3567_v9 = vmax.f32 %v3565_v53, %v3566_v15  ;;  %v3660_v40 = vld [vmem:[#allocation5 + $0x6] sm:$0x3]  ;;  %v7253_v15 = vld [vmem:[#allocation11 + $0x158] sm:$0xff] }
 0x2f9   : > { %v3535_v58 = vrot.slane %v3534_v37, 1  ;;  %v3542_v5 = vrot.slane %v3541_v24, 1  ;;  %v3549_v52 = vrot.slane %v3548_v49, 1  ;;  %v3556_v26 = vrot.slane %v3555_v4, 1  ;;  %3635 = vst [vmem:[#allocation5] sm:$0x3] %v3634_v36  ;;  %4843 = vmatpush.bf16.msra.mxu2 %v7262_v41  ;;  %4856 = vmatpush.bf16.msra.mxu3 %v7270_v13 }
 0x2fa   : > { %v3643_v27 = vsel %vm8378_vm8, %v3640_v47, %v3642_v34  ;;  %v3561_v16 = vrot.slane %v3560_v30, 2  ;;  %v3568_v55 = vrot.slane %v3567_v9, 2  ;;  %v3572_v54 = vsel %vm8655_vm3, %v3478_v3, -inf  ;;  %4818 = vmatpush.bf16.msra.mxu0 %v7245_v62 }
 0x2fb   : > { %v3536_v22 = vmax.f32 %v3534_v37, %v3535_v58  ;;  %v3543_v59 = vmax.f32 %v3541_v24, %v3542_v5  ;;  %v3550_v6 = vmax.f32 %v3548_v49, %v3549_v52  ;;  %v3557_v50 = vmax.f32 %v3555_v4, %v3556_v26  ;;  %3644 = vst [vmem:[#allocation5 + $0x2] sm:$0x3] %v3643_v27  ;;  %v3481_v38 = vld.sshfl [vmem:[#allocation1] sm:$0xff pattern:$0x73625140]  ;;  %v7261_v37 = vld [vmem:[#allocation11 + $0x198] sm:$0xff] }
 0x2fc   : > { %v3482_v51 = vld.sshfl [vmem:[#allocation1 + $0x8] sm:$0xff pattern:$0x73625140]  ;;  %v3562_v0 = vmax.f32 %v3560_v30, %v3561_v16  ;;  %v3569_v39 = vmax.f32 %v3567_v9, %v3568_v55  ;;  %v3573_v35 = vrot.slane %v3572_v54, 4  ;;  %v3579_v43 = vsel %vm8656_vm11, %v3479_v44, -inf  ;;  %v7244_v58 = vld [vmem:[#allocation11 + $0x110] sm:$0xff]  ;;  %4831 = vmatpush.bf16.msra.mxu1 %v7253_v15 }
 0x2fd   : > { %v3616_v45 = vpack.c.bf16 %v3543_v59, %v3536_v22  ;;  %v3617_v21 = vpack.c.bf16 %v3557_v50, %v3550_v6  ;;  %v3580_v23 = vrot.slane %v3579_v43, 4  ;;  %v3586_v46 = vsel %vm8657_vm13, %v3481_v38, -inf  ;;  %4844 = vmatpush.bf16.msra.mxu2 %v7261_v37  ;;  %v7252_v27 = vld [vmem:[#allocation11 + $0x150] sm:$0xff]  ;;  %4857 = vmatpush.bf16.msra.mxu3 %v7269_v61  ;;  %v7281_v15 = vld [vmem:[#allocation11 + $0x238] sm:$0xff] }
 0x2fe   : > { %v3563_v14 = vrot.slane %v3562_v0, 1  ;;  %v3570_v8 = vrot.slane %v3569_v39, 1  ;;  %v3574_v7 = vmax.f32 %v3572_v54, %v3573_v35  ;;  %v3587_v10 = vrot.slane %v3586_v46, 4  ;;  %v7260_v16 = vld [vmem:[#allocation11 + $0x190] sm:$0xff]  ;;  %4819 = vmatpush.bf16.msra.mxu0 %v7244_v58  ;;  %v7243_v35 = vld [vmem:[#allocation11 + $0x108] sm:$0xff] }
 0x2ff   : > { %v3646_v33 = vrot.slane %v3616_v45, 3  ;;  %v3655_v60 = vrot.slane %v3617_v21, 3  ;;  %v3484_v12 = vld.sshfl [vmem:[#allocation1 + $0x20] sm:$0xff pattern:$0x73625140]  ;;  %v3581_v20 = vmax.f32 %v3579_v43, %v3580_v23  ;;  %v3593_v53 = vsel %vm8658_vm14, %v3482_v51, -inf }
 0x300   : > { %v3485_v25 = vld.sshfl [vmem:[#allocation1 + $0x28] sm:$0xff pattern:$0x73625140]  ;;  %v3564_v18 = vmax.f32 %v3562_v0, %v3563_v14  ;;  %v3571_v63 = vmax.f32 %v3569_v39, %v3570_v8  ;;  %v3575_v17 = vrot.slane %v3574_v7, 2  ;;  %v3588_v34 = vmax.f32 %v3586_v46, %v3587_v10  ;;  %v7268_v59 = vld [vmem:[#allocation11 + $0x1d0] sm:$0xff]  ;;  %4832 = vmatpush.bf16.msra.mxu1 %v7252_v27  ;;  %v7259_v23 = vld [vmem:[#allocation11 + $0x188] sm:$0xff] }
 0x301   : > { %v3649_v19 = vsel %vm8659_vm9, %v3616_v45, %v3646_v33  ;;  %v3658_v56 = vsel %vm8660_vm1, %v3617_v21, %v3655_v60  ;;  %v3582_v3 = vrot.slane %v3581_v20, 2  ;;  %v3594_v1 = vrot.slane %v3593_v53, 4  ;;  %v3669_v51 = vld [vmem:[#allocation5 + $0x8] sm:$0x3]  ;;  %4845 = vmatpush.bf16.msra.mxu2 %v7260_v16  ;;  %4858 = vmatpush.bf16.msra.mxu3 %v7268_v59  ;;  %v3678_v10 = vld [vmem:[#allocation5 + $0xa] sm:$0x3] }
 0x302   : > { %v3652_v24 = vsel %vm8378_vm8, %v3649_v19, %v3651_v42  ;;  %v3661_v49 = vsel %vm8378_vm8, %v3658_v56, %v3660_v40  ;;  %v3576_v4 = vmax.f32 %v3574_v7, %v3575_v17  ;;  %v3589_v44 = vrot.slane %v3588_v34, 2  ;;  %v7251_v42 = vld [vmem:[#allocation11 + $0x148] sm:$0xff]  ;;  %4820 = vmatpush.bf16.msra.mxu0 %v7243_v35  ;;  %v7242_v60 = vld [vmem:[#allocation11 + $0x100] sm:$0xff]  ;;  %v3687_v19 = vld [vmem:[#allocation5 + $0xc] sm:$0x3] }
 0x303   : > { %3653 = vst [vmem:[#allocation5 + $0x4] sm:$0x3] %v3652_v24  ;;  %v3583_v32 = vmax.f32 %v3581_v20, %v3582_v3  ;;  %v3595_v36 = vmax.f32 %v3593_v53, %v3594_v1  ;;  %v3600_v47 = vsel %vm8661_vm10, %v3484_v12, -inf  ;;  %v3607_v30 = vsel %vm8662_vm7, %v3485_v25, -inf  ;;  %v7267_v40 = vld [vmem:[#allocation11 + $0x1c8] sm:$0xff]  ;;  %v7250_v53 = vld [vmem:[#allocation11 + $0x140] sm:$0xff] }
 0x304   : > { %3662 = vst [vmem:[#allocation5 + $0x6] sm:$0x3] %v3661_v49  ;;  %v3577_v9 = vrot.slane %v3576_v4, 1  ;;  %v3590_v31 = vmax.f32 %v3588_v34, %v3589_v44  ;;  %v3601_v48 = vrot.slane %v3600_v47, 4  ;;  %v3608_v2 = vrot.slane %v3607_v30, 4  ;;  %4833 = vmatpush.bf16.msra.mxu1 %v7251_v42  ;;  %v7258_v25 = vld [vmem:[#allocation11 + $0x180] sm:$0xff] }
 0x305   : > { %v3584_v5 = vrot.slane %v3583_v32, 1  ;;  %v3596_v52 = vrot.slane %v3595_v36, 2  ;;  %v3618_v26 = vpack.c.bf16 %v3571_v63, %v3564_v18  ;;  %4846 = vmatpush.bf16.msra.mxu2 %v7259_v23  ;;  %4859 = vmatpush.bf16.msra.mxu3 %v7267_v40  ;;  %v7266_v34 = vld [vmem:[#allocation11 + $0x1c0] sm:$0xff]  ;;  %v3696_v1 = vld [vmem:[#allocation5 + $0xe] sm:$0x3]  ;;  %v7304_v58 = vld [vmem:[#allocation11 + $0x2f0] sm:$0xff] }
 0x306   : > { %v3578_v55 = vmax.f32 %v3576_v4, %v3577_v9  ;;  %v3591_v54 = vrot.slane %v3590_v31, 1  ;;  %v3602_v57 = vmax.f32 %v3600_v47, %v3601_v48  ;;  %v3609_v22 = vmax.f32 %v3607_v30, %v3608_v2  ;;  %4821 = vmatpush.bf16.msra.mxu0 %v7242_v60  ;;  %v7289_v49 = vld [vmem:[#allocation11 + $0x278] sm:$0xff]  ;;  %v7288_v48 = vld [vmem:[#allocation11 + $0x270] sm:$0xff]  ;;  %v7286_v59 = vld [vmem:[#allocation11 + $0x260] sm:$0xff] }
 0x307   : > { %v3585_v6 = vmax.f32 %v3583_v32, %v3584_v5  ;;  %v3597_v50 = vmax.f32 %v3595_v36, %v3596_v52  ;;  %v3664_v38 = vrot.slane %v3618_v26, 3  ;;  %v7297_v4 = vld [vmem:[#allocation11 + $0x2b8] sm:$0xff]  ;;  %v7296_v2 = vld [vmem:[#allocation11 + $0x2b0] sm:$0xff]  ;;  %v7279_v5 = vld [vmem:[#allocation11 + $0x228] sm:$0xff] }
 0x308   : > { %v3603_v0 = vrot.slane %v3602_v57, 2  ;;  %v3610_v39 = vrot.slane %v3609_v22, 2  ;;  %v3592_v43 = vmax.f32 %v3590_v31, %v3591_v54  ;;  %4834 = vmatpush.bf16.msra.mxu1 %v7250_v53  ;;  %v7305_v44 = vld [vmem:[#allocation11 + $0x2f8] sm:$0xff]  ;;  %v7280_v31 = vld [vmem:[#allocation11 + $0x230] sm:$0xff]  ;;  %v7287_v52 = vld [vmem:[#allocation11 + $0x268] sm:$0xff] }
 0x309   : > { %v3598_v11 = vrot.slane %v3597_v50, 1  ;;  %v3619_v45 = vpack.c.bf16 %v3585_v6, %v3578_v55  ;;  %v3667_v21 = vsel %vm8663_vm2, %v3618_v26, %v3664_v38  ;;  %4847 = vmatpush.bf16.msra.mxu2 %v7258_v25  ;;  %4860 = vmatpush.bf16.msra.mxu3 %v7266_v34  ;;  %v7295_v26 = vld [vmem:[#allocation11 + $0x2a8] sm:$0xff]  ;;  %v7294_v6 = vld [vmem:[#allocation11 + $0x2a0] sm:$0xff]  ;;  %v7277_v38 = vld [vmem:[#allocation11 + $0x218] sm:$0xff] }
 0x30a   : > { %v3604_v46 = vmax.f32 %v3602_v57, %v3603_v0  ;;  %v3611_v28 = vmax.f32 %v3609_v22, %v3610_v39  ;;  %v3670_v41 = vsel %vm8378_vm8, %v3667_v21, %v3669_v51  ;;  %v7278_v22 = vld [vmem:[#allocation11 + $0x220] sm:$0xff]  ;;  %v7285_v51 = vld [vmem:[#allocation11 + $0x258] sm:$0xff]  ;;  %v7276_v35 = vld [vmem:[#allocation11 + $0x210] sm:$0xff] }
 0x30b   : > { %v3699_v14 = vld [vmem:[#allocation5] sm:$0xff]  ;;  %v3599_v8 = vmax.f32 %v3597_v50, %v3598_v11  ;;  %3671 = vst [vmem:[#allocation5 + $0x8] sm:$0x3] %v3670_v41  ;;  %v3673_v7 = vrot.slane %v3619_v45, 3  ;;  %v7302_v50 = vld [vmem:[#allocation11 + $0x2e0] sm:$0xff]  ;;  %v7293_v0 = vld [vmem:[#allocation11 + $0x298] sm:$0xff] }
 0x30c   : > { %v3605_v13 = vrot.slane %v3604_v46, 1  ;;  %v3612_v33 = vrot.slane %v3611_v28, 1  ;;  %3959 = vst [vmem:[#allocation1] ss:$9 sm:$0xff] %v3699_v14  ;;  %v7301_v39 = vld [vmem:[#allocation11 + $0x2d8] sm:$0xff]  ;;  %v7292_v11 = vld [vmem:[#allocation11 + $0x290] sm:$0xff] }
 0x30d   : > { %v3620_v12 = vpack.c.bf16 %v3599_v8, %v3592_v43  ;;  %v3676_v20 = vsel %vm8664_vm6, %v3619_v45, %v3673_v7  ;;  %v7284_v43 = vld [vmem:[#allocation11 + $0x250] sm:$0xff]  ;;  %v7275_v21 = vld [vmem:[#allocation11 + $0x208] sm:$0xff]  ;;  %v7282_v41 = vld [vmem:[#allocation11 + $0x240] sm:$0xff] }
 0x30e   : > { %v3606_v18 = vmax.f32 %v3604_v46, %v3605_v13  ;;  %v3613_v63 = vmax.f32 %v3611_v28, %v3612_v33  ;;  %v3679_v17 = vsel %vm8378_vm8, %v3676_v20, %v3678_v10  ;;  %v7300_v45 = vld [vmem:[#allocation11 + $0x2d0] sm:$0xff]  ;;  %v7283_v42 = vld [vmem:[#allocation11 + $0x248] sm:$0xff]  ;;  %v7274_v28 = vld [vmem:[#allocation11 + $0x200] sm:$0xff] }
 0x30f   : > { %3680 = vst [vmem:[#allocation5 + $0xa] sm:$0x3] %v3679_v17  ;;  %v3682_v62 = vrot.slane %v3620_v12, 3  ;;  %v7291_v23 = vld [vmem:[#allocation11 + $0x288] sm:$0xff]  ;;  %v7290_v40 = vld [vmem:[#allocation11 + $0x280] sm:$0xff]  ;;  %v7313_v8 = vld [vmem:[#allocation11 + $0x338] sm:$0xff] }
 0x310   : > { %v3621_v56 = vpack.c.bf16 %v3613_v63, %v3606_v18  ;;  %v7299_v46 = vld [vmem:[#allocation11 + $0x2c8] sm:$0xff]  ;;  %v7298_v14 = vld [vmem:[#allocation11 + $0x2c0] sm:$0xff]  ;;  %v7321_v7 = vld [vmem:[#allocation11 + $0x378] sm:$0xff] }
 0x311   : > { %v3685_v3 = vsel %vm8665_vm4, %v3620_v12, %v3682_v62  ;;  %v7329_v10 = vld [vmem:[#allocation11 + $0x3b8] sm:$0xff]  ;;  %v7312_v33 = vld [vmem:[#allocation11 + $0x330] sm:$0xff]  ;;  %v7311_v17 = vld [vmem:[#allocation11 + $0x328] sm:$0xff] }
 0x312   : > { %v3688_v37 = vsel %vm8378_vm8, %v3685_v3, %v3687_v19  ;;  %v3691_v24 = vrot.slane %v3621_v56, 3  ;;  %v7337_v13 = vld [vmem:[#allocation11 + $0x3f8] sm:$0xff]  ;;  %v7320_v60 = vld [vmem:[#allocation11 + $0x370] sm:$0xff]  ;;  %v7319_v34 = vld [vmem:[#allocation11 + $0x368] sm:$0xff] }
 0x313   : > { %3689 = vst [vmem:[#allocation5 + $0xc] sm:$0x3] %v3688_v37  ;;  %v3960_v61 = vld [vmem:[#allocation1] sm:$0xff]  ;;  %v3961_v32 = vld [vmem:[#allocation1 + $0x9] sm:$0xff]  ;;  %v3962_v36 = vld [vmem:[#allocation1 + $0x12] sm:$0xff] }
 0x314   : > { %v3694_v47 = vsel %vm8666_vm5, %v3621_v56, %v3691_v24  ;;  %4770 = vmatmul.bf16.vlgmr.msrb.gmra.mxu0 %v3960_v61  ;;  %4783 = vmatmul.bf16.vlgmr.msrb.gmra.mxu1 %v3961_v32  ;;  %v3963_v30 = vld [vmem:[#allocation1 + $0x1b] sm:$0xff]  ;;  %v3964_v27 = vld [vmem:[#allocation1 + $0x24] sm:$0xff]  ;;  %v3965_v16 = vld [vmem:[#allocation1 + $0x2d] sm:$0xff] }
 0x315   : > { %v3697_v9 = vsel %vm8378_vm8, %v3694_v47, %v3696_v1  ;;  %4796 = vmatmul.bf16.vlgmr.msrb.gmra.mxu2 %v3962_v36  ;;  %4809 = vmatmul.bf16.vlgmr.msrb.gmra.mxu3 %v3963_v30  ;;  %v3966_v54 = vld [vmem:[#allocation1 + $0x36] sm:$0xff]  ;;  %v3967_v57 = vld [vmem:[#allocation1 + $0x3f] sm:$0xff]  ;;  %v7309_v37 = vld [vmem:[#allocation11 + $0x318] sm:$0xff]  ;;  %vm5050_vm8 = vcmask 73728  }
 0x316   : > { %3698 = vst [vmem:[#allocation5 + $0xe] sm:$0x3] %v3697_v9  ;;  %4866 = vmatpush.bf16.msrb.mxu0 %v7281_v15  ;;  %4879 = vmatpush.bf16.msrb.mxu1 %v7289_v49  ;;  %v7328_v12 = vld [vmem:[#allocation11 + $0x3b0] sm:$0xff]  ;;  %v7327_v62 = vld [vmem:[#allocation11 + $0x3a8] sm:$0xff]  ;;  %v7310_v56 = vld [vmem:[#allocation11 + $0x320] sm:$0xff] }
 0x317   : > { %4892 = vmatpush.bf16.msrb.mxu2 %v7297_v4  ;;  %4905 = vmatpush.bf16.msrb.mxu3 %v7305_v44  ;;  %v7336_v25 = vld [vmem:[#allocation11 + $0x3f0] sm:$0xff]  ;;  %v7335_v19 = vld [vmem:[#allocation11 + $0x3e8] sm:$0xff]  ;;  %v7318_v3 = vld [vmem:[#allocation11 + $0x360] sm:$0xff] }
 0x318   : > { %v7326_v1 = vld [vmem:[#allocation11 + $0x3a0] sm:$0xff]  ;;  %v7317_v24 = vld [vmem:[#allocation11 + $0x358] sm:$0xff]  ;;  %v7308_v44 = vld [vmem:[#allocation11 + $0x310] sm:$0xff] }
 0x319   : > { %v7334_v15 = vld [vmem:[#allocation11 + $0x3e0] sm:$0xff]  ;;  %v7325_v49 = vld [vmem:[#allocation11 + $0x398] sm:$0xff]  ;;  %v7316_v61 = vld [vmem:[#allocation11 + $0x350] sm:$0xff] }
 0x31a   : > { %4867 = vmatpush.bf16.msrb.mxu0 %v7280_v31  ;;  %4880 = vmatpush.bf16.msrb.mxu1 %v7288_v48  ;;  %v7333_v4 = vld [vmem:[#allocation11 + $0x3d8] sm:$0xff]  ;;  %v7324_v32 = vld [vmem:[#allocation11 + $0x390] sm:$0xff]  ;;  %v7307_v47 = vld [vmem:[#allocation11 + $0x308] sm:$0xff] }
 0x31b   : > { %4893 = vmatpush.bf16.msrb.mxu2 %v7296_v2  ;;  %4906 = vmatpush.bf16.msrb.mxu3 %v7304_v58  ;;  %v7332_v36 = vld [vmem:[#allocation11 + $0x3d0] sm:$0xff]  ;;  %v7315_v30 = vld [vmem:[#allocation11 + $0x348] sm:$0xff]  ;;  %v7306_v48 = vld [vmem:[#allocation11 + $0x300] sm:$0xff] }
 0x31c   : > { %v7323_v9 = vld [vmem:[#allocation11 + $0x388] sm:$0xff]  ;;  %v7314_v2 = vld [vmem:[#allocation11 + $0x340] sm:$0xff] }
 0x31d   : > { %v3700_v55 = vld [vmem:[#allocation5 + $0x8] sm:$0xff]  ;;  %v7331_v31 = vld [vmem:[#allocation11 + $0x3c8] sm:$0xff]  ;;  %v7322_v58 = vld [vmem:[#allocation11 + $0x380] sm:$0xff] }
 0x31e   : > { %4868 = vmatpush.bf16.msrb.mxu0 %v7279_v5  ;;  %4881 = vmatpush.bf16.msrb.mxu1 %v7287_v52  ;;  %3969 = vst [vmem:[#allocation1] ss:$9 sm:$0xff] %v3700_v55  ;;  %v7330_v5 = vld [vmem:[#allocation11 + $0x3c0] sm:$0xff] }
 0x31f   : > { %4894 = vmatpush.bf16.msrb.mxu2 %v7295_v26  ;;  %4907 = vmatpush.bf16.msrb.mxu3 %v7303_v29 }
 0x322   : > { %4869 = vmatpush.bf16.msrb.mxu0 %v7278_v22  ;;  %4882 = vmatpush.bf16.msrb.mxu1 %v7286_v59 }
 0x323   : > { %4895 = vmatpush.bf16.msrb.mxu2 %v7294_v6  ;;  %4908 = vmatpush.bf16.msrb.mxu3 %v7302_v50  ;;  %v7345_v6 = vld [vmem:[%s8593_s7 + $0x38] sm:$0xff] }
 0x324   : > { %4822 = vmatmul.bf16.vlgmr.msra.gmra.mxu0 %v3964_v27  ;;  %4835 = vmatmul.bf16.vlgmr.msra.gmra.mxu1 %v3965_v16 }
 0x325   : > { %4848 = vmatmul.bf16.vlgmr.msra.gmra.mxu2 %v3966_v54  ;;  %4861 = vmatmul.bf16.vlgmr.msra.gmra.mxu3 %v3967_v57  ;;  %v3970_v20 = vld [vmem:[#allocation1] sm:$0xff]  ;;  %v3971_v53 = vld [vmem:[#allocation1 + $0x9] sm:$0xff]  ;;  %v3972_v18 = vld [vmem:[#allocation1 + $0x12] sm:$0xff] }
 0x326   : > { %4870 = vmatpush.bf16.msrb.mxu0 %v7277_v38  ;;  %4883 = vmatpush.bf16.msrb.mxu1 %v7285_v51  ;;  %v3973_v63 = vld [vmem:[#allocation1 + $0x1b] sm:$0xff]  ;;  %v3974_v52 = vld [vmem:[#allocation1 + $0x24] sm:$0xff]  ;;  %v3975_v26 = vld [vmem:[#allocation1 + $0x2d] sm:$0xff] }
 0x327   : > { %4896 = vmatpush.bf16.msrb.mxu2 %v7293_v0  ;;  %4909 = vmatpush.bf16.msrb.mxu3 %v7301_v39  ;;  %v3976_v29 = vld [vmem:[#allocation1 + $0x36] sm:$0xff]  ;;  %v3977_v27 = vld [vmem:[#allocation1 + $0x3f] sm:$0xff] }
 0x328   : > { %v7344_v39 = vld [vmem:[%s8593_s7 + $0x30] sm:$0xff] }
 0x32a   : > { %4871 = vmatpush.bf16.msrb.mxu0 %v7276_v35  ;;  %4884 = vmatpush.bf16.msrb.mxu1 %v7284_v43  ;;  %v7343_v35 = vld [vmem:[%s8593_s7 + $0x28] sm:$0xff] }
 0x32b   : > { %4897 = vmatpush.bf16.msrb.mxu2 %v7292_v11  ;;  %4910 = vmatpush.bf16.msrb.mxu3 %v7300_v45  ;;  %v7342_v45 = vld [vmem:[%s8593_s7 + $0x20] sm:$0xff] }
 0x32e   : > { %4872 = vmatpush.bf16.msrb.mxu0 %v7275_v21  ;;  %4885 = vmatpush.bf16.msrb.mxu1 %v7283_v42 }
 0x32f   : > { %4898 = vmatpush.bf16.msrb.mxu2 %v7291_v23  ;;  %4911 = vmatpush.bf16.msrb.mxu3 %v7299_v46  ;;  %v3957_v23 = vld [vmem:[%s8592_s6] sm:$0x1] }
 0x332   : > { %4873 = vmatpush.bf16.msrb.mxu0 %v7274_v28  ;;  %4886 = vmatpush.bf16.msrb.mxu1 %v7282_v41 }
 0x333   : > { %4899 = vmatpush.bf16.msrb.mxu2 %v7290_v40  ;;  %4912 = vmatpush.bf16.msrb.mxu3 %v7298_v14 }
 0x335   : > { %4874 = vmatmul.bf16.vlgmr.msrb.gmra.mxu0 %v3970_v20  ;;  %4887 = vmatmul.bf16.vlgmr.msrb.gmra.mxu1 %v3971_v53 }
 0x336   : > { %4918 = vmatpush.bf16.msra.mxu0 %v7313_v8  ;;  %4931 = vmatpush.bf16.msra.mxu1 %v7321_v7  ;;  %v7341_v7 = vld [vmem:[%s8593_s7 + $0x18] sm:$0xff] }
 0x337   : > { %4944 = vmatpush.bf16.msra.mxu2 %v7329_v10  ;;  %4957 = vmatpush.bf16.msra.mxu3 %v7337_v13  ;;  %v7340_v13 = vld [vmem:[%s8593_s7 + $0x10] sm:$0xff] }
 0x338   : > { %4900 = vmatmul.bf16.vlgmr.msrb.gmra.mxu2 %v3972_v18  ;;  %4913 = vmatmul.bf16.vlgmr.msrb.gmra.mxu3 %v3973_v63  ;;  %v7339_v63 = vld [vmem:[%s8593_s7 + $0x8] sm:$0xff] }
 0x33a   : > { %4919 = vmatpush.bf16.msra.mxu0 %v7312_v33  ;;  %4932 = vmatpush.bf16.msra.mxu1 %v7320_v60 }
 0x33b   : > { %4945 = vmatpush.bf16.msra.mxu2 %v7328_v12  ;;  %4958 = vmatpush.bf16.msra.mxu3 %v7336_v25 }
 0x33e   : > { %4920 = vmatpush.bf16.msra.mxu0 %v7311_v17  ;;  %4933 = vmatpush.bf16.msra.mxu1 %v7319_v34  ;;  %v7338_v34 = vld [vmem:[%s8593_s7] sm:$0xff] }
 0x33f   : > { %4946 = vmatpush.bf16.msra.mxu2 %v7327_v62  ;;  %4959 = vmatpush.bf16.msra.mxu3 %v7335_v19 }
 0x342   : > { %4921 = vmatpush.bf16.msra.mxu0 %v7310_v56  ;;  %4934 = vmatpush.bf16.msra.mxu1 %v7318_v3 }
 0x343   : > { %4947 = vmatpush.bf16.msra.mxu2 %v7326_v1  ;;  %4960 = vmatpush.bf16.msra.mxu3 %v7334_v15 }
 0x346   : > { %4922 = vmatpush.bf16.msra.mxu0 %v7309_v37  ;;  %4935 = vmatpush.bf16.msra.mxu1 %v7317_v24 }
 0x347   : > { %4948 = vmatpush.bf16.msra.mxu2 %v7325_v49  ;;  %4961 = vmatpush.bf16.msra.mxu3 %v7333_v4 }
 0x34a   : > { %4923 = vmatpush.bf16.msra.mxu0 %v7308_v44  ;;  %4936 = vmatpush.bf16.msra.mxu1 %v7316_v61 }
 0x34b   : > { %4949 = vmatpush.bf16.msra.mxu2 %v7324_v32  ;;  %4962 = vmatpush.bf16.msra.mxu3 %v7332_v36 }
 0x34e   : > { %4924 = vmatpush.bf16.msra.mxu0 %v7307_v47  ;;  %4937 = vmatpush.bf16.msra.mxu1 %v7315_v30 }
 0x34f   : > { %4950 = vmatpush.bf16.msra.mxu2 %v7323_v9  ;;  %4963 = vmatpush.bf16.msra.mxu3 %v7331_v31 }
 0x352   : > { %4925 = vmatpush.bf16.msra.mxu0 %v7306_v48  ;;  %4938 = vmatpush.bf16.msra.mxu1 %v7314_v2 }
 0x353   : > { %4951 = vmatpush.bf16.msra.mxu2 %v7322_v58  ;;  %4964 = vmatpush.bf16.msra.mxu3 %v7330_v5  ;;  %v4988_v5 = vld [vmem:[%s8594_s8] sm:$0x1] }
 0x355   : > { %4926 = vmatmul.bf16.vlgmr.msra.gmra.mxu0 %v3974_v52  ;;  %4939 = vmatmul.bf16.vlgmr.msra.gmra.mxu1 %v3975_v26 }
 0x356   : > { %4952 = vmatmul.bf16.vlgmr.msra.gmra.mxu2 %v3976_v29  ;;  %4965 = vmatmul.bf16.vlgmr.msra.gmra.mxu3 %v3977_v27 }
 0x357   : > { %5037 = vmatpush.bf16.msrb.mxu0 %v7345_v6 }
 0x35b   : > { %5038 = vmatpush.bf16.msrb.mxu0 %v7344_v39 }
 0x35f   : > { %5039 = vmatpush.bf16.msrb.mxu0 %v7343_v35 }
 0x363   : > { %5040 = vmatpush.bf16.msrb.mxu0 %v7342_v45 }
 0x367   : > { %5041 = vmatpush.bf16.msrb.mxu0 %v7341_v7 }
 0x36b   : > { %5042 = vmatpush.bf16.msrb.mxu0 %v7340_v13 }
 0x36f   : > { %5043 = vmatpush.bf16.msrb.mxu0 %v7339_v63 }
 0x373   : > { %5044 = vmatpush.bf16.msrb.mxu0 %v7338_v34 }
 0x391   : > { %v4771_v16 = vpop.f32.mrf.mxu0  ;;  %v4784_v55 = vpop.f32.mrf.mxu1 }
 0x392   : > { %v4772_v46 = vadd.f32 %v4771_v16, %v3957_v23 }
 0x394   : > { %v4785_v40 = vadd.f32 %v4784_v55, %v4772_v46 }
 0x398   : > { %v4797_v54 = vpop.f32.mrf.mxu2  ;;  %v4810_v57 = vpop.f32.mrf.mxu3 }
 0x399   : > { %v4773_v22 = vpop.f32.mrf.mxu0  ;;  %v4786_v59 = vpop.f32.mrf.mxu1  ;;  %v4798_v10 = vadd.f32 %v4797_v54, %v4785_v40 }
 0x39b   : > { %v4811_v33 = vadd.f32 %v4810_v57, %v4798_v10 }
 0x3a0   : > { %v4799_v50 = vpop.f32.mrf.mxu2  ;;  %v4812_v38 = vpop.f32.mrf.mxu3 }
 0x3a1   : > { %v4823_v51 = vpop.f32.mrf.mxu0  ;;  %v4836_v0 = vpop.f32.mrf.mxu1 }
 0x3a2   : > { %v4824_v60 = vadd.f32 %v4823_v51, %v4811_v33 }
 0x3a4   : > { %v4837_v18 = vadd.f32 %v4836_v0, %v4824_v60 }
 0x3a8   : > { %v4849_v43 = vpop.f32.mrf.mxu2  ;;  %v4862_v11 = vpop.f32.mrf.mxu3 }
 0x3a9   : > { %v4825_v21 = vpop.f32.mrf.mxu0  ;;  %v4838_v42 = vpop.f32.mrf.mxu1  ;;  %v4850_v17 = vadd.f32 %v4849_v43, %v4837_v18 }
 0x3ab   : > { %v4863_v56 = vadd.f32 %v4862_v11, %v4850_v17 }
 0x3b0   : > { %v4851_v28 = vpop.f32.mrf.mxu2  ;;  %v4864_v41 = vpop.f32.mrf.mxu3 }
 0x3b2   : > { %v4875_v14 = vpop.f32.mrf.mxu0  ;;  %v4888_v8 = vpop.f32.mrf.mxu1 }
 0x3b3   : > { %v4876_v3 = vadd.f32 %v4875_v14, %v4863_v56 }
 0x3b5   : > { %v4889_v1 = vadd.f32 %v4888_v8, %v4876_v3 }
 0x3ba   : > { %v4877_v53 = vpop.f32.mrf.mxu0  ;;  %v4890_v25 = vpop.f32.mrf.mxu1 }
 0x3bb   : > { %v4901_v12 = vpop.f32.mrf.mxu2  ;;  %v4914_v20 = vpop.f32.mrf.mxu3 }
 0x3bc   : > { %v4902_v15 = vadd.f32 %v4901_v12, %v4889_v1 }
 0x3be   : > { %v4915_v37 = vadd.f32 %v4914_v20, %v4902_v15 }
 0x3c3   : > { %v4903_v62 = vpop.f32.mrf.mxu2  ;;  %v4916_v19 = vpop.f32.mrf.mxu3 }
 0x3d2   : > { %v4927_v24 = vpop.f32.mrf.mxu0  ;;  %v4940_v49 = vpop.f32.mrf.mxu1 }
 0x3d3   : > { %v4928_v4 = vadd.f32 %v4927_v24, %v4915_v37 }
 0x3d5   : > { %v4941_v44 = vadd.f32 %v4940_v49, %v4928_v4 }
 0x3d9   : > { %v4953_v61 = vpop.f32.mrf.mxu2  ;;  %v4966_v32 = vpop.f32.mrf.mxu3 }
 0x3da   : > { %v4954_v36 = vadd.f32 %v4953_v61, %v4941_v44  ;;  %v4929_v47 = vpop.f32.mrf.mxu0  ;;  %v4942_v30 = vpop.f32.mrf.mxu1 }
 0x3dc   : > { %v4967_v9 = vadd.f32 %v4966_v32, %v4954_v36 }
 0x3de   : > { %v4970_v31 = vmax.f32 %v4967_v9, 0.0 }
 0x3e0   : > { %v4971_v48 = vpack.c.bf16 %v4970_v31, %v4970_v31 }
 0x3e1   : > { %v4955_v2 = vpop.f32.mrf.mxu2  ;;  %v4968_v58 = vpop.f32.mrf.mxu3 }
 0x3e2   : > { %5045 = vmatmul.bf16.vlgmr.msrb.gmra.mxu0 %v4971_v48 }
 0x45f   : > { %v5046_v52 = vpop.f32.mrf.mxu0 }
 0x460   : > { %v5047_v26 = vadd.f32 %v5046_v52, %v4988_v5 }
 0x462   : > { %5051 = vst.msk [vmem:[%s374_s3] sm:$0x1] %vm5050_vm8, %v5047_v26 }
 0x463   : > { %7538 = shalt.err (!%p7535_p8)
}
 0x464   : > { %7359 = dma.vmem_to_hbm [thread:$0]  (%p7678_p5), %s5064_s11, 16, %s5066_s18, %s5053_s21  }
 0x467   : > { %v5048_v29 = vpop.f32.mrf.mxu0 }
 0x468 PF: > { %p7381_p9 = scmp.ge.s32.totalorder %s7581_s12, 2  ;;  %s5077_s22 = sand.u32 1, %s7569_s30  }
 0x469   : > { %s5078_s23 = scalar_lea.sflag [#allocation8], %s5077_s22 }
 0x46a   : > { %p7372_p10 = pnand %p7381_p9, %p7682_p6 }
 0x46c   : > { %p7373_p11 = pneg %p7372_p10 }
 0x46e   : > { %7564 = dma.done.wait (%p7373_p11), %s5078_s23, 16  }
 0x46f   : > { %7566 = vsyncadd (%p7373_p11), %s5078_s23, 4294967280  ;;  %s8667_s25 = sld [smem:[#allocation16_spill]]  ;;  %p21_p12 = scmp.ge.s32.totalorder %s7665_s15, 4  }
 0x470   : > { %s8668_s11 = sld [smem:[#allocation17_spill]]  ;;  %s8669_s30 = smov %s7573_s10 }
 0x471   : > { %s8671_s12 = smov %s7665_s15  ;;  %23 = sbr.rel (!%p21_p12) target bundleno = 8 (0x8), region = 106 }
 0x475   : > { %s8670_s10 = smov %s8667_s25 }
 0x476   :  { %5083 = vsyncpa [#allocation7], 1 }
 0x477   :  { %5085 = vsyncpa [#allocation7 + $0x1], 1 }
 0x478   :  { %5086 = vsyncpa [#allocation10], 1 }
 0x479   :  { %5087 = vsyncpa [#allocation8], 1 }
 0x47a   :  { %5089 = vsyncpa [#allocation8 + $0x1], 1 }

</bundles_post_ra>
